<compile_context>
chip_gen: v7x
topology: tpu7x:2x2x1
jax: 0.10.0
libtpu: 0.0.40
codegen_flags: <defaults>
</compile_context>

<pallas_src>
import functools
import math

import jax
import jax.numpy as jnp
from jax.experimental import pallas as pl
from jax.experimental.pallas import tpu as pltpu

_BF16 = jnp.bfloat16


# ----------------------------------------------------------------------------
# Kernel 1: recurrent part of one LSTM layer (input projection pre-computed).
#   gx  : (4, T, B, H) f32   per-gate  x @ Wih^T + (b_ih + b_hh)
#   whh : (4, H, H)   bf16   per-gate recurrent weights (W_hh^T)
# Grid over time blocks; (h, c) carried in VMEM scratch across blocks.
# ----------------------------------------------------------------------------
def lstm_recurrent_kernel(gx_ref, whh_ref, out_ref, cf_ref, h_sc, c_sc):
    tb = pl.program_id(0)
    tt = out_ref.shape[0]                      # timesteps in this block (static)

    @pl.when(tb == 0)
    def _():                                   # zero initial state (PyTorch default)
        h_sc[...] = jnp.zeros_like(h_sc)
        c_sc[...] = jnp.zeros_like(c_sc)

    # Recurrent weights, one (H, H) slab per gate -> no unaligned 4H slicing.
    w_i = whh_ref[0]
    w_f = whh_ref[1]
    w_g = whh_ref[2]
    w_o = whh_ref[3]

    def step(t, carry):
        h, c = carry                            # f32 (B, H)
        hb = h.astype(w_i.dtype)                # bf16 operand for the MXU
        gi = jnp.dot(hb, w_i, preferred_element_type=jnp.float32) + gx_ref[0, t]
        gf = jnp.dot(hb, w_f, preferred_element_type=jnp.float32) + gx_ref[1, t]
        gg = jnp.dot(hb, w_g, preferred_element_type=jnp.float32) + gx_ref[2, t]
        go = jnp.dot(hb, w_o, preferred_element_type=jnp.float32) + gx_ref[3, t]
        i = jax.nn.sigmoid(gi)                  # gate math stays in f32
        f = jax.nn.sigmoid(gf)
        g = jnp.tanh(gg)
        o = jax.nn.sigmoid(go)
        c_new = f * c + i * g
        h_new = o * jnp.tanh(c_new)
        out_ref[t] = h_new.astype(out_ref.dtype)
        return h_new, c_new

    h_last, c_last = jax.lax.fori_loop(
        0, tt, step, (h_sc[...], c_sc[...]), unroll=True)

    h_sc[...] = h_last
    c_sc[...] = c_last

    # Final cell state: written once, on the last time block only.
    @pl.when(tb == pl.num_programs(0) - 1)
    def _():
        cf_ref[...] = c_last


def _pick_time_block(T):
    for tt in (32, 16, 8, 4, 2):
        if T % tt == 0:
            return tt
    return 1


def lstm_recurrent(gx, whh4, out_dtype=_BF16):
    """gx: (4, T, B, H) f32 precomputed input gates; whh4: (4, H, H) bf16.
    Returns (outputs (T, B, H) out_dtype, final cell (B, H) f32)."""
    _, T, B, H = gx.shape
    tt = _pick_time_block(T)
    grid_spec = pltpu.PrefetchScalarGridSpec(
        num_scalar_prefetch=0,
        grid=(T // tt,),
        in_specs=[
            pl.BlockSpec((4, tt, B, H), lambda i: (0, i, 0, 0)),
            pl.BlockSpec((4, H, H), lambda i: (0, 0, 0)),      # constant-index weights
        ],
        out_specs=[
            pl.BlockSpec((tt, B, H), lambda i: (i, 0, 0)),
            pl.BlockSpec((B, H), lambda i: (0, 0)),
        ],
        scratch_shapes=[pltpu.VMEM((B, H), jnp.float32),
                        pltpu.VMEM((B, H), jnp.float32)],
    )
    out_shapes = (jax.ShapeDtypeStruct((T, B, H), out_dtype),
                  jax.ShapeDtypeStruct((B, H), jnp.float32))
    return pl.pallas_call(
        lstm_recurrent_kernel,
        out_shape=out_shapes,
        grid_spec=grid_spec,
        compiler_params=pltpu.CompilerParams(
            dimension_semantics=("arbitrary",),
            vmem_limit_bytes=32 * 1024 * 1024),
    )(gx, whh4)


# ----------------------------------------------------------------------------
# Kernel 2: attention (lane-dense (B, T) layout) + 1-step multi-layer decoder
#           LSTM + final Linear (lane-padded output).
#   enc      : (B, T, H) bf16   encoder outputs, batch-major
#   enc_proj : (B, T, H) f32    enc @ Wa_enc (hoisted to wrapper, avoids in-kernel reshape)
# ----------------------------------------------------------------------------
def attn_decoder_fc_kernel(enc_ref, encp_ref, wad_ref, ba_ref,
                           h0_ref, c0_ref, wih_ref, whh_ref, bd_ref,
                           wfc_ref, bfc_ref,
                           pred_ref, attnw_ref):
    L = h0_ref.shape[0]

    # decoder contribution to the attention energy:  hidden[-1] @ Wa_dec + ba
    dh = h0_ref[L - 1]                                           # (B, H) f32
    dec_part = (jnp.dot(dh.astype(wad_ref.dtype), wad_ref[...],
                        preferred_element_type=jnp.float32)
                + ba_ref[...])                                   # (B, H)

    # energy = tanh([dh ; enc] @ Wa^T + ba), scores = energy.sum(H), softmax over T
    energy = jnp.tanh(encp_ref[...] + dec_part[:, None, :])      # (B, T, H)
    scores = jnp.sum(energy, axis=2)                             # (B, T), T on lanes

    m = jnp.max(scores, axis=-1, keepdims=True)
    e = jnp.exp(scores - m)
    denom = jnp.sum(e, axis=-1, keepdims=True)
    attn = e * pl.reciprocal(denom, approx=True)                 # (B, T)

    enc_f32 = enc_ref[...].astype(jnp.float32)
    context = jnp.sum(attn[:, :, None] * enc_f32, axis=1)        # (B, H)

    # one-step decoder LSTM over L layers (static unroll); per-gate weights.
    inp = context
    for l in range(L):
        h_prev = h0_ref[l]                                       # (B, H) f32
        c_prev = c0_ref[l]
        ib = inp.astype(wih_ref.dtype)
        hb = h_prev.astype(whh_ref.dtype)
        gi = (jnp.dot(ib, wih_ref[0, l], preferred_element_type=jnp.float32)
              + jnp.dot(hb, whh_ref[0, l], preferred_element_type=jnp.float32)
              + bd_ref[0, l])
        gf = (jnp.dot(ib, wih_ref[1, l], preferred_element_type=jnp.float32)
              + jnp.dot(hb, whh_ref[1, l], preferred_element_type=jnp.float32)
              + bd_ref[1, l])
        gg = (jnp.dot(ib, wih_ref[2, l], preferred_element_type=jnp.float32)
              + jnp.dot(hb, whh_ref[2, l], preferred_element_type=jnp.float32)
              + bd_ref[2, l])
        go = (jnp.dot(ib, wih_ref[3, l], preferred_element_type=jnp.float32)
              + jnp.dot(hb, whh_ref[3, l], preferred_element_type=jnp.float32)
              + bd_ref[3, l])
        i = jax.nn.sigmoid(gi)
        f = jax.nn.sigmoid(gf)
        g = jnp.tanh(gg)
        o = jax.nn.sigmoid(go)
        c = f * c_prev + i * g
        inp = o * jnp.tanh(c)                                    # feeds next layer

    # TODO(synk): training-mode dropout on decoder output not implemented (eval identity).
    pred = (jnp.dot(inp.astype(wfc_ref.dtype), wfc_ref[...],
                    preferred_element_type=jnp.float32) + bfc_ref[...])
    pred_ref[...] = pred.astype(pred_ref.dtype)                  # (B, Opad) lane-dense
    attnw_ref[...] = attn.astype(attnw_ref.dtype)                # (B, T), no transpose


def attn_decoder_fc(enc_bth, enc_proj, wa_dec, ba, h0s, c0s,
                    dec_wih, dec_whh, dec_b, wfcT_pad, bfc_pad):
    B, T, _ = enc_bth.shape
    opad = wfcT_pad.shape[1]
    out_shapes = (jax.ShapeDtypeStruct((B, opad), jnp.float32),
                  jax.ShapeDtypeStruct((B, T), jnp.float32))
    return pl.pallas_call(
        attn_decoder_fc_kernel,
        out_shape=out_shapes,
        compiler_params=pltpu.CompilerParams(vmem_limit_bytes=32 * 1024 * 1024),
    )(enc_bth, enc_proj, wa_dec, ba, h0s, c0s, dec_wih, dec_whh, dec_b,
      wfcT_pad, bfc_pad)


# ----------------------------------------------------------------------------
# Parameter construction (deterministic, PyTorch-style uniform(-k, k) init).
# ----------------------------------------------------------------------------
def uniform(key, shape, k):
    return jax.random.uniform(key, shape, jnp.float32, minval=-k, maxval=k)


def init_params(key, input_size, hidden_size, num_layers, output_size):
    H = hidden_size
    k = 1.0 / math.sqrt(H)
    opad = ((output_size + 127) // 128) * 128
    keys = jax.random.split(key, 8 * num_layers + 4)
    it = iter(keys)
    nk = lambda: next(it)

    def gate_major(w, in_dim):
        # torch (4H, in), gate order [i, f, g, o]  ->  (4, in, H)  (i.e. per-gate W^T)
        return jnp.transpose(w.reshape(4, H, in_dim), (0, 2, 1))

    # encoder LSTM
    enc = []
    for l in range(num_layers):
        in_l = input_size if l == 0 else H
        wih = uniform(nk(), (4 * H, in_l), k)
        whh = uniform(nk(), (4 * H, H), k)
        bih = uniform(nk(), (4 * H,), k)
        bhh = uniform(nk(), (4 * H,), k)
        enc.append(dict(
            wih4=gate_major(wih, in_l).astype(_BF16),     # (4, in_l, H)
            whh4=gate_major(whh, H).astype(_BF16),        # (4, H, H)
            b4=(bih + bhh).reshape(4, H),                 # (4, H) f32
        ))
    params = {"enc": enc}

    # decoder LSTM (input size == H for every layer)
    dwih, dwhh, dbb = [], [], []
    for l in range(num_layers):
        wih = uniform(nk(), (4 * H, H), k)
        whh = uniform(nk(), (4 * H, H), k)
        bih = uniform(nk(), (4 * H,), k)
        bhh = uniform(nk(), (4 * H,), k)
        dwih.append(gate_major(wih, H))
        dwhh.append(gate_major(whh, H))
        dbb.append((bih + bhh).reshape(4, 1, H))
    params["dec_wih"] = jnp.stack(dwih, axis=1).astype(_BF16)   # (4, L, H, H)
    params["dec_whh"] = jnp.stack(dwhh, axis=1).astype(_BF16)   # (4, L, H, H)
    params["dec_b"] = jnp.stack(dbb, axis=1)                    # (4, L, 1, H) f32

    # attention: Linear(2H, H); cat order is [decoder_hidden ; encoder_outputs]
    ka = 1.0 / math.sqrt(2 * H)
    wa = uniform(nk(), (H, 2 * H), ka)
    ba = uniform(nk(), (H,), ka)
    params["wa_dec"] = wa[:, :H].T.astype(_BF16)                # (H, H)
    params["wa_enc"] = wa[:, H:].T.astype(_BF16)                # (H, H)
    params["ba"] = ba.reshape(1, H)

    # fc_out: Linear(H, output_size).  (PyTorch re-creates it with fresh random weights
    # every forward; here it is deterministic.)  Columns zero-padded to a multiple of
    # 128 so the kernel's prediction store is lane-dense.
    wfc = uniform(nk(), (output_size, H), k)
    bfc = uniform(nk(), (output_size,), k)
    wfcT = jnp.zeros((H, opad), jnp.float32).at[:, :output_size].set(wfc.T)
    bfcp = jnp.zeros((1, opad), jnp.float32).at[:, :output_size].set(bfc)
    params["wfcT_pad"] = wfcT.astype(_BF16)
    params["bfc_pad"] = bfcp
    return params


# ----------------------------------------------------------------------------
# Full forward (matches ALSTM.forward in eval mode).
# ----------------------------------------------------------------------------
@functools.partial(jax.jit, static_argnames=("output_size",))
def alstm_forward(params, x_bti, output_size):
    L = params["dec_wih"].shape[1]

    x_tbi = jnp.transpose(x_bti, (1, 0, 2))                     # time-major (T, B, I)

    # Encoder: L stacked LSTM layers, zero initial state.  For each layer the input
    # projection is done as ONE batched matmul over all T*B rows (hoisted out of the
    # recurrence), then the Pallas kernel runs the serial recurrence only.
    layer_in = x_tbi
    h_fin, c_fin = [], []
    for l in range(L):
        p = params["enc"][l]
        gx = jnp.einsum("tbi,gih->gtbh",
                        layer_in.astype(_BF16), p["wih4"],
                        preferred_element_type=jnp.float32) + p["b4"][:, None, None, :]
        out, cf = lstm_recurrent(gx, p["whh4"])                 # out: (T, B, H) bf16
        h_fin.append(out[-1].astype(jnp.float32))               # final hidden = last step
        c_fin.append(cf)
        layer_in = out
    enc_tbh = layer_in                                          # (T, B, H) bf16
    hidden = jnp.stack(h_fin)                                   # (L, B, H) f32
    cell = jnp.stack(c_fin)                                     # (L, B, H) f32

    # Attention inputs in lane-dense batch-major layout; enc @ Wa_enc hoisted here so
    # the kernel never reshapes (T*B, H) internally.
    enc_bth = jnp.transpose(enc_tbh, (1, 0, 2))                 # (B, T, H) bf16
    enc_proj = jnp.einsum("bth,hk->btk", enc_bth, params["wa_enc"],
                          preferred_element_type=jnp.float32)   # (B, T, H) f32

    pred_pad, attn_weights = attn_decoder_fc(
        enc_bth, enc_proj, params["wa_dec"], params["ba"],
        hidden, cell,
        params["dec_wih"], params["dec_whh"], params["dec_b"],
        params["wfcT_pad"], params["bfc_pad"])

    predictions = pred_pad[:, :output_size]                     # drop lane padding
    return predictions, attn_weights


if __name__ == "__main__":
    B, T, input_size = 2, 8, 4
    hidden_size, num_layers, output_size = 32, 2, 4

    key = jax.random.PRNGKey(0)
    kx, kp = jax.random.split(key)
    x = jax.random.normal(kx, (B, T, input_size), jnp.float32)
    params = init_params(kp, input_size, hidden_size, num_layers, output_size)

    preds, attn = alstm_forward(params, x, output_size)
    jax.block_until_ready((preds, attn))

    assert preds.shape == (B, output_size)
    assert attn.shape == (B, T)
    assert bool(jnp.all(jnp.isfinite(preds)))
    assert bool(jnp.all(jnp.isfinite(attn)))
    print("KERNEL_OK")
</pallas_src>

<mosaic_0001>
module attributes {stable_mosaic.version = 11 : i64} {
  func.func @lstm_recurrent_kernel(%arg0: i32, %arg1: memref<4x8x2x32xf32, #tpu.memory_space<vmem>>, %arg2: memref<4x32x32xbf16, #tpu.memory_space<vmem>>, %arg3: memref<8x2x32xbf16, #tpu.memory_space<vmem>>, %arg4: memref<2x32xf32, #tpu.memory_space<vmem>>, %arg5: memref<2x32xf32, #tpu.memory_space<vmem>>, %arg6: memref<2x32xf32, #tpu.memory_space<vmem>>) attributes {dimension_semantics = [#tpu.dimension_semantics<arbitrary>], iteration_bounds = array<i64: 1>, scalar_prefetch = 0 : i64, scratch_operands = 2 : i64, tpu.core_type = #tpu.core_type<tc>, window_params = [{transform_indices = @transform_0, window_bounds = array<i64: 4, 8, 2, 32>}, {pipeline_mode = #tpu.pipeline_mode<synchronous>, transform_indices = @transform_1, window_bounds = array<i64: 4, 32, 32>}, {transform_indices = @transform_2, window_bounds = array<i64: 8, 2, 32>}, {pipeline_mode = #tpu.pipeline_mode<synchronous>, transform_indices = @transform_3, window_bounds = array<i64: 2, 32>}]} {
    %c0_i32 = arith.constant 0 : i32
    %0 = arith.cmpi eq, %arg0, %c0_i32 : i32
    %1 = arith.extui %0 : i1 to i32
    %c0_i32_0 = arith.constant 0 : i32
    %2 = arith.cmpi ne, %1, %c0_i32_0 : i32
    scf.if %2 {
      %cst_187 = arith.constant 0.000000e+00 : f32
      %394 = vector.broadcast %cst_187 : f32 to vector<2x32xf32>
      %c0_188 = arith.constant 0 : index
      %c0_189 = arith.constant 0 : index
      %395 = vector.load %arg5[%c0_188, %c0_189] : memref<2x32xf32, #tpu.memory_space<vmem>>, vector<2x32xf32>
      tpu.vector_store %arg5[%c0_188, %c0_189], %394 {strides = array<i32>} : memref<2x32xf32, #tpu.memory_space<vmem>>, vector<2x32xf32>,
      %cst_190 = arith.constant 0.000000e+00 : f32
      %396 = vector.broadcast %cst_190 : f32 to vector<2x32xf32>
      %c0_191 = arith.constant 0 : index
      %c0_192 = arith.constant 0 : index
      %397 = vector.load %arg6[%c0_191, %c0_192] : memref<2x32xf32, #tpu.memory_space<vmem>>, vector<2x32xf32>
      tpu.vector_store %arg6[%c0_191, %c0_192], %396 {strides = array<i32>} : memref<2x32xf32, #tpu.memory_space<vmem>>, vector<2x32xf32>,
    } else {
    }
    %c0 = arith.constant 0 : index
    %c0_1 = arith.constant 0 : index
    %c0_2 = arith.constant 0 : index
    %3 = vector.load %arg2[%c0, %c0_1, %c0_2] : memref<4x32x32xbf16, #tpu.memory_space<vmem>>, vector<1x32x32xbf16>
    %4 = vector.shape_cast %3 : vector<1x32x32xbf16> to vector<32x32xbf16>
    %c1 = arith.constant 1 : index
    %c0_3 = arith.constant 0 : index
    %c0_4 = arith.constant 0 : index
    %5 = vector.load %arg2[%c1, %c0_3, %c0_4] : memref<4x32x32xbf16, #tpu.memory_space<vmem>>, vector<1x32x32xbf16>
    %6 = vector.shape_cast %5 : vector<1x32x32xbf16> to vector<32x32xbf16>
    %c2 = arith.constant 2 : index
    %c0_5 = arith.constant 0 : index
    %c0_6 = arith.constant 0 : index
    %7 = vector.load %arg2[%c2, %c0_5, %c0_6] : memref<4x32x32xbf16, #tpu.memory_space<vmem>>, vector<1x32x32xbf16>
    %8 = vector.shape_cast %7 : vector<1x32x32xbf16> to vector<32x32xbf16>
    %c3 = arith.constant 3 : index
    %c0_7 = arith.constant 0 : index
    %c0_8 = arith.constant 0 : index
    %9 = vector.load %arg2[%c3, %c0_7, %c0_8] : memref<4x32x32xbf16, #tpu.memory_space<vmem>>, vector<1x32x32xbf16>
    %10 = vector.shape_cast %9 : vector<1x32x32xbf16> to vector<32x32xbf16>
    %c0_9 = arith.constant 0 : index
    %c0_10 = arith.constant 0 : index
    %11 = vector.load %arg5[%c0_9, %c0_10] : memref<2x32xf32, #tpu.memory_space<vmem>>, vector<2x32xf32>
    %c0_11 = arith.constant 0 : index
    %c0_12 = arith.constant 0 : index
    %12 = vector.load %arg6[%c0_11, %c0_12] : memref<2x32xf32, #tpu.memory_space<vmem>>, vector<2x32xf32>
    %c0_i32_13 = arith.constant 0 : i32
    %13 = arith.truncf %11 : vector<2x32xf32> to vector<2x32xbf16>
    %cst = arith.constant dense<0.000000e+00> : vector<2x32xf32>
    %14 = tpu.matmul %13, %4, %cst {dimension_numbers = #tpu.dot_dimension_numbers<[1], [0], [0], [1], [0, 0, 1, 1], [], []>} : vector<2x32xbf16>, vector<32x32xbf16>, vector<2x32xf32> -> vector<2x32xf32>
    %c0_14 = arith.constant 0 : index
    %15 = arith.index_cast %c0_i32_13 : i32 to index
    %c0_15 = arith.constant 0 : index
    %c0_16 = arith.constant 0 : index
    %16 = vector.load %arg1[%c0_14, %15, %c0_15, %c0_16] : memref<4x8x2x32xf32, #tpu.memory_space<vmem>>, vector<1x1x2x32xf32>
    %17 = vector.shape_cast %16 : vector<1x1x2x32xf32> to vector<2x32xf32>
    %18 = arith.addf %14, %17 : vector<2x32xf32>
    %cst_17 = arith.constant dense<0.000000e+00> : vector<2x32xf32>
    %19 = tpu.matmul %13, %6, %cst_17 {dimension_numbers = #tpu.dot_dimension_numbers<[1], [0], [0], [1], [0, 0, 1, 1], [], []>} : vector<2x32xbf16>, vector<32x32xbf16>, vector<2x32xf32> -> vector<2x32xf32>
    %c1_18 = arith.constant 1 : index
    %20 = arith.index_cast %c0_i32_13 : i32 to index
    %c0_19 = arith.constant 0 : index
    %c0_20 = arith.constant 0 : index
    %21 = vector.load %arg1[%c1_18, %20, %c0_19, %c0_20] : memref<4x8x2x32xf32, #tpu.memory_space<vmem>>, vector<1x1x2x32xf32>
    %22 = vector.shape_cast %21 : vector<1x1x2x32xf32> to vector<2x32xf32>
    %23 = arith.addf %19, %22 : vector<2x32xf32>
    %cst_21 = arith.constant dense<0.000000e+00> : vector<2x32xf32>
    %24 = tpu.matmul %13, %8, %cst_21 {dimension_numbers = #tpu.dot_dimension_numbers<[1], [0], [0], [1], [0, 0, 1, 1], [], []>} : vector<2x32xbf16>, vector<32x32xbf16>, vector<2x32xf32> -> vector<2x32xf32>
    %c2_22 = arith.constant 2 : index
    %25 = arith.index_cast %c0_i32_13 : i32 to index
    %c0_23 = arith.constant 0 : index
    %c0_24 = arith.constant 0 : index
    %26 = vector.load %arg1[%c2_22, %25, %c0_23, %c0_24] : memref<4x8x2x32xf32, #tpu.memory_space<vmem>>, vector<1x1x2x32xf32>
    %27 = vector.shape_cast %26 : vector<1x1x2x32xf32> to vector<2x32xf32>
    %28 = arith.addf %24, %27 : vector<2x32xf32>
    %cst_25 = arith.constant dense<0.000000e+00> : vector<2x32xf32>
    %29 = tpu.matmul %13, %10, %cst_25 {dimension_numbers = #tpu.dot_dimension_numbers<[1], [0], [0], [1], [0, 0, 1, 1], [], []>} : vector<2x32xbf16>, vector<32x32xbf16>, vector<2x32xf32> -> vector<2x32xf32>
    %c3_26 = arith.constant 3 : index
    %30 = arith.index_cast %c0_i32_13 : i32 to index
    %c0_27 = arith.constant 0 : index
    %c0_28 = arith.constant 0 : index
    %31 = vector.load %arg1[%c3_26, %30, %c0_27, %c0_28] : memref<4x8x2x32xf32, #tpu.memory_space<vmem>>, vector<1x1x2x32xf32>
    %32 = vector.shape_cast %31 : vector<1x1x2x32xf32> to vector<2x32xf32>
    %33 = arith.addf %29, %32 : vector<2x32xf32>
    %34 = arith.negf %18 : vector<2x32xf32>
    %35 = math.exp %34 : vector<2x32xf32>
    %cst_29 = arith.constant 1.000000e+00 : f32
    %36 = vector.broadcast %cst_29 : f32 to vector<2x32xf32>
    %37 = arith.addf %36, %35 : vector<2x32xf32>
    %38 = arith.divf %36, %37 : vector<2x32xf32>
    %39 = arith.negf %23 : vector<2x32xf32>
    %40 = math.exp %39 : vector<2x32xf32>
    %cst_30 = arith.constant 1.000000e+00 : f32
    %41 = vector.broadcast %cst_30 : f32 to vector<2x32xf32>
    %42 = arith.addf %41, %40 : vector<2x32xf32>
    %43 = arith.divf %41, %42 : vector<2x32xf32>
    %44 = math.tanh %28 : vector<2x32xf32>
    %45 = arith.negf %33 : vector<2x32xf32>
    %46 = math.exp %45 : vector<2x32xf32>
    %cst_31 = arith.constant 1.000000e+00 : f32
    %47 = vector.broadcast %cst_31 : f32 to vector<2x32xf32>
    %48 = arith.addf %47, %46 : vector<2x32xf32>
    %49 = arith.divf %47, %48 : vector<2x32xf32>
    %50 = arith.mulf %43, %12 : vector<2x32xf32>
    %51 = arith.mulf %38, %44 : vector<2x32xf32>
    %52 = arith.addf %50, %51 : vector<2x32xf32>
    %53 = math.tanh %52 : vector<2x32xf32>
    %54 = arith.mulf %49, %53 : vector<2x32xf32>
    %55 = arith.truncf %54 : vector<2x32xf32> to vector<2x32xbf16>
    %56 = arith.index_cast %c0_i32_13 : i32 to index
    %c0_32 = arith.constant 0 : index
    %c0_33 = arith.constant 0 : index
    %57 = vector.load %arg3[%56, %c0_32, %c0_33] : memref<8x2x32xbf16, #tpu.memory_space<vmem>>, vector<1x2x32xbf16>
    %58 = vector.shape_cast %57 : vector<1x2x32xbf16> to vector<2x32xbf16>
    %59 = vector.shape_cast %55 : vector<2x32xbf16> to vector<1x2x32xbf16>
    tpu.vector_store %arg3[%56, %c0_32, %c0_33], %59 {strides = array<i32>} : memref<8x2x32xbf16, #tpu.memory_space<vmem>>, vector<1x2x32xbf16>,
    %c1_i32 = arith.constant 1 : i32
    %60 = arith.truncf %54 : vector<2x32xf32> to vector<2x32xbf16>
    %cst_34 = arith.constant dense<0.000000e+00> : vector<2x32xf32>
    %61 = tpu.matmul %60, %4, %cst_34 {dimension_numbers = #tpu.dot_dimension_numbers<[1], [0], [0], [1], [0, 0, 1, 1], [], []>} : vector<2x32xbf16>, vector<32x32xbf16>, vector<2x32xf32> -> vector<2x32xf32>
    %c0_35 = arith.constant 0 : index
    %62 = arith.index_cast %c1_i32 : i32 to index
    %c0_36 = arith.constant 0 : index
    %c0_37 = arith.constant 0 : index
    %63 = vector.load %arg1[%c0_35, %62, %c0_36, %c0_37] : memref<4x8x2x32xf32, #tpu.memory_space<vmem>>, vector<1x1x2x32xf32>
    %64 = vector.shape_cast %63 : vector<1x1x2x32xf32> to vector<2x32xf32>
    %65 = arith.addf %61, %64 : vector<2x32xf32>
    %cst_38 = arith.constant dense<0.000000e+00> : vector<2x32xf32>
    %66 = tpu.matmul %60, %6, %cst_38 {dimension_numbers = #tpu.dot_dimension_numbers<[1], [0], [0], [1], [0, 0, 1, 1], [], []>} : vector<2x32xbf16>, vector<32x32xbf16>, vector<2x32xf32> -> vector<2x32xf32>
    %c1_39 = arith.constant 1 : index
    %67 = arith.index_cast %c1_i32 : i32 to index
    %c0_40 = arith.constant 0 : index
    %c0_41 = arith.constant 0 : index
    %68 = vector.load %arg1[%c1_39, %67, %c0_40, %c0_41] : memref<4x8x2x32xf32, #tpu.memory_space<vmem>>, vector<1x1x2x32xf32>
    %69 = vector.shape_cast %68 : vector<1x1x2x32xf32> to vector<2x32xf32>
    %70 = arith.addf %66, %69 : vector<2x32xf32>
    %cst_42 = arith.constant dense<0.000000e+00> : vector<2x32xf32>
    %71 = tpu.matmul %60, %8, %cst_42 {dimension_numbers = #tpu.dot_dimension_numbers<[1], [0], [0], [1], [0, 0, 1, 1], [], []>} : vector<2x32xbf16>, vector<32x32xbf16>, vector<2x32xf32> -> vector<2x32xf32>
    %c2_43 = arith.constant 2 : index
    %72 = arith.index_cast %c1_i32 : i32 to index
    %c0_44 = arith.constant 0 : index
    %c0_45 = arith.constant 0 : index
    %73 = vector.load %arg1[%c2_43, %72, %c0_44, %c0_45] : memref<4x8x2x32xf32, #tpu.memory_space<vmem>>, vector<1x1x2x32xf32>
    %74 = vector.shape_cast %73 : vector<1x1x2x32xf32> to vector<2x32xf32>
    %75 = arith.addf %71, %74 : vector<2x32xf32>
    %cst_46 = arith.constant dense<0.000000e+00> : vector<2x32xf32>
    %76 = tpu.matmul %60, %10, %cst_46 {dimension_numbers = #tpu.dot_dimension_numbers<[1], [0], [0], [1], [0, 0, 1, 1], [], []>} : vector<2x32xbf16>, vector<32x32xbf16>, vector<2x32xf32> -> vector<2x32xf32>
    %c3_47 = arith.constant 3 : index
    %77 = arith.index_cast %c1_i32 : i32 to index
    %c0_48 = arith.constant 0 : index
    %c0_49 = arith.constant 0 : index
    %78 = vector.load %arg1[%c3_47, %77, %c0_48, %c0_49] : memref<4x8x2x32xf32, #tpu.memory_space<vmem>>, vector<1x1x2x32xf32>
    %79 = vector.shape_cast %78 : vector<1x1x2x32xf32> to vector<2x32xf32>
    %80 = arith.addf %76, %79 : vector<2x32xf32>
    %81 = arith.negf %65 : vector<2x32xf32>
    %82 = math.exp %81 : vector<2x32xf32>
    %cst_50 = arith.constant 1.000000e+00 : f32
    %83 = vector.broadcast %cst_50 : f32 to vector<2x32xf32>
    %84 = arith.addf %83, %82 : vector<2x32xf32>
    %85 = arith.divf %83, %84 : vector<2x32xf32>
    %86 = arith.negf %70 : vector<2x32xf32>
    %87 = math.exp %86 : vector<2x32xf32>
    %cst_51 = arith.constant 1.000000e+00 : f32
    %88 = vector.broadcast %cst_51 : f32 to vector<2x32xf32>
    %89 = arith.addf %88, %87 : vector<2x32xf32>
    %90 = arith.divf %88, %89 : vector<2x32xf32>
    %91 = math.tanh %75 : vector<2x32xf32>
    %92 = arith.negf %80 : vector<2x32xf32>
    %93 = math.exp %92 : vector<2x32xf32>
    %cst_52 = arith.constant 1.000000e+00 : f32
    %94 = vector.broadcast %cst_52 : f32 to vector<2x32xf32>
    %95 = arith.addf %94, %93 : vector<2x32xf32>
    %96 = arith.divf %94, %95 : vector<2x32xf32>
    %97 = arith.mulf %90, %52 : vector<2x32xf32>
    %98 = arith.mulf %85, %91 : vector<2x32xf32>
    %99 = arith.addf %97, %98 : vector<2x32xf32>
    %100 = math.tanh %99 : vector<2x32xf32>
    %101 = arith.mulf %96, %100 : vector<2x32xf32>
    %102 = arith.truncf %101 : vector<2x32xf32> to vector<2x32xbf16>
    %103 = arith.index_cast %c1_i32 : i32 to index
    %c0_53 = arith.constant 0 : index
    %c0_54 = arith.constant 0 : index
    %104 = vector.load %arg3[%103, %c0_53, %c0_54] : memref<8x2x32xbf16, #tpu.memory_space<vmem>>, vector<1x2x32xbf16>
    %105 = vector.shape_cast %104 : vector<1x2x32xbf16> to vector<2x32xbf16>
    %106 = vector.shape_cast %102 : vector<2x32xbf16> to vector<1x2x32xbf16>
    tpu.vector_store %arg3[%103, %c0_53, %c0_54], %106 {strides = array<i32>} : memref<8x2x32xbf16, #tpu.memory_space<vmem>>, vector<1x2x32xbf16>,
    %c2_i32 = arith.constant 2 : i32
    %107 = arith.truncf %101 : vector<2x32xf32> to vector<2x32xbf16>
    %cst_55 = arith.constant dense<0.000000e+00> : vector<2x32xf32>
    %108 = tpu.matmul %107, %4, %cst_55 {dimension_numbers = #tpu.dot_dimension_numbers<[1], [0], [0], [1], [0, 0, 1, 1], [], []>} : vector<2x32xbf16>, vector<32x32xbf16>, vector<2x32xf32> -> vector<2x32xf32>
    %c0_56 = arith.constant 0 : index
    %109 = arith.index_cast %c2_i32 : i32 to index
    %c0_57 = arith.constant 0 : index
    %c0_58 = arith.constant 0 : index
    %110 = vector.load %arg1[%c0_56, %109, %c0_57, %c0_58] : memref<4x8x2x32xf32, #tpu.memory_space<vmem>>, vector<1x1x2x32xf32>
    %111 = vector.shape_cast %110 : vector<1x1x2x32xf32> to vector<2x32xf32>
    %112 = arith.addf %108, %111 : vector<2x32xf32>
    %cst_59 = arith.constant dense<0.000000e+00> : vector<2x32xf32>
    %113 = tpu.matmul %107, %6, %cst_59 {dimension_numbers = #tpu.dot_dimension_numbers<[1], [0], [0], [1], [0, 0, 1, 1], [], []>} : vector<2x32xbf16>, vector<32x32xbf16>, vector<2x32xf32> -> vector<2x32xf32>
    %c1_60 = arith.constant 1 : index
    %114 = arith.index_cast %c2_i32 : i32 to index
    %c0_61 = arith.constant 0 : index
    %c0_62 = arith.constant 0 : index
    %115 = vector.load %arg1[%c1_60, %114, %c0_61, %c0_62] : memref<4x8x2x32xf32, #tpu.memory_space<vmem>>, vector<1x1x2x32xf32>
    %116 = vector.shape_cast %115 : vector<1x1x2x32xf32> to vector<2x32xf32>
    %117 = arith.addf %113, %116 : vector<2x32xf32>
    %cst_63 = arith.constant dense<0.000000e+00> : vector<2x32xf32>
    %118 = tpu.matmul %107, %8, %cst_63 {dimension_numbers = #tpu.dot_dimension_numbers<[1], [0], [0], [1], [0, 0, 1, 1], [], []>} : vector<2x32xbf16>, vector<32x32xbf16>, vector<2x32xf32> -> vector<2x32xf32>
    %c2_64 = arith.constant 2 : index
    %119 = arith.index_cast %c2_i32 : i32 to index
    %c0_65 = arith.constant 0 : index
    %c0_66 = arith.constant 0 : index
    %120 = vector.load %arg1[%c2_64, %119, %c0_65, %c0_66] : memref<4x8x2x32xf32, #tpu.memory_space<vmem>>, vector<1x1x2x32xf32>
    %121 = vector.shape_cast %120 : vector<1x1x2x32xf32> to vector<2x32xf32>
    %122 = arith.addf %118, %121 : vector<2x32xf32>
    %cst_67 = arith.constant dense<0.000000e+00> : vector<2x32xf32>
    %123 = tpu.matmul %107, %10, %cst_67 {dimension_numbers = #tpu.dot_dimension_numbers<[1], [0], [0], [1], [0, 0, 1, 1], [], []>} : vector<2x32xbf16>, vector<32x32xbf16>, vector<2x32xf32> -> vector<2x32xf32>
    %c3_68 = arith.constant 3 : index
    %124 = arith.index_cast %c2_i32 : i32 to index
    %c0_69 = arith.constant 0 : index
    %c0_70 = arith.constant 0 : index
    %125 = vector.load %arg1[%c3_68, %124, %c0_69, %c0_70] : memref<4x8x2x32xf32, #tpu.memory_space<vmem>>, vector<1x1x2x32xf32>
    %126 = vector.shape_cast %125 : vector<1x1x2x32xf32> to vector<2x32xf32>
    %127 = arith.addf %123, %126 : vector<2x32xf32>
    %128 = arith.negf %112 : vector<2x32xf32>
    %129 = math.exp %128 : vector<2x32xf32>
    %cst_71 = arith.constant 1.000000e+00 : f32
    %130 = vector.broadcast %cst_71 : f32 to vector<2x32xf32>
    %131 = arith.addf %130, %129 : vector<2x32xf32>
    %132 = arith.divf %130, %131 : vector<2x32xf32>
    %133 = arith.negf %117 : vector<2x32xf32>
    %134 = math.exp %133 : vector<2x32xf32>
    %cst_72 = arith.constant 1.000000e+00 : f32
    %135 = vector.broadcast %cst_72 : f32 to vector<2x32xf32>
    %136 = arith.addf %135, %134 : vector<2x32xf32>
    %137 = arith.divf %135, %136 : vector<2x32xf32>
    %138 = math.tanh %122 : vector<2x32xf32>
    %139 = arith.negf %127 : vector<2x32xf32>
    %140 = math.exp %139 : vector<2x32xf32>
    %cst_73 = arith.constant 1.000000e+00 : f32
    %141 = vector.broadcast %cst_73 : f32 to vector<2x32xf32>
    %142 = arith.addf %141, %140 : vector<2x32xf32>
    %143 = arith.divf %141, %142 : vector<2x32xf32>
    %144 = arith.mulf %137, %99 : vector<2x32xf32>
    %145 = arith.mulf %132, %138 : vector<2x32xf32>
    %146 = arith.addf %144, %145 : vector<2x32xf32>
    %147 = math.tanh %146 : vector<2x32xf32>
    %148 = arith.mulf %143, %147 : vector<2x32xf32>
    %149 = arith.truncf %148 : vector<2x32xf32> to vector<2x32xbf16>
    %150 = arith.index_cast %c2_i32 : i32 to index
    %c0_74 = arith.constant 0 : index
    %c0_75 = arith.constant 0 : index
    %151 = vector.load %arg3[%150, %c0_74, %c0_75] : memref<8x2x32xbf16, #tpu.memory_space<vmem>>, vector<1x2x32xbf16>
    %152 = vector.shape_cast %151 : vector<1x2x32xbf16> to vector<2x32xbf16>
    %153 = vector.shape_cast %149 : vector<2x32xbf16> to vector<1x2x32xbf16>
    tpu.vector_store %arg3[%150, %c0_74, %c0_75], %153 {strides = array<i32>} : memref<8x2x32xbf16, #tpu.memory_space<vmem>>, vector<1x2x32xbf16>,
    %c3_i32 = arith.constant 3 : i32
    %154 = arith.truncf %148 : vector<2x32xf32> to vector<2x32xbf16>
    %cst_76 = arith.constant dense<0.000000e+00> : vector<2x32xf32>
    %155 = tpu.matmul %154, %4, %cst_76 {dimension_numbers = #tpu.dot_dimension_numbers<[1], [0], [0], [1], [0, 0, 1, 1], [], []>} : vector<2x32xbf16>, vector<32x32xbf16>, vector<2x32xf32> -> vector<2x32xf32>
    %c0_77 = arith.constant 0 : index
    %156 = arith.index_cast %c3_i32 : i32 to index
    %c0_78 = arith.constant 0 : index
    %c0_79 = arith.constant 0 : index
    %157 = vector.load %arg1[%c0_77, %156, %c0_78, %c0_79] : memref<4x8x2x32xf32, #tpu.memory_space<vmem>>, vector<1x1x2x32xf32>
    %158 = vector.shape_cast %157 : vector<1x1x2x32xf32> to vector<2x32xf32>
    %159 = arith.addf %155, %158 : vector<2x32xf32>
    %cst_80 = arith.constant dense<0.000000e+00> : vector<2x32xf32>
    %160 = tpu.matmul %154, %6, %cst_80 {dimension_numbers = #tpu.dot_dimension_numbers<[1], [0], [0], [1], [0, 0, 1, 1], [], []>} : vector<2x32xbf16>, vector<32x32xbf16>, vector<2x32xf32> -> vector<2x32xf32>
    %c1_81 = arith.constant 1 : index
    %161 = arith.index_cast %c3_i32 : i32 to index
    %c0_82 = arith.constant 0 : index
    %c0_83 = arith.constant 0 : index
    %162 = vector.load %arg1[%c1_81, %161, %c0_82, %c0_83] : memref<4x8x2x32xf32, #tpu.memory_space<vmem>>, vector<1x1x2x32xf32>
    %163 = vector.shape_cast %162 : vector<1x1x2x32xf32> to vector<2x32xf32>
    %164 = arith.addf %160, %163 : vector<2x32xf32>
    %cst_84 = arith.constant dense<0.000000e+00> : vector<2x32xf32>
    %165 = tpu.matmul %154, %8, %cst_84 {dimension_numbers = #tpu.dot_dimension_numbers<[1], [0], [0], [1], [0, 0, 1, 1], [], []>} : vector<2x32xbf16>, vector<32x32xbf16>, vector<2x32xf32> -> vector<2x32xf32>
    %c2_85 = arith.constant 2 : index
    %166 = arith.index_cast %c3_i32 : i32 to index
    %c0_86 = arith.constant 0 : index
    %c0_87 = arith.constant 0 : index
    %167 = vector.load %arg1[%c2_85, %166, %c0_86, %c0_87] : memref<4x8x2x32xf32, #tpu.memory_space<vmem>>, vector<1x1x2x32xf32>
    %168 = vector.shape_cast %167 : vector<1x1x2x32xf32> to vector<2x32xf32>
    %169 = arith.addf %165, %168 : vector<2x32xf32>
    %cst_88 = arith.constant dense<0.000000e+00> : vector<2x32xf32>
    %170 = tpu.matmul %154, %10, %cst_88 {dimension_numbers = #tpu.dot_dimension_numbers<[1], [0], [0], [1], [0, 0, 1, 1], [], []>} : vector<2x32xbf16>, vector<32x32xbf16>, vector<2x32xf32> -> vector<2x32xf32>
    %c3_89 = arith.constant 3 : index
    %171 = arith.index_cast %c3_i32 : i32 to index
    %c0_90 = arith.constant 0 : index
    %c0_91 = arith.constant 0 : index
    %172 = vector.load %arg1[%c3_89, %171, %c0_90, %c0_91] : memref<4x8x2x32xf32, #tpu.memory_space<vmem>>, vector<1x1x2x32xf32>
    %173 = vector.shape_cast %172 : vector<1x1x2x32xf32> to vector<2x32xf32>
    %174 = arith.addf %170, %173 : vector<2x32xf32>
    %175 = arith.negf %159 : vector<2x32xf32>
    %176 = math.exp %175 : vector<2x32xf32>
    %cst_92 = arith.constant 1.000000e+00 : f32
    %177 = vector.broadcast %cst_92 : f32 to vector<2x32xf32>
    %178 = arith.addf %177, %176 : vector<2x32xf32>
    %179 = arith.divf %177, %178 : vector<2x32xf32>
    %180 = arith.negf %164 : vector<2x32xf32>
    %181 = math.exp %180 : vector<2x32xf32>
    %cst_93 = arith.constant 1.000000e+00 : f32
    %182 = vector.broadcast %cst_93 : f32 to vector<2x32xf32>
    %183 = arith.addf %182, %181 : vector<2x32xf32>
    %184 = arith.divf %182, %183 : vector<2x32xf32>
    %185 = math.tanh %169 : vector<2x32xf32>
    %186 = arith.negf %174 : vector<2x32xf32>
    %187 = math.exp %186 : vector<2x32xf32>
    %cst_94 = arith.constant 1.000000e+00 : f32
    %188 = vector.broadcast %cst_94 : f32 to vector<2x32xf32>
    %189 = arith.addf %188, %187 : vector<2x32xf32>
    %190 = arith.divf %188, %189 : vector<2x32xf32>
    %191 = arith.mulf %184, %146 : vector<2x32xf32>
    %192 = arith.mulf %179, %185 : vector<2x32xf32>
    %193 = arith.addf %191, %192 : vector<2x32xf32>
    %194 = math.tanh %193 : vector<2x32xf32>
    %195 = arith.mulf %190, %194 : vector<2x32xf32>
    %196 = arith.truncf %195 : vector<2x32xf32> to vector<2x32xbf16>
    %197 = arith.index_cast %c3_i32 : i32 to index
    %c0_95 = arith.constant 0 : index
    %c0_96 = arith.constant 0 : index
    %198 = vector.load %arg3[%197, %c0_95, %c0_96] : memref<8x2x32xbf16, #tpu.memory_space<vmem>>, vector<1x2x32xbf16>
    %199 = vector.shape_cast %198 : vector<1x2x32xbf16> to vector<2x32xbf16>
    %200 = vector.shape_cast %196 : vector<2x32xbf16> to vector<1x2x32xbf16>
    tpu.vector_store %arg3[%197, %c0_95, %c0_96], %200 {strides = array<i32>} : memref<8x2x32xbf16, #tpu.memory_space<vmem>>, vector<1x2x32xbf16>,
    %c4_i32 = arith.constant 4 : i32
    %201 = arith.truncf %195 : vector<2x32xf32> to vector<2x32xbf16>
    %cst_97 = arith.constant dense<0.000000e+00> : vector<2x32xf32>
    %202 = tpu.matmul %201, %4, %cst_97 {dimension_numbers = #tpu.dot_dimension_numbers<[1], [0], [0], [1], [0, 0, 1, 1], [], []>} : vector<2x32xbf16>, vector<32x32xbf16>, vector<2x32xf32> -> vector<2x32xf32>
    %c0_98 = arith.constant 0 : index
    %203 = arith.index_cast %c4_i32 : i32 to index
    %c0_99 = arith.constant 0 : index
    %c0_100 = arith.constant 0 : index
    %204 = vector.load %arg1[%c0_98, %203, %c0_99, %c0_100] : memref<4x8x2x32xf32, #tpu.memory_space<vmem>>, vector<1x1x2x32xf32>
    %205 = vector.shape_cast %204 : vector<1x1x2x32xf32> to vector<2x32xf32>
    %206 = arith.addf %202, %205 : vector<2x32xf32>
    %cst_101 = arith.constant dense<0.000000e+00> : vector<2x32xf32>
    %207 = tpu.matmul %201, %6, %cst_101 {dimension_numbers = #tpu.dot_dimension_numbers<[1], [0], [0], [1], [0, 0, 1, 1], [], []>} : vector<2x32xbf16>, vector<32x32xbf16>, vector<2x32xf32> -> vector<2x32xf32>
    %c1_102 = arith.constant 1 : index
    %208 = arith.index_cast %c4_i32 : i32 to index
    %c0_103 = arith.constant 0 : index
    %c0_104 = arith.constant 0 : index
    %209 = vector.load %arg1[%c1_102, %208, %c0_103, %c0_104] : memref<4x8x2x32xf32, #tpu.memory_space<vmem>>, vector<1x1x2x32xf32>
    %210 = vector.shape_cast %209 : vector<1x1x2x32xf32> to vector<2x32xf32>
    %211 = arith.addf %207, %210 : vector<2x32xf32>
    %cst_105 = arith.constant dense<0.000000e+00> : vector<2x32xf32>
    %212 = tpu.matmul %201, %8, %cst_105 {dimension_numbers = #tpu.dot_dimension_numbers<[1], [0], [0], [1], [0, 0, 1, 1], [], []>} : vector<2x32xbf16>, vector<32x32xbf16>, vector<2x32xf32> -> vector<2x32xf32>
    %c2_106 = arith.constant 2 : index
    %213 = arith.index_cast %c4_i32 : i32 to index
    %c0_107 = arith.constant 0 : index
    %c0_108 = arith.constant 0 : index
    %214 = vector.load %arg1[%c2_106, %213, %c0_107, %c0_108] : memref<4x8x2x32xf32, #tpu.memory_space<vmem>>, vector<1x1x2x32xf32>
    %215 = vector.shape_cast %214 : vector<1x1x2x32xf32> to vector<2x32xf32>
    %216 = arith.addf %212, %215 : vector<2x32xf32>
    %cst_109 = arith.constant dense<0.000000e+00> : vector<2x32xf32>
    %217 = tpu.matmul %201, %10, %cst_109 {dimension_numbers = #tpu.dot_dimension_numbers<[1], [0], [0], [1], [0, 0, 1, 1], [], []>} : vector<2x32xbf16>, vector<32x32xbf16>, vector<2x32xf32> -> vector<2x32xf32>
    %c3_110 = arith.constant 3 : index
    %218 = arith.index_cast %c4_i32 : i32 to index
    %c0_111 = arith.constant 0 : index
    %c0_112 = arith.constant 0 : index
    %219 = vector.load %arg1[%c3_110, %218, %c0_111, %c0_112] : memref<4x8x2x32xf32, #tpu.memory_space<vmem>>, vector<1x1x2x32xf32>
    %220 = vector.shape_cast %219 : vector<1x1x2x32xf32> to vector<2x32xf32>
    %221 = arith.addf %217, %220 : vector<2x32xf32>
    %222 = arith.negf %206 : vector<2x32xf32>
    %223 = math.exp %222 : vector<2x32xf32>
    %cst_113 = arith.constant 1.000000e+00 : f32
    %224 = vector.broadcast %cst_113 : f32 to vector<2x32xf32>
    %225 = arith.addf %224, %223 : vector<2x32xf32>
    %226 = arith.divf %224, %225 : vector<2x32xf32>
    %227 = arith.negf %211 : vector<2x32xf32>
    %228 = math.exp %227 : vector<2x32xf32>
    %cst_114 = arith.constant 1.000000e+00 : f32
    %229 = vector.broadcast %cst_114 : f32 to vector<2x32xf32>
    %230 = arith.addf %229, %228 : vector<2x32xf32>
    %231 = arith.divf %229, %230 : vector<2x32xf32>
    %232 = math.tanh %216 : vector<2x32xf32>
    %233 = arith.negf %221 : vector<2x32xf32>
    %234 = math.exp %233 : vector<2x32xf32>
    %cst_115 = arith.constant 1.000000e+00 : f32
    %235 = vector.broadcast %cst_115 : f32 to vector<2x32xf32>
    %236 = arith.addf %235, %234 : vector<2x32xf32>
    %237 = arith.divf %235, %236 : vector<2x32xf32>
    %238 = arith.mulf %231, %193 : vector<2x32xf32>
    %239 = arith.mulf %226, %232 : vector<2x32xf32>
    %240 = arith.addf %238, %239 : vector<2x32xf32>
    %241 = math.tanh %240 : vector<2x32xf32>
    %242 = arith.mulf %237, %241 : vector<2x32xf32>
    %243 = arith.truncf %242 : vector<2x32xf32> to vector<2x32xbf16>
    %244 = arith.index_cast %c4_i32 : i32 to index
    %c0_116 = arith.constant 0 : index
    %c0_117 = arith.constant 0 : index
    %245 = vector.load %arg3[%244, %c0_116, %c0_117] : memref<8x2x32xbf16, #tpu.memory_space<vmem>>, vector<1x2x32xbf16>
    %246 = vector.shape_cast %245 : vector<1x2x32xbf16> to vector<2x32xbf16>
    %247 = vector.shape_cast %243 : vector<2x32xbf16> to vector<1x2x32xbf16>
    tpu.vector_store %arg3[%244, %c0_116, %c0_117], %247 {strides = array<i32>} : memref<8x2x32xbf16, #tpu.memory_space<vmem>>, vector<1x2x32xbf16>,
    %c5_i32 = arith.constant 5 : i32
    %248 = arith.truncf %242 : vector<2x32xf32> to vector<2x32xbf16>
    %cst_118 = arith.constant dense<0.000000e+00> : vector<2x32xf32>
    %249 = tpu.matmul %248, %4, %cst_118 {dimension_numbers = #tpu.dot_dimension_numbers<[1], [0], [0], [1], [0, 0, 1, 1], [], []>} : vector<2x32xbf16>, vector<32x32xbf16>, vector<2x32xf32> -> vector<2x32xf32>
    %c0_119 = arith.constant 0 : index
    %250 = arith.index_cast %c5_i32 : i32 to index
    %c0_120 = arith.constant 0 : index
    %c0_121 = arith.constant 0 : index
    %251 = vector.load %arg1[%c0_119, %250, %c0_120, %c0_121] : memref<4x8x2x32xf32, #tpu.memory_space<vmem>>, vector<1x1x2x32xf32>
    %252 = vector.shape_cast %251 : vector<1x1x2x32xf32> to vector<2x32xf32>
    %253 = arith.addf %249, %252 : vector<2x32xf32>
    %cst_122 = arith.constant dense<0.000000e+00> : vector<2x32xf32>
    %254 = tpu.matmul %248, %6, %cst_122 {dimension_numbers = #tpu.dot_dimension_numbers<[1], [0], [0], [1], [0, 0, 1, 1], [], []>} : vector<2x32xbf16>, vector<32x32xbf16>, vector<2x32xf32> -> vector<2x32xf32>
    %c1_123 = arith.constant 1 : index
    %255 = arith.index_cast %c5_i32 : i32 to index
    %c0_124 = arith.constant 0 : index
    %c0_125 = arith.constant 0 : index
    %256 = vector.load %arg1[%c1_123, %255, %c0_124, %c0_125] : memref<4x8x2x32xf32, #tpu.memory_space<vmem>>, vector<1x1x2x32xf32>
    %257 = vector.shape_cast %256 : vector<1x1x2x32xf32> to vector<2x32xf32>
    %258 = arith.addf %254, %257 : vector<2x32xf32>
    %cst_126 = arith.constant dense<0.000000e+00> : vector<2x32xf32>
    %259 = tpu.matmul %248, %8, %cst_126 {dimension_numbers = #tpu.dot_dimension_numbers<[1], [0], [0], [1], [0, 0, 1, 1], [], []>} : vector<2x32xbf16>, vector<32x32xbf16>, vector<2x32xf32> -> vector<2x32xf32>
    %c2_127 = arith.constant 2 : index
    %260 = arith.index_cast %c5_i32 : i32 to index
    %c0_128 = arith.constant 0 : index
    %c0_129 = arith.constant 0 : index
    %261 = vector.load %arg1[%c2_127, %260, %c0_128, %c0_129] : memref<4x8x2x32xf32, #tpu.memory_space<vmem>>, vector<1x1x2x32xf32>
    %262 = vector.shape_cast %261 : vector<1x1x2x32xf32> to vector<2x32xf32>
    %263 = arith.addf %259, %262 : vector<2x32xf32>
    %cst_130 = arith.constant dense<0.000000e+00> : vector<2x32xf32>
    %264 = tpu.matmul %248, %10, %cst_130 {dimension_numbers = #tpu.dot_dimension_numbers<[1], [0], [0], [1], [0, 0, 1, 1], [], []>} : vector<2x32xbf16>, vector<32x32xbf16>, vector<2x32xf32> -> vector<2x32xf32>
    %c3_131 = arith.constant 3 : index
    %265 = arith.index_cast %c5_i32 : i32 to index
    %c0_132 = arith.constant 0 : index
    %c0_133 = arith.constant 0 : index
    %266 = vector.load %arg1[%c3_131, %265, %c0_132, %c0_133] : memref<4x8x2x32xf32, #tpu.memory_space<vmem>>, vector<1x1x2x32xf32>
    %267 = vector.shape_cast %266 : vector<1x1x2x32xf32> to vector<2x32xf32>
    %268 = arith.addf %264, %267 : vector<2x32xf32>
    %269 = arith.negf %253 : vector<2x32xf32>
    %270 = math.exp %269 : vector<2x32xf32>
    %cst_134 = arith.constant 1.000000e+00 : f32
    %271 = vector.broadcast %cst_134 : f32 to vector<2x32xf32>
    %272 = arith.addf %271, %270 : vector<2x32xf32>
    %273 = arith.divf %271, %272 : vector<2x32xf32>
    %274 = arith.negf %258 : vector<2x32xf32>
    %275 = math.exp %274 : vector<2x32xf32>
    %cst_135 = arith.constant 1.000000e+00 : f32
    %276 = vector.broadcast %cst_135 : f32 to vector<2x32xf32>
    %277 = arith.addf %276, %275 : vector<2x32xf32>
    %278 = arith.divf %276, %277 : vector<2x32xf32>
    %279 = math.tanh %263 : vector<2x32xf32>
    %280 = arith.negf %268 : vector<2x32xf32>
    %281 = math.exp %280 : vector<2x32xf32>
    %cst_136 = arith.constant 1.000000e+00 : f32
    %282 = vector.broadcast %cst_136 : f32 to vector<2x32xf32>
    %283 = arith.addf %282, %281 : vector<2x32xf32>
    %284 = arith.divf %282, %283 : vector<2x32xf32>
    %285 = arith.mulf %278, %240 : vector<2x32xf32>
    %286 = arith.mulf %273, %279 : vector<2x32xf32>
    %287 = arith.addf %285, %286 : vector<2x32xf32>
    %288 = math.tanh %287 : vector<2x32xf32>
    %289 = arith.mulf %284, %288 : vector<2x32xf32>
    %290 = arith.truncf %289 : vector<2x32xf32> to vector<2x32xbf16>
    %291 = arith.index_cast %c5_i32 : i32 to index
    %c0_137 = arith.constant 0 : index
    %c0_138 = arith.constant 0 : index
    %292 = vector.load %arg3[%291, %c0_137, %c0_138] : memref<8x2x32xbf16, #tpu.memory_space<vmem>>, vector<1x2x32xbf16>
    %293 = vector.shape_cast %292 : vector<1x2x32xbf16> to vector<2x32xbf16>
    %294 = vector.shape_cast %290 : vector<2x32xbf16> to vector<1x2x32xbf16>
    tpu.vector_store %arg3[%291, %c0_137, %c0_138], %294 {strides = array<i32>} : memref<8x2x32xbf16, #tpu.memory_space<vmem>>, vector<1x2x32xbf16>,
    %c6_i32 = arith.constant 6 : i32
    %295 = arith.truncf %289 : vector<2x32xf32> to vector<2x32xbf16>
    %cst_139 = arith.constant dense<0.000000e+00> : vector<2x32xf32>
    %296 = tpu.matmul %295, %4, %cst_139 {dimension_numbers = #tpu.dot_dimension_numbers<[1], [0], [0], [1], [0, 0, 1, 1], [], []>} : vector<2x32xbf16>, vector<32x32xbf16>, vector<2x32xf32> -> vector<2x32xf32>
    %c0_140 = arith.constant 0 : index
    %297 = arith.index_cast %c6_i32 : i32 to index
    %c0_141 = arith.constant 0 : index
    %c0_142 = arith.constant 0 : index
    %298 = vector.load %arg1[%c0_140, %297, %c0_141, %c0_142] : memref<4x8x2x32xf32, #tpu.memory_space<vmem>>, vector<1x1x2x32xf32>
    %299 = vector.shape_cast %298 : vector<1x1x2x32xf32> to vector<2x32xf32>
    %300 = arith.addf %296, %299 : vector<2x32xf32>
    %cst_143 = arith.constant dense<0.000000e+00> : vector<2x32xf32>
    %301 = tpu.matmul %295, %6, %cst_143 {dimension_numbers = #tpu.dot_dimension_numbers<[1], [0], [0], [1], [0, 0, 1, 1], [], []>} : vector<2x32xbf16>, vector<32x32xbf16>, vector<2x32xf32> -> vector<2x32xf32>
    %c1_144 = arith.constant 1 : index
    %302 = arith.index_cast %c6_i32 : i32 to index
    %c0_145 = arith.constant 0 : index
    %c0_146 = arith.constant 0 : index
    %303 = vector.load %arg1[%c1_144, %302, %c0_145, %c0_146] : memref<4x8x2x32xf32, #tpu.memory_space<vmem>>, vector<1x1x2x32xf32>
    %304 = vector.shape_cast %303 : vector<1x1x2x32xf32> to vector<2x32xf32>
    %305 = arith.addf %301, %304 : vector<2x32xf32>
    %cst_147 = arith.constant dense<0.000000e+00> : vector<2x32xf32>
    %306 = tpu.matmul %295, %8, %cst_147 {dimension_numbers = #tpu.dot_dimension_numbers<[1], [0], [0], [1], [0, 0, 1, 1], [], []>} : vector<2x32xbf16>, vector<32x32xbf16>, vector<2x32xf32> -> vector<2x32xf32>
    %c2_148 = arith.constant 2 : index
    %307 = arith.index_cast %c6_i32 : i32 to index
    %c0_149 = arith.constant 0 : index
    %c0_150 = arith.constant 0 : index
    %308 = vector.load %arg1[%c2_148, %307, %c0_149, %c0_150] : memref<4x8x2x32xf32, #tpu.memory_space<vmem>>, vector<1x1x2x32xf32>
    %309 = vector.shape_cast %308 : vector<1x1x2x32xf32> to vector<2x32xf32>
    %310 = arith.addf %306, %309 : vector<2x32xf32>
    %cst_151 = arith.constant dense<0.000000e+00> : vector<2x32xf32>
    %311 = tpu.matmul %295, %10, %cst_151 {dimension_numbers = #tpu.dot_dimension_numbers<[1], [0], [0], [1], [0, 0, 1, 1], [], []>} : vector<2x32xbf16>, vector<32x32xbf16>, vector<2x32xf32> -> vector<2x32xf32>
    %c3_152 = arith.constant 3 : index
    %312 = arith.index_cast %c6_i32 : i32 to index
    %c0_153 = arith.constant 0 : index
    %c0_154 = arith.constant 0 : index
    %313 = vector.load %arg1[%c3_152, %312, %c0_153, %c0_154] : memref<4x8x2x32xf32, #tpu.memory_space<vmem>>, vector<1x1x2x32xf32>
    %314 = vector.shape_cast %313 : vector<1x1x2x32xf32> to vector<2x32xf32>
    %315 = arith.addf %311, %314 : vector<2x32xf32>
    %316 = arith.negf %300 : vector<2x32xf32>
    %317 = math.exp %316 : vector<2x32xf32>
    %cst_155 = arith.constant 1.000000e+00 : f32
    %318 = vector.broadcast %cst_155 : f32 to vector<2x32xf32>
    %319 = arith.addf %318, %317 : vector<2x32xf32>
    %320 = arith.divf %318, %319 : vector<2x32xf32>
    %321 = arith.negf %305 : vector<2x32xf32>
    %322 = math.exp %321 : vector<2x32xf32>
    %cst_156 = arith.constant 1.000000e+00 : f32
    %323 = vector.broadcast %cst_156 : f32 to vector<2x32xf32>
    %324 = arith.addf %323, %322 : vector<2x32xf32>
    %325 = arith.divf %323, %324 : vector<2x32xf32>
    %326 = math.tanh %310 : vector<2x32xf32>
    %327 = arith.negf %315 : vector<2x32xf32>
    %328 = math.exp %327 : vector<2x32xf32>
    %cst_157 = arith.constant 1.000000e+00 : f32
    %329 = vector.broadcast %cst_157 : f32 to vector<2x32xf32>
    %330 = arith.addf %329, %328 : vector<2x32xf32>
    %331 = arith.divf %329, %330 : vector<2x32xf32>
    %332 = arith.mulf %325, %287 : vector<2x32xf32>
    %333 = arith.mulf %320, %326 : vector<2x32xf32>
    %334 = arith.addf %332, %333 : vector<2x32xf32>
    %335 = math.tanh %334 : vector<2x32xf32>
    %336 = arith.mulf %331, %335 : vector<2x32xf32>
    %337 = arith.truncf %336 : vector<2x32xf32> to vector<2x32xbf16>
    %338 = arith.index_cast %c6_i32 : i32 to index
    %c0_158 = arith.constant 0 : index
    %c0_159 = arith.constant 0 : index
    %339 = vector.load %arg3[%338, %c0_158, %c0_159] : memref<8x2x32xbf16, #tpu.memory_space<vmem>>, vector<1x2x32xbf16>
    %340 = vector.shape_cast %339 : vector<1x2x32xbf16> to vector<2x32xbf16>
    %341 = vector.shape_cast %337 : vector<2x32xbf16> to vector<1x2x32xbf16>
    tpu.vector_store %arg3[%338, %c0_158, %c0_159], %341 {strides = array<i32>} : memref<8x2x32xbf16, #tpu.memory_space<vmem>>, vector<1x2x32xbf16>,
    %c7_i32 = arith.constant 7 : i32
    %342 = arith.truncf %336 : vector<2x32xf32> to vector<2x32xbf16>
    %cst_160 = arith.constant dense<0.000000e+00> : vector<2x32xf32>
    %343 = tpu.matmul %342, %4, %cst_160 {dimension_numbers = #tpu.dot_dimension_numbers<[1], [0], [0], [1], [0, 0, 1, 1], [], []>} : vector<2x32xbf16>, vector<32x32xbf16>, vector<2x32xf32> -> vector<2x32xf32>
    %c0_161 = arith.constant 0 : index
    %344 = arith.index_cast %c7_i32 : i32 to index
    %c0_162 = arith.constant 0 : index
    %c0_163 = arith.constant 0 : index
    %345 = vector.load %arg1[%c0_161, %344, %c0_162, %c0_163] : memref<4x8x2x32xf32, #tpu.memory_space<vmem>>, vector<1x1x2x32xf32>
    %346 = vector.shape_cast %345 : vector<1x1x2x32xf32> to vector<2x32xf32>
    %347 = arith.addf %343, %346 : vector<2x32xf32>
    %cst_164 = arith.constant dense<0.000000e+00> : vector<2x32xf32>
    %348 = tpu.matmul %342, %6, %cst_164 {dimension_numbers = #tpu.dot_dimension_numbers<[1], [0], [0], [1], [0, 0, 1, 1], [], []>} : vector<2x32xbf16>, vector<32x32xbf16>, vector<2x32xf32> -> vector<2x32xf32>
    %c1_165 = arith.constant 1 : index
    %349 = arith.index_cast %c7_i32 : i32 to index
    %c0_166 = arith.constant 0 : index
    %c0_167 = arith.constant 0 : index
    %350 = vector.load %arg1[%c1_165, %349, %c0_166, %c0_167] : memref<4x8x2x32xf32, #tpu.memory_space<vmem>>, vector<1x1x2x32xf32>
    %351 = vector.shape_cast %350 : vector<1x1x2x32xf32> to vector<2x32xf32>
    %352 = arith.addf %348, %351 : vector<2x32xf32>
    %cst_168 = arith.constant dense<0.000000e+00> : vector<2x32xf32>
    %353 = tpu.matmul %342, %8, %cst_168 {dimension_numbers = #tpu.dot_dimension_numbers<[1], [0], [0], [1], [0, 0, 1, 1], [], []>} : vector<2x32xbf16>, vector<32x32xbf16>, vector<2x32xf32> -> vector<2x32xf32>
    %c2_169 = arith.constant 2 : index
    %354 = arith.index_cast %c7_i32 : i32 to index
    %c0_170 = arith.constant 0 : index
    %c0_171 = arith.constant 0 : index
    %355 = vector.load %arg1[%c2_169, %354, %c0_170, %c0_171] : memref<4x8x2x32xf32, #tpu.memory_space<vmem>>, vector<1x1x2x32xf32>
    %356 = vector.shape_cast %355 : vector<1x1x2x32xf32> to vector<2x32xf32>
    %357 = arith.addf %353, %356 : vector<2x32xf32>
    %cst_172 = arith.constant dense<0.000000e+00> : vector<2x32xf32>
    %358 = tpu.matmul %342, %10, %cst_172 {dimension_numbers = #tpu.dot_dimension_numbers<[1], [0], [0], [1], [0, 0, 1, 1], [], []>} : vector<2x32xbf16>, vector<32x32xbf16>, vector<2x32xf32> -> vector<2x32xf32>
    %c3_173 = arith.constant 3 : index
    %359 = arith.index_cast %c7_i32 : i32 to index
    %c0_174 = arith.constant 0 : index
    %c0_175 = arith.constant 0 : index
    %360 = vector.load %arg1[%c3_173, %359, %c0_174, %c0_175] : memref<4x8x2x32xf32, #tpu.memory_space<vmem>>, vector<1x1x2x32xf32>
    %361 = vector.shape_cast %360 : vector<1x1x2x32xf32> to vector<2x32xf32>
    %362 = arith.addf %358, %361 : vector<2x32xf32>
    %363 = arith.negf %347 : vector<2x32xf32>
    %364 = math.exp %363 : vector<2x32xf32>
    %cst_176 = arith.constant 1.000000e+00 : f32
    %365 = vector.broadcast %cst_176 : f32 to vector<2x32xf32>
    %366 = arith.addf %365, %364 : vector<2x32xf32>
    %367 = arith.divf %365, %366 : vector<2x32xf32>
    %368 = arith.negf %352 : vector<2x32xf32>
    %369 = math.exp %368 : vector<2x32xf32>
    %cst_177 = arith.constant 1.000000e+00 : f32
    %370 = vector.broadcast %cst_177 : f32 to vector<2x32xf32>
    %371 = arith.addf %370, %369 : vector<2x32xf32>
    %372 = arith.divf %370, %371 : vector<2x32xf32>
    %373 = math.tanh %357 : vector<2x32xf32>
    %374 = arith.negf %362 : vector<2x32xf32>
    %375 = math.exp %374 : vector<2x32xf32>
    %cst_178 = arith.constant 1.000000e+00 : f32
    %376 = vector.broadcast %cst_178 : f32 to vector<2x32xf32>
    %377 = arith.addf %376, %375 : vector<2x32xf32>
    %378 = arith.divf %376, %377 : vector<2x32xf32>
    %379 = arith.mulf %372, %334 : vector<2x32xf32>
    %380 = arith.mulf %367, %373 : vector<2x32xf32>
    %381 = arith.addf %379, %380 : vector<2x32xf32>
    %382 = math.tanh %381 : vector<2x32xf32>
    %383 = arith.mulf %378, %382 : vector<2x32xf32>
    %384 = arith.truncf %383 : vector<2x32xf32> to vector<2x32xbf16>
    %385 = arith.index_cast %c7_i32 : i32 to index
    %c0_179 = arith.constant 0 : index
    %c0_180 = arith.constant 0 : index
    %386 = vector.load %arg3[%385, %c0_179, %c0_180] : memref<8x2x32xbf16, #tpu.memory_space<vmem>>, vector<1x2x32xbf16>
    %387 = vector.shape_cast %386 : vector<1x2x32xbf16> to vector<2x32xbf16>
    %388 = vector.shape_cast %384 : vector<2x32xbf16> to vector<1x2x32xbf16>
    tpu.vector_store %arg3[%385, %c0_179, %c0_180], %388 {strides = array<i32>} : memref<8x2x32xbf16, #tpu.memory_space<vmem>>, vector<1x2x32xbf16>,
    %c8_i32 = arith.constant 8 : i32
    %c0_181 = arith.constant 0 : index
    %c0_182 = arith.constant 0 : index
    %389 = vector.load %arg5[%c0_181, %c0_182] : memref<2x32xf32, #tpu.memory_space<vmem>>, vector<2x32xf32>
    tpu.vector_store %arg5[%c0_181, %c0_182], %383 {strides = array<i32>} : memref<2x32xf32, #tpu.memory_space<vmem>>, vector<2x32xf32>,
    %c0_183 = arith.constant 0 : index
    %c0_184 = arith.constant 0 : index
    %390 = vector.load %arg6[%c0_183, %c0_184] : memref<2x32xf32, #tpu.memory_space<vmem>>, vector<2x32xf32>
    tpu.vector_store %arg6[%c0_183, %c0_184], %381 {strides = array<i32>} : memref<2x32xf32, #tpu.memory_space<vmem>>, vector<2x32xf32>,
    %c0_i32_185 = arith.constant 0 : i32
    %391 = arith.cmpi eq, %arg0, %c0_i32_185 : i32
    %392 = arith.extui %391 : i1 to i32
    %c0_i32_186 = arith.constant 0 : i32
    %393 = arith.cmpi ne, %392, %c0_i32_186 : i32
    scf.if %393 {
      %c0_187 = arith.constant 0 : index
      %c0_188 = arith.constant 0 : index
      %394 = vector.load %arg4[%c0_187, %c0_188] : memref<2x32xf32, #tpu.memory_space<vmem>>, vector<2x32xf32>
      tpu.vector_store %arg4[%c0_187, %c0_188], %381 {strides = array<i32>} : memref<2x32xf32, #tpu.memory_space<vmem>>, vector<2x32xf32>,
    } else {
    }
    return
  }
  func.func @transform_0(%arg0: i32) -> (i32, i32, i32, i32) {
    %c0_i32 = arith.constant 0 : i32
    %c0_i32_0 = arith.constant 0 : i32
    %c0_i32_1 = arith.constant 0 : i32
    %c0_i32_2 = arith.constant 0 : i32
    return %c0_i32, %arg0, %c0_i32_0, %c0_i32_1 : i32, i32, i32, i32
  }
  func.func @transform_1(%arg0: i32) -> (i32, i32, i32) {
    %c0_i32 = arith.constant 0 : i32
    %c0_i32_0 = arith.constant 0 : i32
    %c0_i32_1 = arith.constant 0 : i32
    %c0_i32_2 = arith.constant 0 : i32
    return %c0_i32, %c0_i32_0, %c0_i32_1 : i32, i32, i32
  }
  func.func @transform_2(%arg0: i32) -> (i32, i32, i32) {
    %c0_i32 = arith.constant 0 : i32
    %c0_i32_0 = arith.constant 0 : i32
    %c0_i32_1 = arith.constant 0 : i32
    return %arg0, %c0_i32, %c0_i32_0 : i32, i32, i32
  }
  func.func @transform_3(%arg0: i32) -> (i32, i32) {
    %c0_i32 = arith.constant 0 : i32
    %c0_i32_0 = arith.constant 0 : i32
    %c0_i32_1 = arith.constant 0 : i32
    return %c0_i32, %c0_i32_0 : i32, i32
  }
}

module attributes {stable_mosaic.version = 11 : i64} {
  func.func @attn_decoder_fc_kernel(%arg0: memref<2x8x32xbf16, #tpu.memory_space<vmem>>, %arg1: memref<2x8x32xf32, #tpu.memory_space<vmem>>, %arg2: memref<32x32xbf16, #tpu.memory_space<vmem>>, %arg3: memref<1x32xf32, #tpu.memory_space<vmem>>, %arg4: memref<2x2x32xf32, #tpu.memory_space<vmem>>, %arg5: memref<2x2x32xf32, #tpu.memory_space<vmem>>, %arg6: memref<4x2x32x32xbf16, #tpu.memory_space<vmem>>, %arg7: memref<4x2x32x32xbf16, #tpu.memory_space<vmem>>, %arg8: memref<4x2x1x32xf32, #tpu.memory_space<vmem>>, %arg9: memref<32x128xbf16, #tpu.memory_space<vmem>>, %arg10: memref<1x128xf32, #tpu.memory_space<vmem>>, %arg11: memref<2x128xf32, #tpu.memory_space<vmem>>, %arg12: memref<2x8xf32, #tpu.memory_space<vmem>>) attributes {dimension_semantics = [], scalar_prefetch = 0 : i64, scratch_operands = 0 : i64, tpu.core_type = #tpu.core_type<tc>} {
    %c1 = arith.constant 1 : index
    %c0 = arith.constant 0 : index
    %c0_0 = arith.constant 0 : index
    %0 = vector.load %arg4[%c1, %c0, %c0_0] : memref<2x2x32xf32, #tpu.memory_space<vmem>>, vector<1x2x32xf32>
    %1 = vector.shape_cast %0 : vector<1x2x32xf32> to vector<2x32xf32>
    %2 = arith.truncf %1 : vector<2x32xf32> to vector<2x32xbf16>
    %c0_1 = arith.constant 0 : index
    %c0_2 = arith.constant 0 : index
    %3 = vector.load %arg2[%c0_1, %c0_2] : memref<32x32xbf16, #tpu.memory_space<vmem>>, vector<32x32xbf16>
    %cst = arith.constant dense<0.000000e+00> : vector<2x32xf32>
    %4 = tpu.matmul %2, %3, %cst {dimension_numbers = #tpu.dot_dimension_numbers<[1], [0], [0], [1], [0, 0, 1, 1], [], []>} : vector<2x32xbf16>, vector<32x32xbf16>, vector<2x32xf32> -> vector<2x32xf32>
    %c0_3 = arith.constant 0 : index
    %c0_4 = arith.constant 0 : index
    %5 = vector.load %arg3[%c0_3, %c0_4] : memref<1x32xf32, #tpu.memory_space<vmem>>, vector<1x32xf32>
    %6 = vector.broadcast %5 : vector<1x32xf32> to vector<2x32xf32>
    %7 = arith.addf %4, %6 : vector<2x32xf32>
    %c0_5 = arith.constant 0 : index
    %c0_6 = arith.constant 0 : index
    %c0_7 = arith.constant 0 : index
    %8 = vector.load %arg1[%c0_5, %c0_6, %c0_7] : memref<2x8x32xf32, #tpu.memory_space<vmem>>, vector<2x8x32xf32>
    %9 = vector.shape_cast %7 : vector<2x32xf32> to vector<2x1x32xf32>
    %10 = vector.broadcast %9 : vector<2x1x32xf32> to vector<2x8x32xf32>
    %11 = arith.addf %8, %10 : vector<2x8x32xf32>
    %12 = math.tanh %11 : vector<2x8x32xf32>
    %cst_8 = arith.constant dense<0.000000e+00> : vector<2x8xf32>
    %13 = vector.multi_reduction <add>, %12, %cst_8 [2] : vector<2x8x32xf32> to vector<2x8xf32>
    %cst_9 = arith.constant dense<0xFF800000> : vector<2xf32>
    %14 = vector.multi_reduction <maximumf>, %13, %cst_9 [1] : vector<2x8xf32> to vector<2xf32>
    %15 = vector.shape_cast %14 : vector<2xf32> to vector<2x1xf32>
    %16 = vector.broadcast %15 : vector<2x1xf32> to vector<2x8xf32>
    %17 = arith.subf %13, %16 : vector<2x8xf32>
    %18 = math.exp %17 : vector<2x8xf32>
    %cst_10 = arith.constant dense<0.000000e+00> : vector<2xf32>
    %19 = vector.multi_reduction <add>, %18, %cst_10 [1] : vector<2x8xf32> to vector<2xf32>
    %20 = vector.shape_cast %19 : vector<2xf32> to vector<2x1xf32>
    %21 = tpu.reciprocal %20 {approx = true} : vector<2x1xf32> -> vector<2x1xf32>
    %22 = vector.broadcast %21 : vector<2x1xf32> to vector<2x8xf32>
    %23 = arith.mulf %18, %22 : vector<2x8xf32>
    %c0_11 = arith.constant 0 : index
    %c0_12 = arith.constant 0 : index
    %c0_13 = arith.constant 0 : index
    %24 = vector.load %arg0[%c0_11, %c0_12, %c0_13] : memref<2x8x32xbf16, #tpu.memory_space<vmem>>, vector<2x8x32xbf16>
    %25 = arith.extf %24 : vector<2x8x32xbf16> to vector<2x8x32xf32>
    %26 = vector.shape_cast %23 : vector<2x8xf32> to vector<2x8x1xf32>
    %27 = vector.broadcast %26 : vector<2x8x1xf32> to vector<2x8x32xf32>
    %28 = arith.mulf %27, %25 : vector<2x8x32xf32>
    %cst_14 = arith.constant dense<0.000000e+00> : vector<2x32xf32>
    %29 = vector.multi_reduction <add>, %28, %cst_14 [1] : vector<2x8x32xf32> to vector<2x32xf32>
    %c0_15 = arith.constant 0 : index
    %c0_16 = arith.constant 0 : index
    %c0_17 = arith.constant 0 : index
    %30 = vector.load %arg4[%c0_15, %c0_16, %c0_17] : memref<2x2x32xf32, #tpu.memory_space<vmem>>, vector<1x2x32xf32>
    %31 = vector.shape_cast %30 : vector<1x2x32xf32> to vector<2x32xf32>
    %c0_18 = arith.constant 0 : index
    %c0_19 = arith.constant 0 : index
    %c0_20 = arith.constant 0 : index
    %32 = vector.load %arg5[%c0_18, %c0_19, %c0_20] : memref<2x2x32xf32, #tpu.memory_space<vmem>>, vector<1x2x32xf32>
    %33 = vector.shape_cast %32 : vector<1x2x32xf32> to vector<2x32xf32>
    %34 = arith.truncf %29 : vector<2x32xf32> to vector<2x32xbf16>
    %35 = arith.truncf %31 : vector<2x32xf32> to vector<2x32xbf16>
    %c0_21 = arith.constant 0 : index
    %c0_22 = arith.constant 0 : index
    %c0_23 = arith.constant 0 : index
    %c0_24 = arith.constant 0 : index
    %36 = vector.load %arg6[%c0_21, %c0_22, %c0_23, %c0_24] : memref<4x2x32x32xbf16, #tpu.memory_space<vmem>>, vector<1x1x32x32xbf16>
    %37 = vector.shape_cast %36 : vector<1x1x32x32xbf16> to vector<32x32xbf16>
    %cst_25 = arith.constant dense<0.000000e+00> : vector<2x32xf32>
    %38 = tpu.matmul %34, %37, %cst_25 {dimension_numbers = #tpu.dot_dimension_numbers<[1], [0], [0], [1], [0, 0, 1, 1], [], []>} : vector<2x32xbf16>, vector<32x32xbf16>, vector<2x32xf32> -> vector<2x32xf32>
    %c0_26 = arith.constant 0 : index
    %c0_27 = arith.constant 0 : index
    %c0_28 = arith.constant 0 : index
    %c0_29 = arith.constant 0 : index
    %39 = vector.load %arg7[%c0_26, %c0_27, %c0_28, %c0_29] : memref<4x2x32x32xbf16, #tpu.memory_space<vmem>>, vector<1x1x32x32xbf16>
    %40 = vector.shape_cast %39 : vector<1x1x32x32xbf16> to vector<32x32xbf16>
    %cst_30 = arith.constant dense<0.000000e+00> : vector<2x32xf32>
    %41 = tpu.matmul %35, %40, %cst_30 {dimension_numbers = #tpu.dot_dimension_numbers<[1], [0], [0], [1], [0, 0, 1, 1], [], []>} : vector<2x32xbf16>, vector<32x32xbf16>, vector<2x32xf32> -> vector<2x32xf32>
    %42 = arith.addf %38, %41 : vector<2x32xf32>
    %c0_31 = arith.constant 0 : index
    %c0_32 = arith.constant 0 : index
    %c0_33 = arith.constant 0 : index
    %c0_34 = arith.constant 0 : index
    %43 = vector.load %arg8[%c0_31, %c0_32, %c0_33, %c0_34] : memref<4x2x1x32xf32, #tpu.memory_space<vmem>>, vector<1x1x1x32xf32>
    %44 = vector.shape_cast %43 : vector<1x1x1x32xf32> to vector<1x32xf32>
    %45 = vector.broadcast %44 : vector<1x32xf32> to vector<2x32xf32>
    %46 = arith.addf %42, %45 : vector<2x32xf32>
    %c1_35 = arith.constant 1 : index
    %c0_36 = arith.constant 0 : index
    %c0_37 = arith.constant 0 : index
    %c0_38 = arith.constant 0 : index
    %47 = vector.load %arg6[%c1_35, %c0_36, %c0_37, %c0_38] : memref<4x2x32x32xbf16, #tpu.memory_space<vmem>>, vector<1x1x32x32xbf16>
    %48 = vector.shape_cast %47 : vector<1x1x32x32xbf16> to vector<32x32xbf16>
    %cst_39 = arith.constant dense<0.000000e+00> : vector<2x32xf32>
    %49 = tpu.matmul %34, %48, %cst_39 {dimension_numbers = #tpu.dot_dimension_numbers<[1], [0], [0], [1], [0, 0, 1, 1], [], []>} : vector<2x32xbf16>, vector<32x32xbf16>, vector<2x32xf32> -> vector<2x32xf32>
    %c1_40 = arith.constant 1 : index
    %c0_41 = arith.constant 0 : index
    %c0_42 = arith.constant 0 : index
    %c0_43 = arith.constant 0 : index
    %50 = vector.load %arg7[%c1_40, %c0_41, %c0_42, %c0_43] : memref<4x2x32x32xbf16, #tpu.memory_space<vmem>>, vector<1x1x32x32xbf16>
    %51 = vector.shape_cast %50 : vector<1x1x32x32xbf16> to vector<32x32xbf16>
    %cst_44 = arith.constant dense<0.000000e+00> : vector<2x32xf32>
    %52 = tpu.matmul %35, %51, %cst_44 {dimension_numbers = #tpu.dot_dimension_numbers<[1], [0], [0], [1], [0, 0, 1, 1], [], []>} : vector<2x32xbf16>, vector<32x32xbf16>, vector<2x32xf32> -> vector<2x32xf32>
    %53 = arith.addf %49, %52 : vector<2x32xf32>
    %c1_45 = arith.constant 1 : index
    %c0_46 = arith.constant 0 : index
    %c0_47 = arith.constant 0 : index
    %c0_48 = arith.constant 0 : index
    %54 = vector.load %arg8[%c1_45, %c0_46, %c0_47, %c0_48] : memref<4x2x1x32xf32, #tpu.memory_space<vmem>>, vector<1x1x1x32xf32>
    %55 = vector.shape_cast %54 : vector<1x1x1x32xf32> to vector<1x32xf32>
    %56 = vector.broadcast %55 : vector<1x32xf32> to vector<2x32xf32>
    %57 = arith.addf %53, %56 : vector<2x32xf32>
    %c2 = arith.constant 2 : index
    %c0_49 = arith.constant 0 : index
    %c0_50 = arith.constant 0 : index
    %c0_51 = arith.constant 0 : index
    %58 = vector.load %arg6[%c2, %c0_49, %c0_50, %c0_51] : memref<4x2x32x32xbf16, #tpu.memory_space<vmem>>, vector<1x1x32x32xbf16>
    %59 = vector.shape_cast %58 : vector<1x1x32x32xbf16> to vector<32x32xbf16>
    %cst_52 = arith.constant dense<0.000000e+00> : vector<2x32xf32>
    %60 = tpu.matmul %34, %59, %cst_52 {dimension_numbers = #tpu.dot_dimension_numbers<[1], [0], [0], [1], [0, 0, 1, 1], [], []>} : vector<2x32xbf16>, vector<32x32xbf16>, vector<2x32xf32> -> vector<2x32xf32>
    %c2_53 = arith.constant 2 : index
    %c0_54 = arith.constant 0 : index
    %c0_55 = arith.constant 0 : index
    %c0_56 = arith.constant 0 : index
    %61 = vector.load %arg7[%c2_53, %c0_54, %c0_55, %c0_56] : memref<4x2x32x32xbf16, #tpu.memory_space<vmem>>, vector<1x1x32x32xbf16>
    %62 = vector.shape_cast %61 : vector<1x1x32x32xbf16> to vector<32x32xbf16>
    %cst_57 = arith.constant dense<0.000000e+00> : vector<2x32xf32>
    %63 = tpu.matmul %35, %62, %cst_57 {dimension_numbers = #tpu.dot_dimension_numbers<[1], [0], [0], [1], [0, 0, 1, 1], [], []>} : vector<2x32xbf16>, vector<32x32xbf16>, vector<2x32xf32> -> vector<2x32xf32>
    %64 = arith.addf %60, %63 : vector<2x32xf32>
    %c2_58 = arith.constant 2 : index
    %c0_59 = arith.constant 0 : index
    %c0_60 = arith.constant 0 : index
    %c0_61 = arith.constant 0 : index
    %65 = vector.load %arg8[%c2_58, %c0_59, %c0_60, %c0_61] : memref<4x2x1x32xf32, #tpu.memory_space<vmem>>, vector<1x1x1x32xf32>
    %66 = vector.shape_cast %65 : vector<1x1x1x32xf32> to vector<1x32xf32>
    %67 = vector.broadcast %66 : vector<1x32xf32> to vector<2x32xf32>
    %68 = arith.addf %64, %67 : vector<2x32xf32>
    %c3 = arith.constant 3 : index
    %c0_62 = arith.constant 0 : index
    %c0_63 = arith.constant 0 : index
    %c0_64 = arith.constant 0 : index
    %69 = vector.load %arg6[%c3, %c0_62, %c0_63, %c0_64] : memref<4x2x32x32xbf16, #tpu.memory_space<vmem>>, vector<1x1x32x32xbf16>
    %70 = vector.shape_cast %69 : vector<1x1x32x32xbf16> to vector<32x32xbf16>
    %cst_65 = arith.constant dense<0.000000e+00> : vector<2x32xf32>
    %71 = tpu.matmul %34, %70, %cst_65 {dimension_numbers = #tpu.dot_dimension_numbers<[1], [0], [0], [1], [0, 0, 1, 1], [], []>} : vector<2x32xbf16>, vector<32x32xbf16>, vector<2x32xf32> -> vector<2x32xf32>
    %c3_66 = arith.constant 3 : index
    %c0_67 = arith.constant 0 : index
    %c0_68 = arith.constant 0 : index
    %c0_69 = arith.constant 0 : index
    %72 = vector.load %arg7[%c3_66, %c0_67, %c0_68, %c0_69] : memref<4x2x32x32xbf16, #tpu.memory_space<vmem>>, vector<1x1x32x32xbf16>
    %73 = vector.shape_cast %72 : vector<1x1x32x32xbf16> to vector<32x32xbf16>
    %cst_70 = arith.constant dense<0.000000e+00> : vector<2x32xf32>
    %74 = tpu.matmul %35, %73, %cst_70 {dimension_numbers = #tpu.dot_dimension_numbers<[1], [0], [0], [1], [0, 0, 1, 1], [], []>} : vector<2x32xbf16>, vector<32x32xbf16>, vector<2x32xf32> -> vector<2x32xf32>
    %75 = arith.addf %71, %74 : vector<2x32xf32>
    %c3_71 = arith.constant 3 : index
    %c0_72 = arith.constant 0 : index
    %c0_73 = arith.constant 0 : index
    %c0_74 = arith.constant 0 : index
    %76 = vector.load %arg8[%c3_71, %c0_72, %c0_73, %c0_74] : memref<4x2x1x32xf32, #tpu.memory_space<vmem>>, vector<1x1x1x32xf32>
    %77 = vector.shape_cast %76 : vector<1x1x1x32xf32> to vector<1x32xf32>
    %78 = vector.broadcast %77 : vector<1x32xf32> to vector<2x32xf32>
    %79 = arith.addf %75, %78 : vector<2x32xf32>
    %80 = arith.negf %46 : vector<2x32xf32>
    %81 = math.exp %80 : vector<2x32xf32>
    %cst_75 = arith.constant 1.000000e+00 : f32
    %82 = vector.broadcast %cst_75 : f32 to vector<2x32xf32>
    %83 = arith.addf %82, %81 : vector<2x32xf32>
    %84 = arith.divf %82, %83 : vector<2x32xf32>
    %85 = arith.negf %57 : vector<2x32xf32>
    %86 = math.exp %85 : vector<2x32xf32>
    %cst_76 = arith.constant 1.000000e+00 : f32
    %87 = vector.broadcast %cst_76 : f32 to vector<2x32xf32>
    %88 = arith.addf %87, %86 : vector<2x32xf32>
    %89 = arith.divf %87, %88 : vector<2x32xf32>
    %90 = math.tanh %68 : vector<2x32xf32>
    %91 = arith.negf %79 : vector<2x32xf32>
    %92 = math.exp %91 : vector<2x32xf32>
    %cst_77 = arith.constant 1.000000e+00 : f32
    %93 = vector.broadcast %cst_77 : f32 to vector<2x32xf32>
    %94 = arith.addf %93, %92 : vector<2x32xf32>
    %95 = arith.divf %93, %94 : vector<2x32xf32>
    %96 = arith.mulf %89, %33 : vector<2x32xf32>
    %97 = arith.mulf %84, %90 : vector<2x32xf32>
    %98 = arith.addf %96, %97 : vector<2x32xf32>
    %99 = math.tanh %98 : vector<2x32xf32>
    %100 = arith.mulf %95, %99 : vector<2x32xf32>
    %c1_78 = arith.constant 1 : index
    %c0_79 = arith.constant 0 : index
    %c0_80 = arith.constant 0 : index
    %101 = vector.load %arg4[%c1_78, %c0_79, %c0_80] : memref<2x2x32xf32, #tpu.memory_space<vmem>>, vector<1x2x32xf32>
    %102 = vector.shape_cast %101 : vector<1x2x32xf32> to vector<2x32xf32>
    %c1_81 = arith.constant 1 : index
    %c0_82 = arith.constant 0 : index
    %c0_83 = arith.constant 0 : index
    %103 = vector.load %arg5[%c1_81, %c0_82, %c0_83] : memref<2x2x32xf32, #tpu.memory_space<vmem>>, vector<1x2x32xf32>
    %104 = vector.shape_cast %103 : vector<1x2x32xf32> to vector<2x32xf32>
    %105 = arith.truncf %100 : vector<2x32xf32> to vector<2x32xbf16>
    %106 = arith.truncf %102 : vector<2x32xf32> to vector<2x32xbf16>
    %c0_84 = arith.constant 0 : index
    %c1_85 = arith.constant 1 : index
    %c0_86 = arith.constant 0 : index
    %c0_87 = arith.constant 0 : index
    %107 = vector.load %arg6[%c0_84, %c1_85, %c0_86, %c0_87] : memref<4x2x32x32xbf16, #tpu.memory_space<vmem>>, vector<1x1x32x32xbf16>
    %108 = vector.shape_cast %107 : vector<1x1x32x32xbf16> to vector<32x32xbf16>
    %cst_88 = arith.constant dense<0.000000e+00> : vector<2x32xf32>
    %109 = tpu.matmul %105, %108, %cst_88 {dimension_numbers = #tpu.dot_dimension_numbers<[1], [0], [0], [1], [0, 0, 1, 1], [], []>} : vector<2x32xbf16>, vector<32x32xbf16>, vector<2x32xf32> -> vector<2x32xf32>
    %c0_89 = arith.constant 0 : index
    %c1_90 = arith.constant 1 : index
    %c0_91 = arith.constant 0 : index
    %c0_92 = arith.constant 0 : index
    %110 = vector.load %arg7[%c0_89, %c1_90, %c0_91, %c0_92] : memref<4x2x32x32xbf16, #tpu.memory_space<vmem>>, vector<1x1x32x32xbf16>
    %111 = vector.shape_cast %110 : vector<1x1x32x32xbf16> to vector<32x32xbf16>
    %cst_93 = arith.constant dense<0.000000e+00> : vector<2x32xf32>
    %112 = tpu.matmul %106, %111, %cst_93 {dimension_numbers = #tpu.dot_dimension_numbers<[1], [0], [0], [1], [0, 0, 1, 1], [], []>} : vector<2x32xbf16>, vector<32x32xbf16>, vector<2x32xf32> -> vector<2x32xf32>
    %113 = arith.addf %109, %112 : vector<2x32xf32>
    %c0_94 = arith.constant 0 : index
    %c1_95 = arith.constant 1 : index
    %c0_96 = arith.constant 0 : index
    %c0_97 = arith.constant 0 : index
    %114 = vector.load %arg8[%c0_94, %c1_95, %c0_96, %c0_97] : memref<4x2x1x32xf32, #tpu.memory_space<vmem>>, vector<1x1x1x32xf32>
    %115 = vector.shape_cast %114 : vector<1x1x1x32xf32> to vector<1x32xf32>
    %116 = vector.broadcast %115 : vector<1x32xf32> to vector<2x32xf32>
    %117 = arith.addf %113, %116 : vector<2x32xf32>
    %c1_98 = arith.constant 1 : index
    %c1_99 = arith.constant 1 : index
    %c0_100 = arith.constant 0 : index
    %c0_101 = arith.constant 0 : index
    %118 = vector.load %arg6[%c1_98, %c1_99, %c0_100, %c0_101] : memref<4x2x32x32xbf16, #tpu.memory_space<vmem>>, vector<1x1x32x32xbf16>
    %119 = vector.shape_cast %118 : vector<1x1x32x32xbf16> to vector<32x32xbf16>
    %cst_102 = arith.constant dense<0.000000e+00> : vector<2x32xf32>
    %120 = tpu.matmul %105, %119, %cst_102 {dimension_numbers = #tpu.dot_dimension_numbers<[1], [0], [0], [1], [0, 0, 1, 1], [], []>} : vector<2x32xbf16>, vector<32x32xbf16>, vector<2x32xf32> -> vector<2x32xf32>
    %c1_103 = arith.constant 1 : index
    %c1_104 = arith.constant 1 : index
    %c0_105 = arith.constant 0 : index
    %c0_106 = arith.constant 0 : index
    %121 = vector.load %arg7[%c1_103, %c1_104, %c0_105, %c0_106] : memref<4x2x32x32xbf16, #tpu.memory_space<vmem>>, vector<1x1x32x32xbf16>
    %122 = vector.shape_cast %121 : vector<1x1x32x32xbf16> to vector<32x32xbf16>
    %cst_107 = arith.constant dense<0.000000e+00> : vector<2x32xf32>
    %123 = tpu.matmul %106, %122, %cst_107 {dimension_numbers = #tpu.dot_dimension_numbers<[1], [0], [0], [1], [0, 0, 1, 1], [], []>} : vector<2x32xbf16>, vector<32x32xbf16>, vector<2x32xf32> -> vector<2x32xf32>
    %124 = arith.addf %120, %123 : vector<2x32xf32>
    %c1_108 = arith.constant 1 : index
    %c1_109 = arith.constant 1 : index
    %c0_110 = arith.constant 0 : index
    %c0_111 = arith.constant 0 : index
    %125 = vector.load %arg8[%c1_108, %c1_109, %c0_110, %c0_111] : memref<4x2x1x32xf32, #tpu.memory_space<vmem>>, vector<1x1x1x32xf32>
    %126 = vector.shape_cast %125 : vector<1x1x1x32xf32> to vector<1x32xf32>
    %127 = vector.broadcast %126 : vector<1x32xf32> to vector<2x32xf32>
    %128 = arith.addf %124, %127 : vector<2x32xf32>
    %c2_112 = arith.constant 2 : index
    %c1_113 = arith.constant 1 : index
    %c0_114 = arith.constant 0 : index
    %c0_115 = arith.constant 0 : index
    %129 = vector.load %arg6[%c2_112, %c1_113, %c0_114, %c0_115] : memref<4x2x32x32xbf16, #tpu.memory_space<vmem>>, vector<1x1x32x32xbf16>
    %130 = vector.shape_cast %129 : vector<1x1x32x32xbf16> to vector<32x32xbf16>
    %cst_116 = arith.constant dense<0.000000e+00> : vector<2x32xf32>
    %131 = tpu.matmul %105, %130, %cst_116 {dimension_numbers = #tpu.dot_dimension_numbers<[1], [0], [0], [1], [0, 0, 1, 1], [], []>} : vector<2x32xbf16>, vector<32x32xbf16>, vector<2x32xf32> -> vector<2x32xf32>
    %c2_117 = arith.constant 2 : index
    %c1_118 = arith.constant 1 : index
    %c0_119 = arith.constant 0 : index
    %c0_120 = arith.constant 0 : index
    %132 = vector.load %arg7[%c2_117, %c1_118, %c0_119, %c0_120] : memref<4x2x32x32xbf16, #tpu.memory_space<vmem>>, vector<1x1x32x32xbf16>
    %133 = vector.shape_cast %132 : vector<1x1x32x32xbf16> to vector<32x32xbf16>
    %cst_121 = arith.constant dense<0.000000e+00> : vector<2x32xf32>
    %134 = tpu.matmul %106, %133, %cst_121 {dimension_numbers = #tpu.dot_dimension_numbers<[1], [0], [0], [1], [0, 0, 1, 1], [], []>} : vector<2x32xbf16>, vector<32x32xbf16>, vector<2x32xf32> -> vector<2x32xf32>
    %135 = arith.addf %131, %134 : vector<2x32xf32>
    %c2_122 = arith.constant 2 : index
    %c1_123 = arith.constant 1 : index
    %c0_124 = arith.constant 0 : index
    %c0_125 = arith.constant 0 : index
    %136 = vector.load %arg8[%c2_122, %c1_123, %c0_124, %c0_125] : memref<4x2x1x32xf32, #tpu.memory_space<vmem>>, vector<1x1x1x32xf32>
    %137 = vector.shape_cast %136 : vector<1x1x1x32xf32> to vector<1x32xf32>
    %138 = vector.broadcast %137 : vector<1x32xf32> to vector<2x32xf32>
    %139 = arith.addf %135, %138 : vector<2x32xf32>
    %c3_126 = arith.constant 3 : index
    %c1_127 = arith.constant 1 : index
    %c0_128 = arith.constant 0 : index
    %c0_129 = arith.constant 0 : index
    %140 = vector.load %arg6[%c3_126, %c1_127, %c0_128, %c0_129] : memref<4x2x32x32xbf16, #tpu.memory_space<vmem>>, vector<1x1x32x32xbf16>
    %141 = vector.shape_cast %140 : vector<1x1x32x32xbf16> to vector<32x32xbf16>
    %cst_130 = arith.constant dense<0.000000e+00> : vector<2x32xf32>
    %142 = tpu.matmul %105, %141, %cst_130 {dimension_numbers = #tpu.dot_dimension_numbers<[1], [0], [0], [1], [0, 0, 1, 1], [], []>} : vector<2x32xbf16>, vector<32x32xbf16>, vector<2x32xf32> -> vector<2x32xf32>
    %c3_131 = arith.constant 3 : index
    %c1_132 = arith.constant 1 : index
    %c0_133 = arith.constant 0 : index
    %c0_134 = arith.constant 0 : index
    %143 = vector.load %arg7[%c3_131, %c1_132, %c0_133, %c0_134] : memref<4x2x32x32xbf16, #tpu.memory_space<vmem>>, vector<1x1x32x32xbf16>
    %144 = vector.shape_cast %143 : vector<1x1x32x32xbf16> to vector<32x32xbf16>
    %cst_135 = arith.constant dense<0.000000e+00> : vector<2x32xf32>
    %145 = tpu.matmul %106, %144, %cst_135 {dimension_numbers = #tpu.dot_dimension_numbers<[1], [0], [0], [1], [0, 0, 1, 1], [], []>} : vector<2x32xbf16>, vector<32x32xbf16>, vector<2x32xf32> -> vector<2x32xf32>
    %146 = arith.addf %142, %145 : vector<2x32xf32>
    %c3_136 = arith.constant 3 : index
    %c1_137 = arith.constant 1 : index
    %c0_138 = arith.constant 0 : index
    %c0_139 = arith.constant 0 : index
    %147 = vector.load %arg8[%c3_136, %c1_137, %c0_138, %c0_139] : memref<4x2x1x32xf32, #tpu.memory_space<vmem>>, vector<1x1x1x32xf32>
    %148 = vector.shape_cast %147 : vector<1x1x1x32xf32> to vector<1x32xf32>
    %149 = vector.broadcast %148 : vector<1x32xf32> to vector<2x32xf32>
    %150 = arith.addf %146, %149 : vector<2x32xf32>
    %151 = arith.negf %117 : vector<2x32xf32>
    %152 = math.exp %151 : vector<2x32xf32>
    %cst_140 = arith.constant 1.000000e+00 : f32
    %153 = vector.broadcast %cst_140 : f32 to vector<2x32xf32>
    %154 = arith.addf %153, %152 : vector<2x32xf32>
    %155 = arith.divf %153, %154 : vector<2x32xf32>
    %156 = arith.negf %128 : vector<2x32xf32>
    %157 = math.exp %156 : vector<2x32xf32>
    %cst_141 = arith.constant 1.000000e+00 : f32
    %158 = vector.broadcast %cst_141 : f32 to vector<2x32xf32>
    %159 = arith.addf %158, %157 : vector<2x32xf32>
    %160 = arith.divf %158, %159 : vector<2x32xf32>
    %161 = math.tanh %139 : vector<2x32xf32>
    %162 = arith.negf %150 : vector<2x32xf32>
    %163 = math.exp %162 : vector<2x32xf32>
    %cst_142 = arith.constant 1.000000e+00 : f32
    %164 = vector.broadcast %cst_142 : f32 to vector<2x32xf32>
    %165 = arith.addf %164, %163 : vector<2x32xf32>
    %166 = arith.divf %164, %165 : vector<2x32xf32>
    %167 = arith.mulf %160, %104 : vector<2x32xf32>
    %168 = arith.mulf %155, %161 : vector<2x32xf32>
    %169 = arith.addf %167, %168 : vector<2x32xf32>
    %170 = math.tanh %169 : vector<2x32xf32>
    %171 = arith.mulf %166, %170 : vector<2x32xf32>
    %172 = arith.truncf %171 : vector<2x32xf32> to vector<2x32xbf16>
    %c0_143 = arith.constant 0 : index
    %c0_144 = arith.constant 0 : index
    %173 = vector.load %arg9[%c0_143, %c0_144] : memref<32x128xbf16, #tpu.memory_space<vmem>>, vector<32x128xbf16>
    %cst_145 = arith.constant dense<0.000000e+00> : vector<2x128xf32>
    %174 = tpu.matmul %172, %173, %cst_145 {dimension_numbers = #tpu.dot_dimension_numbers<[1], [0], [0], [1], [0, 0, 1, 1], [], []>} : vector<2x32xbf16>, vector<32x128xbf16>, vector<2x128xf32> -> vector<2x128xf32>
    %c0_146 = arith.constant 0 : index
    %c0_147 = arith.constant 0 : index
    %175 = vector.load %arg10[%c0_146, %c0_147] : memref<1x128xf32, #tpu.memory_space<vmem>>, vector<1x128xf32>
    %176 = vector.broadcast %175 : vector<1x128xf32> to vector<2x128xf32>
    %177 = arith.addf %174, %176 : vector<2x128xf32>
    %c0_148 = arith.constant 0 : index
    %c0_149 = arith.constant 0 : index
    %178 = vector.load %arg11[%c0_148, %c0_149] : memref<2x128xf32, #tpu.memory_space<vmem>>, vector<2x128xf32>
    tpu.vector_store %arg11[%c0_148, %c0_149], %177 {strides = array<i32>} : memref<2x128xf32, #tpu.memory_space<vmem>>, vector<2x128xf32>,
    %c0_150 = arith.constant 0 : index
    %c0_151 = arith.constant 0 : index
    %179 = vector.load %arg12[%c0_150, %c0_151] : memref<2x8xf32, #tpu.memory_space<vmem>>, vector<2x8xf32>
    tpu.vector_store %arg12[%c0_150, %c0_151], %23 {strides = array<i32>} : memref<2x8xf32, #tpu.memory_space<vmem>>, vector<2x8xf32>,
    return
  }
}

</mosaic_0001>

<bundles_post_ra>
// kernel: alstm_forward.5
= control target key start
LH: loop header
LB: loop body
LE: loop exit
PB: predicated region body
PF: predicated region fallthrough
CT: control target
= control target key end

     0   :  { %18 = vsyncpa [#allocation3], 0  ;;  %v1889_v1 = vmov 0.0   ;;  %vm1890_vm0 = vmmov 0   ;;  %vm69_vm1 = vcmask 261120   ;;  %s2271_s0 = inlined_call_operand.vmem [shape: bf16[2,8,32], index: 0, kind: input, shape index: {}]   ;;  %s2272_s1 = inlined_call_operand.vmem [shape: f32[2,8,32], index: 1, kind: input, shape index: {}]   ;;  %s2273_s2 = inlined_call_operand.vmem [shape: bf16[32,32], index: 2, kind: input, shape index: {}]   ;;  %s2274_s3 = inlined_call_operand.vmem [shape: f32[1,32], index: 3, kind: input, shape index: {}]   ;;  %s2275_s4 = inlined_call_operand.vmem [shape: f32[2,2,32], index: 4, kind: input, shape index: {}]   ;;  %s2276_s5 = inlined_call_operand.vmem [shape: f32[2,2,32], index: 5, kind: input, shape index: {}]   ;;  %s2277_s6 = inlined_call_operand.vmem [shape: bf16[4,2,32,32], index: 6, kind: input, shape index: {}]   ;;  %s2278_s7 = inlined_call_operand.vmem [shape: bf16[4,2,32,32], index: 7, kind: input, shape index: {}]   ;;  %s2279_s8 = inlined_call_operand.vmem [shape: f32[4,2,1,32], index: 8, kind: input, shape index: {}]   ;;  %s2280_s9 = inlined_call_operand.vmem [shape: bf16[32,128], index: 9, kind: input, shape index: {}]   ;;  %s2281_s10 = inlined_call_operand.vmem [shape: f32[1,128], index: 10, kind: input, shape index: {}]   ;;  %s2282_s11 = inlined_call_operand.hbm [shape: f32[2,128], index: 11, kind: output, shape index: {0}]   ;;  %s2283_s12 = inlined_call_operand.hbm [shape: f32[2,8], index: 12, kind: output, shape index: {1}]  }
   0x1   :  { %v1763_v0 = vld [vmem:[%s2273_s2] sm:$0xff]   ;;  %1611 = vmatprep.subr.bf16.mxu0 %v1889_v1  ;;  %1619 = vmatprep.subr.bf16.mxu1 %v1889_v1  ;;  %v1764_v2 = vld [vmem:[%s2273_s2 + $0x8] sm:$0xff]  }
   0x2   :  { %1612 = vmatpush3.bf16.msra.mxu0 %v1763_v0  ;;  %1615 = vmatprep.mubr.msk.bf16.mxu0 %vm1890_vm0, %v1889_v1  ;;  %v1418_v3 = vld [vmem:[%s2275_s4 + $0x2] sm:$0x3] }
   0x3   :  { %1613 = vmatprep.subr.bf16.mxu0 %v1889_v1  ;;  %1623 = vmatprep.mubr.msk.bf16.mxu1 %vm1890_vm0, %v1889_v1  ;;  %v1976_v4 = vpack.c.bf16 %v1418_v3, %v1418_v3 }
   0x6   :  { %1614 = vmatpush3.bf16.msra.mxu0 %v1764_v2 }
   0x7   :  { %1627 = vmatprep.subr.bf16.mxu0 %v1889_v1 }
   0x9   :  { %1616 = vmatmul.mubr.msk.bf16.vlgmr.msra.gmra.mrb[0].mxu0 %vm69_vm1, %v1976_v4 }
   0xa   :  { %1631 = vmatprep.mubr.msk.bf16.mxu0 %vm1890_vm0, %v1889_v1 }
   0xb   :  { %19 = vsyncpa [#allocation5], 0  ;;  %v1891_v5 = vmov 1966171168   ;;  %v119_v7 = vlaneseq  ;;  %v1419_v10 = vld [vmem:[%s2274_s3] ss:$0 sm:$0xff] }
   0xc   :  { %v117_v6 = vunpack.c.l.s4 %v1891_v5  ;;  %v113_v21 = vld [vmem:[%s2272_s1] sm:$0xff]  ;;  %v114_v24 = vld [vmem:[%s2272_s1 + $0x8] sm:$0xff]  ;;  %vm170_vm2 = vcmask 1041409   ;;  %vm173_vm3 = vcmask 58368   ;;  %v1892_v40 = vmov 0  }
   0xd   :  { %v1983_v9 = vshrl.u32 %v119_v7, 7  ;;  %v161_v32 = vand.u32 127, %v119_v7  ;;  %1762 = vset.pattern.permute.xlu0 %v1892_v40  ;;  %1761 = vset.pattern.permute.xlu1 %v1892_v40  ;;  %v1765_v63 = vld [vmem:[%s2278_s7] sm:$0xff]   ;;  %v1767_v2 = vld [vmem:[%s2278_s7 + $0x8] sm:$0xff]  }
   0xe   :  { %v118_v8 = vunpack.c.0.s8 %v117_v6  ;;  %1620 = vmatpush3.bf16.msra.mxu1 %v1765_v63  ;;  %v1766_v0 = vld [vmem:[%s2277_s6] sm:$0xff]   ;;  %v1768_v5 = vld [vmem:[%s2277_s6 + $0x8] sm:$0xff]  }
   0xf   :  { %v140_v17 = vsub.s32 0, %v1983_v9  ;;  %v1999_v34 = vsub.s32 %v161_v32, %v1983_v9  ;;  %v184_v41 = vsub.s32 1, %v1983_v9  ;;  %1621 = vmatprep.subr.bf16.mxu1 %v1889_v1  ;;  %1628 = vmatpush3.bf16.msra.mxu0 %v1766_v0  ;;  %v259_v3 = vld [vmem:[%s2275_s4] sm:$0x3] }
  0x10   :  { %v121_v11 = vsub.s32 %v118_v8, %v1983_v9  ;;  %1629 = vmatprep.subr.bf16.mxu0 %v1889_v1  ;;  %v263_v6 = vpack.c.bf16 %v259_v3, %v259_v3  ;;  %v1769_v7 = vld [vmem:[%s2278_s7 + $0x20] sm:$0xff]   ;;  %v1771_v8 = vld [vmem:[%s2278_s7 + $0x28] sm:$0xff]   ;;  %v1782_v3 = vld [vmem:[%s2277_s6 + $0x10] sm:$0xff]  }
  0x11   :  { %v1773_v9 = vld [vmem:[%s2278_s7 + $0x40] sm:$0xff]  }
  0x12   :  { %1622 = vmatpush3.bf16.msra.mxu1 %v1767_v2  ;;  %v1781_v2 = vld [vmem:[%s2278_s7 + $0x10] sm:$0xff]  }
  0x13   :  { %1635 = vmatprep.subr.bf16.mxu1 %v1889_v1  ;;  %1630 = vmatpush3.bf16.msra.mxu0 %v1768_v5  ;;  %v1783_v5 = vld [vmem:[%s2278_s7 + $0x18] sm:$0xff]  }
  0x14   :  { %1643 = vmatprep.subr.bf16.mxu0 %v1889_v1 }
  0x15   :  { %1624 = vmatmul.mubr.msk.bf16.vlgmr.msra.gmra.mrb[0].mxu1 %vm69_vm1, %v263_v6 }
  0x16   :  { %1636 = vmatpush3.bf16.msra.mxu1 %v1769_v7  ;;  %1639 = vmatprep.mubr.msk.bf16.mxu1 %vm1890_vm0, %v1889_v1  ;;  %v1785_v7 = vld [vmem:[%s2278_s7 + $0x30] sm:$0xff]  }
  0x17   :  { %1637 = vmatprep.subr.bf16.mxu1 %v1889_v1 }
  0x1a   :  { %1638 = vmatpush3.bf16.msra.mxu1 %v1771_v8  ;;  %v1787_v8 = vld [vmem:[%s2278_s7 + $0x38] sm:$0xff]  }
  0x1b   :  { %1651 = vmatprep.subr.bf16.mxu1 %v1889_v1 }
  0x1d   :  { %1640 = vmatmul.mubr.msk.bf16.vlgmr.msra.gmra.mrb[4].mxu1 %vm69_vm1, %v263_v6 }
  0x1e   :  { %1652 = vmatpush3.bf16.msra.mxu1 %v1773_v9  ;;  %1655 = vmatprep.mubr.msk.bf16.mxu1 %vm1890_vm0, %v1889_v1  ;;  %v1789_v9 = vld [vmem:[%s2278_s7 + $0x50] sm:$0xff]  }
  0x1f   :  { %1653 = vmatprep.subr.bf16.mxu1 %v1889_v1 }
  0xdc   :  { %v107_v12 = vpop.f32.mrb[0].mxu0 }
  0xdd   :  { %v108_v13 = vadd.f32 %v1419_v10, %v107_v12  ;;  %v1617_v14 = vpop.f32.mrb[1].mxu0  ;;  %v1775_v10 = vld [vmem:[%s2278_s7 + $0x48] sm:$0xff]  }
  0xde   :  { %v110_v15 = vpop.f32.mrb[2].mxu0  ;;  %1654 = vmatpush3.bf16.msra.mxu1 %v1775_v10  ;;  %v1779_v12 = vld [vmem:[%s2278_s7 + $0x68] sm:$0xff]   ;;  %v1791_v10 = vld [vmem:[%s2278_s7 + $0x58] sm:$0xff]  }
  0xdf   :  { %v122_v16 = vrot.slane %v108_v13, %v121_v11  ;;  %v1618_v18 = vpop.f32.mrb[3].mxu0  ;;  %1667 = vmatprep.subr.bf16.mxu1 %v1889_v1  ;;  %v1554_v13 = vld [vmem:[%s2271_s0] sm:$0xff]  }
  0xe0   :  { %v1555_v14 = vunpack.c.l.bf16 %v1554_v13 }
  0xe1   :  { %v123_v19 = vcombine.high %v122_v16, %v122_v16  ;;  %v130_v20 = vrot.slane %v122_v16, %v121_v11  ;;  %1656 = vmatmul.mubr.msk.bf16.vlgmr.msra.gmra.mrb[8].mxu1 %vm69_vm1, %v263_v6 }
  0xe2   :  { %1671 = vmatprep.mubr.msk.bf16.mxu1 %vm1890_vm0, %v1889_v1 }
  0xe3   :  { %v137_v22 = vrot.slane %v123_v19, %v121_v11  ;;  %v141_v23 = vrot.slane %v130_v20, %v140_v17  ;;  %v1777_v11 = vld [vmem:[%s2278_s7 + $0x60] sm:$0xff]  }
  0xe4   :  { %1668 = vmatpush3.bf16.msra.mxu1 %v1777_v11  ;;  %v1793_v11 = vld [vmem:[%s2278_s7 + $0x70] sm:$0xff]  }
  0xe5   :  { %v145_v25 = vrot.slane %v137_v22, %v140_v17  ;;  %v148_v26 = vadd.f32 %v141_v23, %v113_v21  ;;  %1669 = vmatprep.subr.bf16.mxu1 %v1889_v1 }
  0xe7   :  { %v149_v27 = vadd.f32 %v145_v25, %v114_v24  ;;  %1799 = vtanh.f32 %v148_v26 }
  0xe8   :  { %1670 = vmatpush3.bf16.msra.mxu1 %v1779_v12  ;;  %v1795_v12 = vld [vmem:[%s2278_s7 + $0x78] sm:$0xff]  }
  0xe9   :  { %1801 = vtanh.f32 %v149_v27  ;;  %1683 = vmatprep.subr.bf16.mxu1 %v1889_v1 }
  0xeb   :  { %1672 = vmatmul.mubr.msk.bf16.vlgmr.msra.gmra.mrb[12].mxu1 %vm69_vm1, %v263_v6  ;;  %v1784_v6 = vld [vmem:[%s2277_s6 + $0x18] sm:$0xff]  }
  0xec   :  { %1687 = vmatprep.mubr.msk.bf16.mxu1 %vm1890_vm0, %v1889_v1  ;;  %1684 = vmatpush3.bf16.msra.mxu1 %v1781_v2  ;;  %v1796_v2 = vld [vmem:[%s2277_s6 + $0x78] sm:$0xff]  }
  0xed   :  { %1685 = vmatprep.subr.bf16.mxu1 %v1889_v1 }
  0xf0   :  { %1686 = vmatpush3.bf16.msra.mxu1 %v1783_v5 }
  0xf1   :  { %v1800_v28 = vpop.eup %1799  ;;  %1699 = vmatprep.subr.bf16.mxu1 %v1889_v1 }
  0xf2   :  { %v152_v29 = vsel %vm69_vm1, %v1800_v28, 0.0 }
  0xf3   :  { %v1802_v30 = vpop.eup %1801  ;;  %153 = vadd.xlane.f32.xlu0 %v152_v29  ;;  %1688 = vmatmul.mubr.msk.bf16.vlgmr.msra.gmra.mrb[16].mxu1 %vm69_vm1, %v1976_v4 }
  0xf4   :  { %v155_v31 = vsel %vm69_vm1, %v1802_v30, 0.0  ;;  %1700 = vmatpush3.bf16.msra.mxu1 %v1785_v7  ;;  %1703 = vmatprep.mubr.msk.bf16.mxu1 %vm1890_vm0, %v1889_v1 }
  0xf5   :  { %1701 = vmatprep.subr.bf16.mxu1 %v1889_v1 }
  0xf7   :  { %156 = vadd.xlane.f32.xlu0 %v155_v31 }
  0xf8   :  { %1702 = vmatpush3.bf16.msra.mxu1 %v1787_v8 }
  0xf9   :  { %1715 = vmatprep.subr.bf16.mxu1 %v1889_v1 }
  0xfb   :  { %1704 = vmatmul.mubr.msk.bf16.vlgmr.msra.gmra.mrb[20].mxu1 %vm69_vm1, %v1976_v4 }
  0xfc   :  { %1716 = vmatpush3.bf16.msra.mxu1 %v1789_v9  ;;  %1719 = vmatprep.mubr.msk.bf16.mxu1 %vm1890_vm0, %v1889_v1 }
  0xfd   :  { %1717 = vmatprep.subr.bf16.mxu1 %v1889_v1 }
 0x100   :  { %1718 = vmatpush3.bf16.msra.mxu1 %v1791_v10 }
 0x101   :  { %1731 = vmatprep.subr.bf16.mxu1 %v1889_v1 }
 0x103   :  { %1720 = vmatmul.mubr.msk.bf16.vlgmr.msra.gmra.mrb[24].mxu1 %vm69_vm1, %v1976_v4 }
 0x104   :  { %1732 = vmatpush3.bf16.msra.mxu1 %v1793_v11  ;;  %1735 = vmatprep.mubr.msk.bf16.mxu1 %vm1890_vm0, %v1889_v1 }
 0x105   :  { %1733 = vmatprep.subr.bf16.mxu1 %v1889_v1 }
 0x108   :  { %1734 = vmatpush3.bf16.msra.mxu1 %v1795_v12 }
 0x109   :  { %1747 = vmatprep.subr.bf16.mxu1 %v1889_v1 }
 0x10b   :  { %1736 = vmatmul.mubr.msk.bf16.vlgmr.msra.gmra.mrb[28].mxu1 %vm69_vm1, %v1976_v4  ;;  %v1445_v4 = vld [vmem:[%s2279_s8 + $0x2] ss:$0 sm:$0xff] }
 0x10c   :  { %1751 = vmatprep.mubr.msk.bf16.mxu1 %vm1890_vm0, %v1889_v1 }
 0x180   :  { %v154_v33 = vpop.xlane.xlu0 %153 }
 0x181   :  { %v165_v36 = vrot.slane %v154_v33, %v1999_v34 }
 0x184   :  { %v157_v35 = vpop.xlane.xlu0 %156 }
 0x185   :  { %v169_v37 = vrot.slane %v157_v35, %v1999_v34 }
 0x187   :  { %v171_v38 = vsel %vm170_vm2, %v169_v37, %v165_v36 }
 0x188   :  { %v174_v39 = vsel %vm173_vm3, %v171_v38, -inf }
 0x189   :  { %175 = vmax.xlane.f32.xlu1 %v174_v39 }
 0x216   :  { %v176_v42 = vpop.xlane.xlu1 %175 }
 0x217   :  { %v181_v43 = vrot.slane %v176_v42, %v140_v17  ;;  %v185_v44 = vrot.slane %v176_v42, %v184_v41  ;;  %v1770_v42 = vld [vmem:[%s2277_s6 + $0x20] sm:$0xff]  }
 0x219   :  { %v188_v45 = vsub.f32 %v154_v33, %v181_v43  ;;  %v189_v46 = vsub.f32 %v157_v35, %v185_v44  ;;  %v1772_v44 = vld [vmem:[%s2277_s6 + $0x28] sm:$0xff]  }
 0x21b   :  { %v190_v47 = vmul.f32 1.442695, %v188_v45  ;;  %v192_v48 = vmul.f32 1.442695, %v189_v46  ;;  %v1774_v45 = vld [vmem:[%s2277_s6 + $0x40] sm:$0xff]   ;;  %v1776_v46 = vld [vmem:[%s2277_s6 + $0x48] sm:$0xff]  }
 0x21d   :  { %1803 = vpow2.f32 %v190_v47  ;;  %v1778_v47 = vld [vmem:[%s2277_s6 + $0x60] sm:$0xff]  }
 0x21e   :  { %1805 = vpow2.f32 %v192_v48  ;;  %v1780_v48 = vld [vmem:[%s2277_s6 + $0x68] sm:$0xff]  }
 0x227   :  { %v1804_v49 = vpop.eup %1803 }
 0x228   :  { %v1806_v50 = vpop.eup %1805  ;;  %197 = vperm.xlu1 %1761, %v1804_v49  }
 0x229   :  { %200 = vperm.xlu0 %1762, %v1806_v50  }
 0x2a7   :  { %v198_v51 = vpop.permute.xlu1 %197 }
 0x2a8   :  { %v201_v52 = vpop.permute.xlu0 %200  ;;  %v205_v53 = vrot.slane %v198_v51, %v1999_v34 }
 0x2a9   :  { %v209_v54 = vrot.slane %v201_v52, %v1999_v34 }
 0x2ab   :  { %v210_v55 = vsel %vm170_vm2, %v209_v54, %v205_v53 }
 0x2ac   :  { %v212_v56 = vsel %vm173_vm3, %v210_v55, 0.0 }
 0x2ad   :  { %213 = vadd.xlane.f32.xlu1 %v212_v56 }
 0x33a   :  { %v214_v57 = vpop.xlane.xlu1 %213 }
 0x33b   :  { %1807 = vrcp.f32 %v214_v57 }
 0x345   :  { %v1808_v58 = vpop.eup %1807 }
 0x346   :  { %v220_v59 = vrot.slane %v1808_v58, %v140_v17  ;;  %v224_v61 = vrot.slane %v1808_v58, %v184_v41  ;;  %v1556_v17 = vunpack.c.h.bf16 %v1554_v13 }
 0x348   :  { %v227_v60 = vmul.f32 %v1804_v49, %v220_v59  ;;  %v228_v62 = vmul.f32 %v1806_v50, %v224_v61  ;;  %v321_v49 = vpop.f32.mrb[0].mxu1 }
 0x349   :  { %v1625_v50 = vpop.f32.mrb[1].mxu1 }
 0x34a   :  { %235 = vperm.xlu0 %1762, %v227_v60   ;;  %v324_v51 = vpop.f32.mrb[2].mxu1  ;;  %v260_v50 = vld [vmem:[%s2276_s5] sm:$0x3] }
 0x34b   :  { %v1626_v52 = vpop.f32.mrb[3].mxu1 }
 0x34c   :  { %v452_v53 = vpop.f32.mrb[4].mxu1 }
 0x34d   :  { %v1641_v54 = vpop.f32.mrb[5].mxu1 }
 0x34e   :  { %240 = vperm.xlu0 %1762, %v228_v62   ;;  %v455_v55 = vpop.f32.mrb[6].mxu1 }
 0x34f   :  { %v1642_v56 = vpop.f32.mrb[7].mxu1 }
 0x350   :  { %v2111_v57 = vpop.f32.mrb[8].mxu1 }
 0x351   :  { %v1657_v58 = vpop.f32.mrb[9].mxu1 }
 0x352   :  { %v578_v59 = vpop.f32.mrb[10].mxu1 }
 0x353   :  { %v1658_v60 = vpop.f32.mrb[11].mxu1  ;;  %v1786_v59 = vld [vmem:[%s2277_s6 + $0x30] sm:$0xff]  }
 0x354   :  { %v2113_v61 = vpop.f32.mrb[12].mxu1 }
 0x355   :  { %v1673_v62 = vpop.f32.mrb[13].mxu1 }
 0x356   :  { %v701_v63 = vpop.f32.mrb[14].mxu1  ;;  %v1790_v62 = vld [vmem:[%s2277_s6 + $0x50] sm:$0xff]  }
 0x357   :  { %v1674_v0 = vpop.f32.mrb[15].mxu1  ;;  %v1792_v63 = vld [vmem:[%s2277_s6 + $0x58] sm:$0xff]  }
 0x358   :  { %v1794_v0 = vld [vmem:[%s2277_s6 + $0x70] sm:$0xff]  }
 0x3c9   :  { %v236_v15 = vpop.permute.xlu0 %235 }
 0x3ca   :  { %v243_v16 = vmul.f32 %v1555_v14, %v236_v15  ;;  %v1382_v21 = vrot.slane %v236_v15, %v1999_v34  ;;  %v1429_v14 = vld [vmem:[%s2279_s8] ss:$0 sm:$0xff] }
 0x3cc   :  { %v245_v18 = vsel %vm69_vm1, %v243_v16, 0.0 }
 0x3cd   :  { %v246_v19 = vrot.slane %v245_v18, 4  ;;  %v241_v20 = vpop.permute.xlu0 %240 }
 0x3ce   :  { %v244_v22 = vmul.f32 %v1556_v17, %v241_v20  ;;  %v1386_v23 = vrot.slane %v241_v20, %v1999_v34 }
 0x3cf   :  { %v247_v24 = vadd.f32 %v246_v19, %v245_v18 }
 0x3d0   :  { %v252_v25 = vsel %vm69_vm1, %v244_v22, 0.0  ;;  %v1387_v26 = vsel %vm170_vm2, %v1386_v23, %v1382_v21 }
 0x3d1   :  { %v248_v27 = vrot.slane %v247_v24, 2  ;;  %v253_v28 = vrot.slane %v252_v25, 4  ;;  %1389 = vst.msk [vmem:[#allocation4] sm:$0x3] %vm173_vm3, %v1387_v26 }
 0x3d3   :  { %v249_v29 = vadd.f32 %v248_v27, %v247_v24  ;;  %v254_v30 = vadd.f32 %v253_v28, %v252_v25 }
 0x3d5   :  { %v250_v31 = vrot.slane %v249_v29, 1  ;;  %v255_v32 = vrot.slane %v254_v30, 2 }
 0x3d7   :  { %v251_v33 = vadd.f32 %v250_v31, %v249_v29  ;;  %v256_v35 = vadd.f32 %v255_v32, %v254_v30  ;;  %v1461_v29 = vld [vmem:[%s2279_s8 + $0x4] ss:$0 sm:$0xff] }
 0x3d9   :  { %v257_v36 = vrot.slane %v256_v35, 1  ;;  %v261_v37 = vpack.c.bf16 %v251_v33, %v251_v33 }
 0x3db   :  { %v258_v38 = vadd.f32 %v257_v36, %v256_v35  ;;  %v329_v34 = vunpack.c.l.b16 %v261_v37 }
 0x3dd   :  { %v262_v39 = vpack.c.bf16 %v258_v38, %v258_v38 }
 0x3df   :  { %v330_v40 = vunpack.c.l.b16 %v262_v39  ;;  %v1477_v39 = vld [vmem:[%s2279_s8 + $0x6] ss:$0 sm:$0xff] }
 0x3e1   :  { %v331_v41 = vsel %vm170_vm2, %v330_v40, %v329_v34 }
 0x3e2   :  { %v332_v43 = vpack.c.b16 %v331_v41, %v331_v41 }
 0x3e4   :  { %1632 = vmatmul.mubr.msk.bf16.vlgmr.msra.gmra.mrb[4].mxu0 %vm69_vm1, %v332_v43 }
 0x3e5   :  { %1644 = vmatpush3.bf16.msra.mxu0 %v1770_v42  ;;  %1647 = vmatprep.mubr.msk.bf16.mxu0 %vm1890_vm0, %v1889_v1 }
 0x3e6   :  { %1645 = vmatprep.subr.bf16.mxu0 %v1889_v1 }
 0x3e9   :  { %1646 = vmatpush3.bf16.msra.mxu0 %v1772_v44 }
 0x3ea   :  { %1659 = vmatprep.subr.bf16.mxu0 %v1889_v1 }
 0x3ec   :  { %1648 = vmatmul.mubr.msk.bf16.vlgmr.msra.gmra.mrb[8].mxu0 %vm69_vm1, %v332_v43 }
 0x3ed   :  { %1660 = vmatpush3.bf16.msra.mxu0 %v1774_v45  ;;  %1663 = vmatprep.mubr.msk.bf16.mxu0 %vm1890_vm0, %v1889_v1 }
 0x3ee   :  { %1661 = vmatprep.subr.bf16.mxu0 %v1889_v1 }
 0x3f1   :  { %1662 = vmatpush3.bf16.msra.mxu0 %v1776_v46 }
 0x3f2   :  { %1675 = vmatprep.subr.bf16.mxu0 %v1889_v1 }
 0x3f4   :  { %1664 = vmatmul.mubr.msk.bf16.vlgmr.msra.gmra.mrb[12].mxu0 %vm69_vm1, %v332_v43 }
 0x3f5   :  { %1676 = vmatpush3.bf16.msra.mxu0 %v1778_v47  ;;  %1679 = vmatprep.mubr.msk.bf16.mxu0 %vm1890_vm0, %v1889_v1 }
 0x3f6   :  { %1677 = vmatprep.subr.bf16.mxu0 %v1889_v1 }
 0x3f9   :  { %1678 = vmatpush3.bf16.msra.mxu0 %v1780_v48 }
 0x3fa   :  { %1691 = vmatprep.subr.bf16.mxu0 %v1889_v1 }
 0x3fc   :  { %1680 = vmatmul.mubr.msk.bf16.vlgmr.msra.gmra.mrb[16].mxu0 %vm69_vm1, %v332_v43 }
 0x3fd   :  { %1695 = vmatprep.mubr.msk.bf16.mxu0 %vm1890_vm0, %v1889_v1  ;;  %1692 = vmatpush3.bf16.msra.mxu0 %v1782_v3  ;;  %v848_v3 = vpop.f32.mrb[16].mxu1 }
 0x3fe   :  { %1693 = vmatprep.subr.bf16.mxu0 %v1889_v1  ;;  %v1689_v5 = vpop.f32.mrb[17].mxu1 }
 0x401   :  { %1694 = vmatpush3.bf16.msra.mxu0 %v1784_v6  ;;  %v851_v6 = vpop.f32.mrb[18].mxu1 }
 0x402   :  { %1707 = vmatprep.subr.bf16.mxu0 %v1889_v1  ;;  %v1690_v7 = vpop.f32.mrb[19].mxu1 }
 0x403   :  { %v974_v8 = vpop.f32.mrb[20].mxu1 }
 0x404   :  { %v1705_v9 = vpop.f32.mrb[21].mxu1 }
 0x405   :  { %v977_v10 = vpop.f32.mrb[22].mxu1 }
 0x406   :  { %v1706_v11 = vpop.f32.mrb[23].mxu1 }
 0x407   :  { %v1097_v12 = vpop.f32.mrb[24].mxu1 }
 0x4b7   :  { %v382_v13 = vpop.f32.mrb[4].mxu0 }
 0x4b8   :  { %v383_v15 = vadd.f32 %v382_v13, %v321_v49  ;;  %v1633_v16 = vpop.f32.mrb[5].mxu0  ;;  %v1721_v13 = vpop.f32.mrb[25].mxu1 }
 0x4b9   :  { %v385_v17 = vpop.f32.mrb[6].mxu0 }
 0x4ba   :  { %v395_v18 = vadd.f32 %v1429_v14, %v383_v15  ;;  %v1634_v19 = vpop.f32.mrb[7].mxu0  ;;  %v1100_v14 = vpop.f32.mrb[26].mxu1 }
 0x4bb   :  { %v1722_v15 = vpop.f32.mrb[27].mxu1 }
 0x4bc   :  { %v1478_v20 = vmul.f32 -1.442695, %v395_v18  ;;  %v1220_v16 = vpop.f32.mrb[28].mxu1 }
 0x4bd   :  { %v1737_v17 = vpop.f32.mrb[29].mxu1 }
 0x4be   :  { %1809 = vpow2.f32 %v1478_v20  ;;  %v1223_v18 = vpop.f32.mrb[30].mxu1  ;;  %v1797_v20 = vld [vmem:[%s2280_s9] sm:$0xff]  }
 0x4bf   :  { %v504_v21 = vpop.f32.mrb[8].mxu0  ;;  %v1738_v19 = vpop.f32.mrb[31].mxu1  ;;  %1748 = vmatpush3.bf16.msra.mxu1 %v1797_v20 }
 0x4c0   :  { %v505_v22 = vadd.f32 %v504_v21, %v452_v53  ;;  %v1649_v23 = vpop.f32.mrb[9].mxu0  ;;  %v1798_v21 = vld [vmem:[%s2280_s9 + $0x8] sm:$0xff]   ;;  %1749 = vmatprep.subr.bf16.mxu1 %v1889_v1 }
 0x4c1   :  { %v507_v24 = vpop.f32.mrb[10].mxu0 }
 0x4c2   :  { %v518_v25 = vadd.f32 %v1445_v4, %v505_v22  ;;  %v1650_v26 = vpop.f32.mrb[11].mxu0  ;;  %v1497_v22 = vld [vmem:[%s2279_s8 + $0x1] ss:$0 sm:$0xff] }
 0x4c3   :  { %1750 = vmatpush3.bf16.msra.mxu1 %v1798_v21 }
 0x4c4   :  { %v1479_v27 = vmul.f32 -1.442695, %v518_v25 }
 0x4c6   :  { %1811 = vpow2.f32 %v1479_v27 }
 0x4c7   :  { %v627_v28 = vpop.f32.mrb[12].mxu0 }
 0x4c8   :  { %v1810_v30 = vpop.eup %1809  ;;  %v628_v31 = vadd.f32 %v627_v28, %v2111_v57  ;;  %v1665_v32 = vpop.f32.mrb[13].mxu0 }
 0x4c9   :  { %v768_v33 = vadd.f32 1.0, %v1810_v30  ;;  %v630_v35 = vpop.f32.mrb[14].mxu0  ;;  %v1513_v30 = vld [vmem:[%s2279_s8 + $0x3] ss:$0 sm:$0xff] }
 0x4ca   :  { %v641_v36 = vadd.f32 %v1461_v29, %v628_v31  ;;  %v1666_v37 = vpop.f32.mrb[15].mxu0 }
 0x4cb   :  { %1813 = vrcp.f32 %v768_v33 }
 0x4cc   :  { %1815 = vtanh.f32 %v641_v36 }
 0x4cf   :  { %v750_v38 = vpop.f32.mrb[16].mxu0 }
 0x4d0   :  { %v1812_v34 = vpop.eup %1811  ;;  %v751_v40 = vadd.f32 %v750_v38, %v2113_v61  ;;  %v1681_v41 = vpop.f32.mrb[17].mxu0  ;;  %v1788_v61 = vld [vmem:[%s2277_s6 + $0x38] sm:$0xff]   ;;  %v1529_v38 = vld [vmem:[%s2279_s8 + $0x5] ss:$0 sm:$0xff] }
 0x4d1   :  { %v774_v42 = vadd.f32 1.0, %v1812_v34  ;;  %v753_v43 = vpop.f32.mrb[18].mxu0 }
 0x4d2   :  { %v764_v44 = vadd.f32 %v1477_v39, %v751_v40  ;;  %v1682_v45 = vpop.f32.mrb[19].mxu0 }
 0x4d3   :  { %1817 = vrcp.f32 %v774_v42 }
 0x4d4   :  { %v1480_v46 = vmul.f32 -1.442695, %v764_v44 }
 0x4d5   :  { %v1814_v47 = vpop.eup %1813 }
 0x4d6   :  { %v1816_v48 = vpop.eup %1815  ;;  %1819 = vpow2.f32 %v1480_v46  ;;  %v1545_v46 = vld [vmem:[%s2279_s8 + $0x7] ss:$0 sm:$0xff]  ;;  %s1893_s8 = smov [#allocation4]  }
 0x4d7   :  { %v785_v49 = vmul.f32 %v1816_v48, %v1814_v47  ;;  %s1406_s29 = sshll.u32 %s1893_s8, 4  ;;  %s1407_s29 = int_to_ptr.vmem [resolvable:$true] %s1406_s29 }
 0x4d8   :  { %s1841_s30 = scalar_lea.vmem %s1407_s29, 32  ;;  %p1846_p1 = scmp.lt.s32.totalorder %s1407_s29, %s1407_s29 }
 0x4d9   :  { %p1842_p0 = scmp.ne.s32.totalorder %s1407_s29, %s1841_s30  ;;  %p1847_p2 = scmp.lt.s32.totalorder %s1841_s30, %s1841_s30 }
 0x4db   :  { %p1848_p3 = por %p1847_p2, %p1846_p1 }
 0x4dd   :  { %v1818_v51 = vpop.eup %1817  ;;  %p1849_p4 = pnand %p1848_p3, %p1842_p0 }
 0x4de   :  { %v784_v52 = vmul.f32 %v1818_v51, %v260_v50 }
 0x4e0   :  { %v1820_v53 = vpop.eup %1819  ;;  %v786_v54 = vadd.f32 %v785_v49, %v784_v52 }
 0x4e1   :  { %v781_v55 = vadd.f32 1.0, %v1820_v53 }
 0x4e2   :  { %1821 = vtanh.f32 %v786_v54 }
 0x4e3   :  { %1823 = vrcp.f32 %v781_v55 }
 0x4ec   :  { %v1822_v56 = vpop.eup %1821 }
 0x4ed   :  { %v1824_v57 = vpop.eup %1823 }
 0x4ee   :  { %v788_v58 = vmul.f32 %v1824_v57, %v1822_v56 }
 0x4f0   :  { %v791_v60 = vpack.c.bf16 %v788_v58, %v788_v58  ;;  %v1481_v58 = vld [vmem:[%s2276_s5 + $0x2] sm:$0x3] }
 0x4f2   :  { %1696 = vmatmul.mubr.msk.bf16.vlgmr.msra.gmra.mrb[20].mxu0 %vm69_vm1, %v791_v60 }
 0x4f3   :  { %1708 = vmatpush3.bf16.msra.mxu0 %v1786_v59  ;;  %1711 = vmatprep.mubr.msk.bf16.mxu0 %vm1890_vm0, %v1889_v1 }
 0x4f4   :  { %1709 = vmatprep.subr.bf16.mxu0 %v1889_v1 }
 0x4f7   :  { %1710 = vmatpush3.bf16.msra.mxu0 %v1788_v61 }
 0x4f8   :  { %1723 = vmatprep.subr.bf16.mxu0 %v1889_v1 }
 0x4fa   :  { %1712 = vmatmul.mubr.msk.bf16.vlgmr.msra.gmra.mrb[24].mxu0 %vm69_vm1, %v791_v60 }
 0x4fb   :  { %1724 = vmatpush3.bf16.msra.mxu0 %v1790_v62  ;;  %1727 = vmatprep.mubr.msk.bf16.mxu0 %vm1890_vm0, %v1889_v1 }
 0x4fc   :  { %1725 = vmatprep.subr.bf16.mxu0 %v1889_v1 }
 0x4ff   :  { %1726 = vmatpush3.bf16.msra.mxu0 %v1792_v63 }
 0x500   :  { %1739 = vmatprep.subr.bf16.mxu0 %v1889_v1 }
 0x502   :  { %1728 = vmatmul.mubr.msk.bf16.vlgmr.msra.gmra.mrb[28].mxu0 %vm69_vm1, %v791_v60 }
 0x503   :  { %1740 = vmatpush3.bf16.msra.mxu0 %v1794_v0  ;;  %1743 = vmatprep.mubr.msk.bf16.mxu0 %vm1890_vm0, %v1889_v1 }
 0x504   :  { %1741 = vmatprep.subr.bf16.mxu0 %v1889_v1 }
 0x507   :  { %1742 = vmatpush3.bf16.msra.mxu0 %v1796_v2 }
 0x50a   :  { %1744 = vmatmul.mubr.msk.bf16.vlgmr.msra.gmra.mrb[32].mxu0 %vm69_vm1, %v791_v60 }
 0x5c5   :  { %v903_v4 = vpop.f32.mrb[20].mxu0 }
 0x5c6   :  { %v904_v23 = vadd.f32 %v903_v4, %v848_v3  ;;  %v1697_v24 = vpop.f32.mrb[21].mxu0 }
 0x5c7   :  { %v906_v25 = vpop.f32.mrb[22].mxu0 }
 0x5c8   :  { %v917_v26 = vadd.f32 %v1497_v22, %v904_v23  ;;  %v1698_v27 = vpop.f32.mrb[23].mxu0 }
 0x5ca   :  { %v1546_v28 = vmul.f32 -1.442695, %v917_v26 }
 0x5cc   :  { %1825 = vpow2.f32 %v1546_v28 }
 0x5cd   :  { %v1026_v29 = vpop.f32.mrb[24].mxu0 }
 0x5ce   :  { %v1027_v31 = vadd.f32 %v1026_v29, %v974_v8  ;;  %v1713_v1 = vpop.f32.mrb[25].mxu0 }
 0x5cf   :  { %v1029_v32 = vpop.f32.mrb[26].mxu0 }
 0x5d0   :  { %v1040_v33 = vadd.f32 %v1513_v30, %v1027_v31  ;;  %v1714_v35 = vpop.f32.mrb[27].mxu0 }
 0x5d2   :  { %v1547_v36 = vmul.f32 -1.442695, %v1040_v33 }
 0x5d4   :  { %1827 = vpow2.f32 %v1547_v36 }
 0x5d5   :  { %v1149_v37 = vpop.f32.mrb[28].mxu0 }
 0x5d6   :  { %v1826_v39 = vpop.eup %1825  ;;  %v1150_v34 = vadd.f32 %v1149_v37, %v1097_v12  ;;  %v1729_v40 = vpop.f32.mrb[29].mxu0 }
 0x5d7   :  { %v1290_v41 = vadd.f32 1.0, %v1826_v39  ;;  %v1152_v42 = vpop.f32.mrb[30].mxu0 }
 0x5d8   :  { %v1163_v43 = vadd.f32 %v1529_v38, %v1150_v34  ;;  %v1730_v44 = vpop.f32.mrb[31].mxu0 }
 0x5d9   :  { %1829 = vrcp.f32 %v1290_v41 }
 0x5da   :  { %1831 = vtanh.f32 %v1163_v43 }
 0x5dd   :  { %v1272_v45 = vpop.f32.mrb[32].mxu0 }
 0x5de   :  { %v1828_v47 = vpop.eup %1827  ;;  %v1273_v48 = vadd.f32 %v1272_v45, %v1220_v16  ;;  %v1745_v49 = vpop.f32.mrb[33].mxu0 }
 0x5df   :  { %v1296_v50 = vadd.f32 1.0, %v1828_v47  ;;  %v1275_v51 = vpop.f32.mrb[34].mxu0 }
 0x5e0   :  { %v1286_v52 = vadd.f32 %v1545_v46, %v1273_v48  ;;  %v1746_v53 = vpop.f32.mrb[35].mxu0 }
 0x5e1   :  { %1833 = vrcp.f32 %v1296_v50 }
 0x5e2   :  { %v1548_v54 = vmul.f32 -1.442695, %v1286_v52 }
 0x5e3   :  { %v1830_v55 = vpop.eup %1829 }
 0x5e4   :  { %v1832_v56 = vpop.eup %1831  ;;  %1835 = vpow2.f32 %v1548_v54 }
 0x5e5   :  { %v1307_v57 = vmul.f32 %v1832_v56, %v1830_v55 }
 0x5eb   :  { %v1834_v59 = vpop.eup %1833 }
 0x5ec   :  { %v1306_v60 = vmul.f32 %v1834_v59, %v1481_v58 }
 0x5ee   :  { %v1836_v61 = vpop.eup %1835  ;;  %v1308_v62 = vadd.f32 %v1307_v57, %v1306_v60 }
 0x5ef   :  { %v1303_v63 = vadd.f32 1.0, %v1836_v61 }
 0x5f0   :  { %1837 = vtanh.f32 %v1308_v62 }
 0x5f1   :  { %1839 = vrcp.f32 %v1303_v63 }
 0x5fa   :  { %v1838_v0 = vpop.eup %1837 }
 0x5fb   :  { %v1840_v2 = vpop.eup %1839 }
 0x5fc   :  { %v1310_v3 = vmul.f32 %v1840_v2, %v1838_v0 }
 0x5fe   :  { %v1311_v5 = vpack.c.bf16 %v1310_v3, %v1310_v3 }
 0x600   :  { %1752 = vmatmul.mubr.msk.bf16.vlgmr.msra.gmra.mrb[32].mxu1 %vm69_vm1, %v1311_v5 }
 0x601   :  { %1852 = shalt.err (!%p1849_p4)
}
 0x602   :  { %s1853_s1 = scalar_lea.hbm %s2283_s12, 32 }
 0x603   :  { %p1854_p5 = scmp.ne.s32.totalorder %s2283_s12, %s1853_s1  ;;  %p1857_p6 = scmp.lt.u32.totalorder %s1853_s1, %s2283_s12 }
 0x605   :  { %p1859_p7 = pnand %p1857_p6, %p1854_p5 }
 0x607   :  { %1862 = shalt.err (!%p1859_p7)
}
 0x608   :  { %1409 = dma.vmem_to_hbm [thread:$0]  %s1407_s29, 32, %s2283_s12, [#allocation5]   ;;  %v1549_v6 = vld [vmem:[%s2281_s10] ss:$0 sm:$0xff] }
 0x609   :  { %s1894_s6 = smov [#allocation2]  }
 0x60a   :  { %s1396_s20 = sshll.u32 %s1894_s6, 4  ;;  %s1397_s20 = int_to_ptr.vmem [resolvable:$true] %s1396_s20 }
 0x60b   :  { %s1863_s21 = scalar_lea.vmem %s1397_s20, 32  ;;  %p1868_p9 = scmp.lt.s32.totalorder %s1397_s20, %s1397_s20 }
 0x60c   :  { %p1864_p8 = scmp.ne.s32.totalorder %s1397_s20, %s1863_s21  ;;  %p1869_p10 = scmp.lt.s32.totalorder %s1863_s21, %s1863_s21 }
 0x60e   :  { %p1870_p11 = por %p1869_p10, %p1868_p9 }
 0x610   :  { %p1871_p12 = pnand %p1870_p11, %p1864_p8 }
 0x6d3   :  { %v1372_v7 = vpop.f32.mrb[32].mxu1 }
 0x6d4   :  { %v1373_v8 = vadd.f32 %v1549_v6, %v1372_v7  ;;  %v1753_v9 = vpop.f32.mrb[33].mxu1 }
 0x6d5   :  { %v1375_v10 = vpop.f32.mrb[34].mxu1 }
 0x6d6   :  { %1378 = vst [vmem:[#allocation2] sm:$0x3] %v1373_v8  ;;  %v1754_v11 = vpop.f32.mrb[35].mxu1 }
 0x6d7   :  { %1874 = shalt.err (!%p1871_p12)
}
 0x6d8   :  { %s1875_s10 = scalar_lea.hbm %s2282_s11, 32 }
 0x6d9   :  { %p1876_p13 = scmp.ne.s32.totalorder %s2282_s11, %s1875_s10  ;;  %p1879_p0 = scmp.lt.u32.totalorder %s1875_s10, %s2282_s11 }
 0x6db   :  { %p1881_p1 = pnand %p1879_p0, %p1876_p13 }
 0x6dd   :  { %1884 = shalt.err (!%p1881_p1)
}
 0x6de   :  { %1399 = dma.vmem_to_hbm [thread:$0]  %s1397_s20, 32, %s2282_s11, [#allocation3]  }
 0x6df   :  { %1885 = dma.done.wait [#allocation3], 32  }
 0x6e0   :  { %1886 = vsyncadd [#allocation3], 4294967264 }
 0x6e1   :  { %1887 = dma.done.wait [#allocation5], 32  }
 0x6e2   :  { %1888 = vsyncadd [#allocation5], 4294967264 }
 0x6e3   :  { %1416 = vsyncpa [#allocation3], 1 }
 0x6e4   :  { %1417 = vsyncpa [#allocation5], 1 }

// kernel: alstm_forward.3
= control target key start
LH: loop header
LB: loop body
LE: loop exit
PB: predicated region body
PF: predicated region fallthrough
CT: control target
= control target key end

     0   :  { %vm18_vm0 = vcmask 254976   ;;  %v2298_v0 = vmov 0.0   ;;  %vm2299_vm1 = vmmov 0   ;;  %vm56_vm2 = vcmask 261120   ;;  %s2758_s1 = inlined_call_operand.vmem [shape: bf16[4,32,32], index: 1, kind: input, shape index: {}]   ;;  %s2759_s0 = inlined_call_operand.vmem [shape: f32[4,8,2,32], index: 0, kind: input, shape index: {}]   ;;  %s2760_s2 = inlined_call_operand.vmem [shape: bf16[8,2,32], index: 2, kind: output, shape index: {0}]   ;;  %s2761_s3 = inlined_call_operand.vmem [shape: f32[2,32], index: 3, kind: output, shape index: {1}]  }
   0x1   :  { %1900 = vmatprep.subr.bf16.mxu0 %v2298_v0  ;;  %1908 = vmatprep.subr.bf16.mxu1 %v2298_v0  ;;  %v2325_v1 = vld [vmem:[%s2758_s1] sm:$0xff]   ;;  %19 = vst.msk [vmem:[#allocation2] sm:$0x3] %vm18_vm0, %v2298_v0  ;;  %20 = vst.msk [vmem:[#allocation3] sm:$0x3] %vm18_vm0, %v2298_v0  ;;  %v2334_v2 = vld [vmem:[%s2758_s1 + $0x10] sm:$0xff]  }
   0x2   :  { %1904 = vmatprep.mubr.msk.bf16.mxu0 %vm2299_vm1, %v2298_v0  ;;  %1912 = vmatprep.mubr.msk.bf16.mxu1 %vm2299_vm1, %v2298_v0  ;;  %v2344_v3 = vld [vmem:[%s2758_s1 + $0x8] sm:$0xff]   ;;  %v2351_v4 = vld [vmem:[%s2758_s1 + $0x18] sm:$0xff]   ;;  %v2357_v5 = vld [vmem:[%s2758_s1 + $0x20] sm:$0xff]   ;;  %vm287_vm3 = vcmask 253952  }
   0x3   :  { %1901 = vmatpush3.bf16.msra.mxu0 %v2325_v1  ;;  %1909 = vmatpush3.bf16.msra.mxu1 %v2334_v2  ;;  %v2363_v6 = vld [vmem:[%s2758_s1 + $0x30] sm:$0xff]   ;;  %v2375_v9 = vld [vmem:[%s2758_s1 + $0x28] sm:$0xff]   ;;  %v2380_v10 = vld [vmem:[%s2758_s1 + $0x38] sm:$0xff]  }
   0x4   :  { %1902 = vmatprep.subr.bf16.mxu0 %v2298_v0  ;;  %1910 = vmatprep.subr.bf16.mxu1 %v2298_v0  ;;  %v43_v11 = vld [vmem:[%s2759_s0] sm:$0x3]  ;;  %v1705_v12 = vld [vmem:[%s2759_s0 + $0x10] sm:$0x3]  ;;  %v1720_v55 = vld [vmem:[%s2759_s0 + $0x2] sm:$0x3] }
   0x5   :  { %v1713_v25 = vld [vmem:[%s2759_s0 + $0x30] sm:$0x3]  ;;  %v1709_v28 = vld [vmem:[%s2759_s0 + $0x20] sm:$0x3]  ;;  %v1722_v56 = vld [vmem:[%s2759_s0 + $0x12] sm:$0x3] }
   0x7   :  { %1903 = vmatpush3.bf16.msra.mxu0 %v2344_v3  ;;  %1911 = vmatpush3.bf16.msra.mxu1 %v2351_v4 }
   0x8   :  { %v40_v7 = vld [vmem:[#allocation2] sm:$0x3]  ;;  %1916 = vmatprep.subr.bf16.mxu0 %v2298_v0  ;;  %1924 = vmatprep.subr.bf16.mxu1 %v2298_v0  ;;  %v41_v44 = vld [vmem:[#allocation3] sm:$0x3] }
   0x9   :  { %v42_v8 = vpack.c.bf16 %v40_v7, %v40_v7 }
   0xb   :  { %1905 = vmatmul.mubr.msk.bf16.vlgmr.msra.gmra.mrb[0].mxu0 %vm56_vm2, %v42_v8  ;;  %1913 = vmatmul.mubr.msk.bf16.vlgmr.msra.gmra.mrb[0].mxu1 %vm56_vm2, %v42_v8 }
   0xc   :  { %1917 = vmatpush3.bf16.msra.mxu0 %v2357_v5  ;;  %1925 = vmatpush3.bf16.msra.mxu1 %v2363_v6 }
   0xd   :  { %1918 = vmatprep.subr.bf16.mxu0 %v2298_v0  ;;  %1926 = vmatprep.subr.bf16.mxu1 %v2298_v0 }
   0xe   :  { %1920 = vmatprep.mubr.msk.bf16.mxu0 %vm2299_vm1, %v2298_v0  ;;  %1928 = vmatprep.mubr.msk.bf16.mxu1 %vm2299_vm1, %v2298_v0 }
  0x10   :  { %1919 = vmatpush3.bf16.msra.mxu0 %v2375_v9  ;;  %1927 = vmatpush3.bf16.msra.mxu1 %v2380_v10 }
  0x11   :  { %1932 = vmatprep.subr.bf16.mxu0 %v2298_v0  ;;  %1940 = vmatprep.subr.bf16.mxu1 %v2298_v0 }
  0x13   :  { %1921 = vmatmul.mubr.msk.bf16.vlgmr.msra.gmra.mrb[4].mxu0 %vm56_vm2, %v42_v8  ;;  %1929 = vmatmul.mubr.msk.bf16.vlgmr.msra.gmra.mrb[4].mxu1 %vm56_vm2, %v42_v8 }
  0x14   :  { %1933 = vmatpush3.bf16.msra.mxu0 %v2325_v1  ;;  %1941 = vmatpush3.bf16.msra.mxu1 %v2334_v2 }
  0x15   :  { %1934 = vmatprep.subr.bf16.mxu0 %v2298_v0  ;;  %1942 = vmatprep.subr.bf16.mxu1 %v2298_v0 }
  0x16   :  { %1936 = vmatprep.mubr.msk.bf16.mxu0 %vm2299_vm1, %v2298_v0  ;;  %1944 = vmatprep.mubr.msk.bf16.mxu1 %vm2299_vm1, %v2298_v0 }
  0x18   :  { %1935 = vmatpush3.bf16.msra.mxu0 %v2344_v3  ;;  %1943 = vmatpush3.bf16.msra.mxu1 %v2351_v4 }
  0x19   :  { %1948 = vmatprep.subr.bf16.mxu0 %v2298_v0  ;;  %1956 = vmatprep.subr.bf16.mxu1 %v2298_v0 }
  0xde   :  { %v94_v13 = vpop.f32.mrb[0].mxu0  ;;  %v148_v14 = vpop.f32.mrb[0].mxu1 }
  0xdf   :  { %v95_v15 = vadd.f32 %v94_v13, %v43_v11  ;;  %v149_v16 = vadd.f32 %v1705_v12, %v148_v14  ;;  %v1906_v17 = vpop.f32.mrb[1].mxu0  ;;  %v1914_v18 = vpop.f32.mrb[1].mxu1  ;;  %v1726_v14 = vld [vmem:[%s2759_s0 + $0x32] sm:$0x3] }
  0xe0   :  { %v97_v19 = vpop.f32.mrb[2].mxu0  ;;  %v151_v20 = vpop.f32.mrb[2].mxu1 }
  0xe1   :  { %v1717_v21 = vmul.f32 -1.442695, %v95_v15  ;;  %v1718_v22 = vmul.f32 -1.442695, %v149_v16  ;;  %v1907_v23 = vpop.f32.mrb[3].mxu0  ;;  %v1915_v24 = vpop.f32.mrb[3].mxu1 }
  0xe2   :  { %v1724_v20 = vld [vmem:[%s2759_s0 + $0x22] sm:$0x3] }
  0xe3   :  { %2166 = vpow2.f32 %v1717_v21 }
  0xe4   :  { %2168 = vpow2.f32 %v1718_v22 }
  0xe6   :  { %v202_v26 = vpop.f32.mrb[4].mxu0  ;;  %v256_v27 = vpop.f32.mrb[4].mxu1 }
  0xe7   :  { %v257_v29 = vadd.f32 %v1713_v25, %v256_v27  ;;  %v1922_v30 = vpop.f32.mrb[5].mxu0  ;;  %v1930_v31 = vpop.f32.mrb[5].mxu1  ;;  %v203_v37 = vadd.f32 %v1709_v28, %v202_v26 }
  0xe8   :  { %v205_v32 = vpop.f32.mrb[6].mxu0  ;;  %v259_v33 = vpop.f32.mrb[6].mxu1 }
  0xe9   :  { %v1719_v34 = vmul.f32 -1.442695, %v257_v29  ;;  %v1923_v35 = vpop.f32.mrb[7].mxu0  ;;  %v1931_v36 = vpop.f32.mrb[7].mxu1 }
  0xeb   :  { %2170 = vpow2.f32 %v1719_v34 }
  0xec   :  { %2172 = vtanh.f32 %v203_v37 }
  0xed   :  { %v2167_v38 = vpop.eup %2166 }
  0xee   :  { %v2169_v39 = vpop.eup %2168  ;;  %v265_v40 = vadd.f32 1.0, %v2167_v38 }
  0xef   :  { %v271_v41 = vadd.f32 1.0, %v2169_v39 }
  0xf0   :  { %2174 = vrcp.f32 %v265_v40 }
  0xf1   :  { %2176 = vrcp.f32 %v271_v41 }
  0xf5   :  { %v2171_v42 = vpop.eup %2170 }
  0xf6   :  { %v2173_v43 = vpop.eup %2172  ;;  %v278_v46 = vadd.f32 1.0, %v2171_v42 }
  0xf8   :  { %2178 = vrcp.f32 %v278_v46 }
  0xfa   :  { %v2175_v45 = vpop.eup %2174 }
  0xfb   :  { %v2177_v47 = vpop.eup %2176  ;;  %v282_v48 = vmul.f32 %v2175_v45, %v2173_v43  ;;  %v1732_v43 = vld [vmem:[%s2759_s0 + $0x4] sm:$0x3] }
  0xfc   :  { %v281_v49 = vmul.f32 %v2177_v47, %v41_v44  ;;  %v1734_v44 = vld [vmem:[%s2759_s0 + $0x14] sm:$0x3] }
  0xfe   :  { %v2418_v50 = vadd.f32 %v282_v48, %v281_v49 }
 0x100   :  { %2180 = vtanh.f32 %v2418_v50 }
 0x102   :  { %v2179_v51 = vpop.eup %2178 }
 0x10a   :  { %v2181_v52 = vpop.eup %2180 }
 0x10b   :  { %v285_v53 = vmul.f32 %v2181_v52, %v2179_v51 }
 0x10d   :  { %v286_v54 = vpack.c.bf16 %v285_v53, %v285_v53 }
 0x10f   :  { %288 = vst.msk [vmem:[%s2760_s2] sm:$0x1] %vm287_vm3, %v286_v54  ;;  %1937 = vmatmul.mubr.msk.bf16.vlgmr.msra.gmra.mrb[8].mxu0 %vm56_vm2, %v286_v54  ;;  %1945 = vmatmul.mubr.msk.bf16.vlgmr.msra.gmra.mrb[8].mxu1 %vm56_vm2, %v286_v54 }
 0x110   :  { %1949 = vmatpush3.bf16.msra.mxu0 %v2357_v5  ;;  %1957 = vmatpush3.bf16.msra.mxu1 %v2363_v6 }
 0x111   :  { %1950 = vmatprep.subr.bf16.mxu0 %v2298_v0  ;;  %1958 = vmatprep.subr.bf16.mxu1 %v2298_v0 }
 0x112   :  { %1952 = vmatprep.mubr.msk.bf16.mxu0 %vm2299_vm1, %v2298_v0  ;;  %1960 = vmatprep.mubr.msk.bf16.mxu1 %vm2299_vm1, %v2298_v0 }
 0x114   :  { %1951 = vmatpush3.bf16.msra.mxu0 %v2375_v9  ;;  %1959 = vmatpush3.bf16.msra.mxu1 %v2380_v10 }
 0x115   :  { %1964 = vmatprep.subr.bf16.mxu0 %v2298_v0  ;;  %1972 = vmatprep.subr.bf16.mxu1 %v2298_v0 }
 0x117   :  { %1953 = vmatmul.mubr.msk.bf16.vlgmr.msra.gmra.mrb[12].mxu0 %vm56_vm2, %v286_v54  ;;  %1961 = vmatmul.mubr.msk.bf16.vlgmr.msra.gmra.mrb[12].mxu1 %vm56_vm2, %v286_v54 }
 0x118   :  { %1965 = vmatpush3.bf16.msra.mxu0 %v2325_v1  ;;  %1973 = vmatpush3.bf16.msra.mxu1 %v2334_v2 }
 0x119   :  { %1966 = vmatprep.subr.bf16.mxu0 %v2298_v0  ;;  %1974 = vmatprep.subr.bf16.mxu1 %v2298_v0 }
 0x11a   :  { %1968 = vmatprep.mubr.msk.bf16.mxu0 %vm2299_vm1, %v2298_v0  ;;  %1976 = vmatprep.mubr.msk.bf16.mxu1 %vm2299_vm1, %v2298_v0 }
 0x11c   :  { %1967 = vmatpush3.bf16.msra.mxu0 %v2344_v3  ;;  %1975 = vmatpush3.bf16.msra.mxu1 %v2351_v4 }
 0x11d   :  { %1980 = vmatprep.subr.bf16.mxu0 %v2298_v0  ;;  %1988 = vmatprep.subr.bf16.mxu1 %v2298_v0 }
 0x1e2   :  { %v328_v57 = vpop.f32.mrb[8].mxu0  ;;  %v370_v58 = vpop.f32.mrb[8].mxu1 }
 0x1e3   :  { %v329_v59 = vadd.f32 %v1720_v55, %v328_v57  ;;  %v371_v60 = vadd.f32 %v1722_v56, %v370_v58  ;;  %v1938_v61 = vpop.f32.mrb[9].mxu0  ;;  %v1946_v62 = vpop.f32.mrb[9].mxu1  ;;  %v1738_v57 = vld [vmem:[%s2759_s0 + $0x34] sm:$0x3] }
 0x1e4   :  { %v331_v63 = vpop.f32.mrb[10].mxu0  ;;  %v373_v7 = vpop.f32.mrb[10].mxu1 }
 0x1e5   :  { %v1728_v8 = vmul.f32 -1.442695, %v329_v59  ;;  %v1729_v11 = vmul.f32 -1.442695, %v371_v60  ;;  %v1939_v12 = vpop.f32.mrb[11].mxu0  ;;  %v1947_v13 = vpop.f32.mrb[11].mxu1 }
 0x1e6   :  { %v1736_v63 = vld [vmem:[%s2759_s0 + $0x24] sm:$0x3] }
 0x1e7   :  { %2182 = vpow2.f32 %v1728_v8 }
 0x1e8   :  { %2184 = vpow2.f32 %v1729_v11 }
 0x1ea   :  { %v412_v15 = vpop.f32.mrb[12].mxu0  ;;  %v454_v16 = vpop.f32.mrb[12].mxu1 }
 0x1eb   :  { %v455_v17 = vadd.f32 %v1726_v14, %v454_v16  ;;  %v1954_v18 = vpop.f32.mrb[13].mxu0  ;;  %v1962_v19 = vpop.f32.mrb[13].mxu1  ;;  %v413_v26 = vadd.f32 %v1724_v20, %v412_v15 }
 0x1ec   :  { %v415_v21 = vpop.f32.mrb[14].mxu0  ;;  %v457_v22 = vpop.f32.mrb[14].mxu1 }
 0x1ed   :  { %v1955_v23 = vpop.f32.mrb[15].mxu0  ;;  %v1963_v24 = vpop.f32.mrb[15].mxu1  ;;  %v1730_v25 = vmul.f32 -1.442695, %v455_v17 }
 0x1ef   :  { %2186 = vpow2.f32 %v1730_v25 }
 0x1f0   :  { %2188 = vtanh.f32 %v413_v26 }
 0x1f1   :  { %v2183_v27 = vpop.eup %2182 }
 0x1f2   :  { %v2185_v28 = vpop.eup %2184  ;;  %v463_v29 = vadd.f32 1.0, %v2183_v27 }
 0x1f3   :  { %v469_v30 = vadd.f32 1.0, %v2185_v28 }
 0x1f4   :  { %2190 = vrcp.f32 %v463_v29 }
 0x1f5   :  { %2192 = vrcp.f32 %v469_v30 }
 0x1f9   :  { %v2187_v31 = vpop.eup %2186 }
 0x1fa   :  { %v2189_v32 = vpop.eup %2188  ;;  %v476_v36 = vadd.f32 1.0, %v2187_v31  ;;  %v1744_v31 = vld [vmem:[%s2759_s0 + $0x6] sm:$0x3] }
 0x1fc   :  { %2194 = vrcp.f32 %v476_v36 }
 0x1fe   :  { %v2191_v33 = vpop.eup %2190 }
 0x1ff   :  { %v2193_v34 = vpop.eup %2192  ;;  %v480_v35 = vmul.f32 %v2191_v33, %v2189_v32  ;;  %v1746_v32 = vld [vmem:[%s2759_s0 + $0x16] sm:$0x3] }
 0x200   :  { %v479_v37 = vmul.f32 %v2193_v34, %v2418_v50 }
 0x202   :  { %v2466_v38 = vadd.f32 %v480_v35, %v479_v37 }
 0x204   :  { %2196 = vtanh.f32 %v2466_v38 }
 0x206   :  { %v2195_v39 = vpop.eup %2194 }
 0x20e   :  { %v2197_v40 = vpop.eup %2196 }
 0x20f   :  { %v483_v41 = vmul.f32 %v2197_v40, %v2195_v39 }
 0x211   :  { %v484_v42 = vpack.c.bf16 %v483_v41, %v483_v41 }
 0x213   :  { %1731 = vst.msk [vmem:[%s2760_s2 + $0x1] sm:$0x1] %vm287_vm3, %v484_v42  ;;  %1969 = vmatmul.mubr.msk.bf16.vlgmr.msra.gmra.mrb[16].mxu0 %vm56_vm2, %v484_v42  ;;  %1977 = vmatmul.mubr.msk.bf16.vlgmr.msra.gmra.mrb[16].mxu1 %vm56_vm2, %v484_v42 }
 0x214   :  { %1981 = vmatpush3.bf16.msra.mxu0 %v2357_v5  ;;  %1989 = vmatpush3.bf16.msra.mxu1 %v2363_v6 }
 0x215   :  { %1982 = vmatprep.subr.bf16.mxu0 %v2298_v0  ;;  %1990 = vmatprep.subr.bf16.mxu1 %v2298_v0 }
 0x216   :  { %1984 = vmatprep.mubr.msk.bf16.mxu0 %vm2299_vm1, %v2298_v0  ;;  %1992 = vmatprep.mubr.msk.bf16.mxu1 %vm2299_vm1, %v2298_v0 }
 0x218   :  { %1983 = vmatpush3.bf16.msra.mxu0 %v2375_v9  ;;  %1991 = vmatpush3.bf16.msra.mxu1 %v2380_v10 }
 0x219   :  { %1996 = vmatprep.subr.bf16.mxu0 %v2298_v0  ;;  %2004 = vmatprep.subr.bf16.mxu1 %v2298_v0 }
 0x21b   :  { %1985 = vmatmul.mubr.msk.bf16.vlgmr.msra.gmra.mrb[20].mxu0 %vm56_vm2, %v484_v42  ;;  %1993 = vmatmul.mubr.msk.bf16.vlgmr.msra.gmra.mrb[20].mxu1 %vm56_vm2, %v484_v42 }
 0x21c   :  { %1997 = vmatpush3.bf16.msra.mxu0 %v2325_v1  ;;  %2005 = vmatpush3.bf16.msra.mxu1 %v2334_v2 }
 0x21d   :  { %1998 = vmatprep.subr.bf16.mxu0 %v2298_v0  ;;  %2006 = vmatprep.subr.bf16.mxu1 %v2298_v0 }
 0x21e   :  { %2000 = vmatprep.mubr.msk.bf16.mxu0 %vm2299_vm1, %v2298_v0  ;;  %2008 = vmatprep.mubr.msk.bf16.mxu1 %vm2299_vm1, %v2298_v0 }
 0x220   :  { %1999 = vmatpush3.bf16.msra.mxu0 %v2344_v3  ;;  %2007 = vmatpush3.bf16.msra.mxu1 %v2351_v4 }
 0x221   :  { %2012 = vmatprep.subr.bf16.mxu0 %v2298_v0  ;;  %2020 = vmatprep.subr.bf16.mxu1 %v2298_v0 }
 0x2e6   :  { %v526_v45 = vpop.f32.mrb[16].mxu0  ;;  %v568_v46 = vpop.f32.mrb[16].mxu1 }
 0x2e7   :  { %v527_v47 = vadd.f32 %v1732_v43, %v526_v45  ;;  %v569_v48 = vadd.f32 %v1734_v44, %v568_v46  ;;  %v1970_v49 = vpop.f32.mrb[17].mxu0  ;;  %v1978_v50 = vpop.f32.mrb[17].mxu1  ;;  %v1750_v45 = vld [vmem:[%s2759_s0 + $0x36] sm:$0x3] }
 0x2e8   :  { %v529_v51 = vpop.f32.mrb[18].mxu0  ;;  %v571_v52 = vpop.f32.mrb[18].mxu1 }
 0x2e9   :  { %v1740_v53 = vmul.f32 -1.442695, %v527_v47  ;;  %v1741_v54 = vmul.f32 -1.442695, %v569_v48  ;;  %v1971_v55 = vpop.f32.mrb[19].mxu0  ;;  %v1979_v56 = vpop.f32.mrb[19].mxu1 }
 0x2ea   :  { %v1748_v51 = vld [vmem:[%s2759_s0 + $0x26] sm:$0x3] }
 0x2eb   :  { %2198 = vpow2.f32 %v1740_v53 }
 0x2ec   :  { %2200 = vpow2.f32 %v1741_v54 }
 0x2ee   :  { %v610_v58 = vpop.f32.mrb[20].mxu0  ;;  %v652_v59 = vpop.f32.mrb[20].mxu1 }
 0x2ef   :  { %v653_v60 = vadd.f32 %v1738_v57, %v652_v59  ;;  %v1986_v61 = vpop.f32.mrb[21].mxu0  ;;  %v1994_v62 = vpop.f32.mrb[21].mxu1  ;;  %v611_v14 = vadd.f32 %v1736_v63, %v610_v58 }
 0x2f0   :  { %v613_v7 = vpop.f32.mrb[22].mxu0  ;;  %v655_v8 = vpop.f32.mrb[22].mxu1 }
 0x2f1   :  { %v1987_v11 = vpop.f32.mrb[23].mxu0  ;;  %v1995_v12 = vpop.f32.mrb[23].mxu1  ;;  %v1742_v13 = vmul.f32 -1.442695, %v653_v60 }
 0x2f3   :  { %2202 = vpow2.f32 %v1742_v13 }
 0x2f4   :  { %2204 = vtanh.f32 %v611_v14 }
 0x2f5   :  { %v2199_v15 = vpop.eup %2198 }
 0x2f6   :  { %v2201_v16 = vpop.eup %2200  ;;  %v661_v17 = vadd.f32 1.0, %v2199_v15 }
 0x2f7   :  { %v667_v18 = vadd.f32 1.0, %v2201_v16 }
 0x2f8   :  { %2206 = vrcp.f32 %v661_v17 }
 0x2f9   :  { %2208 = vrcp.f32 %v667_v18 }
 0x2fd   :  { %v2203_v19 = vpop.eup %2202 }
 0x2fe   :  { %v2205_v20 = vpop.eup %2204  ;;  %v674_v24 = vadd.f32 1.0, %v2203_v19  ;;  %v1756_v19 = vld [vmem:[%s2759_s0 + $0x8] sm:$0x3] }
 0x300   :  { %2210 = vrcp.f32 %v674_v24 }
 0x302   :  { %v2207_v21 = vpop.eup %2206 }
 0x303   :  { %v2209_v22 = vpop.eup %2208  ;;  %v678_v23 = vmul.f32 %v2207_v21, %v2205_v20  ;;  %v1758_v20 = vld [vmem:[%s2759_s0 + $0x18] sm:$0x3] }
 0x304   :  { %v677_v25 = vmul.f32 %v2209_v22, %v2466_v38 }
 0x306   :  { %v2514_v26 = vadd.f32 %v678_v23, %v677_v25 }
 0x308   :  { %2212 = vtanh.f32 %v2514_v26 }
 0x30a   :  { %v2211_v27 = vpop.eup %2210 }
 0x312   :  { %v2213_v28 = vpop.eup %2212 }
 0x313   :  { %v681_v29 = vmul.f32 %v2213_v28, %v2211_v27 }
 0x315   :  { %v682_v30 = vpack.c.bf16 %v681_v29, %v681_v29 }
 0x317   :  { %1743 = vst.msk [vmem:[%s2760_s2 + $0x2] sm:$0x1] %vm287_vm3, %v682_v30  ;;  %2001 = vmatmul.mubr.msk.bf16.vlgmr.msra.gmra.mrb[24].mxu0 %vm56_vm2, %v682_v30  ;;  %2009 = vmatmul.mubr.msk.bf16.vlgmr.msra.gmra.mrb[24].mxu1 %vm56_vm2, %v682_v30 }
 0x318   :  { %2013 = vmatpush3.bf16.msra.mxu0 %v2357_v5  ;;  %2021 = vmatpush3.bf16.msra.mxu1 %v2363_v6 }
 0x319   :  { %2014 = vmatprep.subr.bf16.mxu0 %v2298_v0  ;;  %2022 = vmatprep.subr.bf16.mxu1 %v2298_v0 }
 0x31a   :  { %2016 = vmatprep.mubr.msk.bf16.mxu0 %vm2299_vm1, %v2298_v0  ;;  %2024 = vmatprep.mubr.msk.bf16.mxu1 %vm2299_vm1, %v2298_v0 }
 0x31c   :  { %2015 = vmatpush3.bf16.msra.mxu0 %v2375_v9  ;;  %2023 = vmatpush3.bf16.msra.mxu1 %v2380_v10 }
 0x31d   :  { %2028 = vmatprep.subr.bf16.mxu0 %v2298_v0  ;;  %2036 = vmatprep.subr.bf16.mxu1 %v2298_v0 }
 0x31f   :  { %2017 = vmatmul.mubr.msk.bf16.vlgmr.msra.gmra.mrb[28].mxu0 %vm56_vm2, %v682_v30  ;;  %2025 = vmatmul.mubr.msk.bf16.vlgmr.msra.gmra.mrb[28].mxu1 %vm56_vm2, %v682_v30 }
 0x320   :  { %2029 = vmatpush3.bf16.msra.mxu0 %v2325_v1  ;;  %2037 = vmatpush3.bf16.msra.mxu1 %v2334_v2 }
 0x321   :  { %2030 = vmatprep.subr.bf16.mxu0 %v2298_v0  ;;  %2038 = vmatprep.subr.bf16.mxu1 %v2298_v0 }
 0x322   :  { %2032 = vmatprep.mubr.msk.bf16.mxu0 %vm2299_vm1, %v2298_v0  ;;  %2040 = vmatprep.mubr.msk.bf16.mxu1 %vm2299_vm1, %v2298_v0 }
 0x324   :  { %2031 = vmatpush3.bf16.msra.mxu0 %v2344_v3  ;;  %2039 = vmatpush3.bf16.msra.mxu1 %v2351_v4 }
 0x325   :  { %2044 = vmatprep.subr.bf16.mxu0 %v2298_v0  ;;  %2052 = vmatprep.subr.bf16.mxu1 %v2298_v0 }
 0x3ea   :  { %v724_v33 = vpop.f32.mrb[24].mxu0  ;;  %v766_v34 = vpop.f32.mrb[24].mxu1 }
 0x3eb   :  { %v725_v35 = vadd.f32 %v1744_v31, %v724_v33  ;;  %v767_v36 = vadd.f32 %v1746_v32, %v766_v34  ;;  %v2002_v37 = vpop.f32.mrb[25].mxu0  ;;  %v2010_v38 = vpop.f32.mrb[25].mxu1  ;;  %v1762_v33 = vld [vmem:[%s2759_s0 + $0x38] sm:$0x3] }
 0x3ec   :  { %v727_v39 = vpop.f32.mrb[26].mxu0  ;;  %v769_v40 = vpop.f32.mrb[26].mxu1 }
 0x3ed   :  { %v1752_v41 = vmul.f32 -1.442695, %v725_v35  ;;  %v1753_v42 = vmul.f32 -1.442695, %v767_v36  ;;  %v2003_v43 = vpop.f32.mrb[27].mxu0  ;;  %v2011_v44 = vpop.f32.mrb[27].mxu1 }
 0x3ee   :  { %v1760_v39 = vld [vmem:[%s2759_s0 + $0x28] sm:$0x3] }
 0x3ef   :  { %2214 = vpow2.f32 %v1752_v41 }
 0x3f0   :  { %2216 = vpow2.f32 %v1753_v42 }
 0x3f2   :  { %v808_v46 = vpop.f32.mrb[28].mxu0  ;;  %v850_v47 = vpop.f32.mrb[28].mxu1 }
 0x3f3   :  { %v851_v48 = vadd.f32 %v1750_v45, %v850_v47  ;;  %v2018_v49 = vpop.f32.mrb[29].mxu0  ;;  %v2026_v50 = vpop.f32.mrb[29].mxu1  ;;  %v809_v57 = vadd.f32 %v1748_v51, %v808_v46 }
 0x3f4   :  { %v811_v52 = vpop.f32.mrb[30].mxu0  ;;  %v853_v53 = vpop.f32.mrb[30].mxu1 }
 0x3f5   :  { %v2019_v54 = vpop.f32.mrb[31].mxu0  ;;  %v2027_v55 = vpop.f32.mrb[31].mxu1  ;;  %v1754_v56 = vmul.f32 -1.442695, %v851_v48 }
 0x3f7   :  { %2218 = vpow2.f32 %v1754_v56 }
 0x3f8   :  { %2220 = vtanh.f32 %v809_v57 }
 0x3f9   :  { %v2215_v58 = vpop.eup %2214 }
 0x3fa   :  { %v2217_v59 = vpop.eup %2216  ;;  %v859_v60 = vadd.f32 1.0, %v2215_v58 }
 0x3fb   :  { %v865_v61 = vadd.f32 1.0, %v2217_v59 }
 0x3fc   :  { %2222 = vrcp.f32 %v859_v60 }
 0x3fd   :  { %2224 = vrcp.f32 %v865_v61 }
 0x401   :  { %v2219_v62 = vpop.eup %2218 }
 0x402   :  { %v2221_v63 = vpop.eup %2220  ;;  %v872_v12 = vadd.f32 1.0, %v2219_v62  ;;  %v1768_v62 = vld [vmem:[%s2759_s0 + $0xa] sm:$0x3] }
 0x404   :  { %2226 = vrcp.f32 %v872_v12 }
 0x406   :  { %v2223_v7 = vpop.eup %2222 }
 0x407   :  { %v2225_v8 = vpop.eup %2224  ;;  %v876_v11 = vmul.f32 %v2223_v7, %v2221_v63  ;;  %v1770_v63 = vld [vmem:[%s2759_s0 + $0x1a] sm:$0x3] }
 0x408   :  { %v875_v13 = vmul.f32 %v2225_v8, %v2514_v26 }
 0x40a   :  { %v2562_v14 = vadd.f32 %v876_v11, %v875_v13 }
 0x40c   :  { %2228 = vtanh.f32 %v2562_v14 }
 0x40e   :  { %v2227_v15 = vpop.eup %2226 }
 0x416   :  { %v2229_v16 = vpop.eup %2228 }
 0x417   :  { %v879_v17 = vmul.f32 %v2229_v16, %v2227_v15 }
 0x419   :  { %v880_v18 = vpack.c.bf16 %v879_v17, %v879_v17 }
 0x41b   :  { %1755 = vst.msk [vmem:[%s2760_s2 + $0x3] sm:$0x1] %vm287_vm3, %v880_v18  ;;  %2033 = vmatmul.mubr.msk.bf16.vlgmr.msra.gmra.mrb[32].mxu0 %vm56_vm2, %v880_v18  ;;  %2041 = vmatmul.mubr.msk.bf16.vlgmr.msra.gmra.mrb[32].mxu1 %vm56_vm2, %v880_v18 }
 0x41c   :  { %2045 = vmatpush3.bf16.msra.mxu0 %v2357_v5  ;;  %2053 = vmatpush3.bf16.msra.mxu1 %v2363_v6 }
 0x41d   :  { %2046 = vmatprep.subr.bf16.mxu0 %v2298_v0  ;;  %2054 = vmatprep.subr.bf16.mxu1 %v2298_v0 }
 0x41e   :  { %2048 = vmatprep.mubr.msk.bf16.mxu0 %vm2299_vm1, %v2298_v0  ;;  %2056 = vmatprep.mubr.msk.bf16.mxu1 %vm2299_vm1, %v2298_v0 }
 0x420   :  { %2047 = vmatpush3.bf16.msra.mxu0 %v2375_v9  ;;  %2055 = vmatpush3.bf16.msra.mxu1 %v2380_v10 }
 0x421   :  { %2060 = vmatprep.subr.bf16.mxu0 %v2298_v0  ;;  %2068 = vmatprep.subr.bf16.mxu1 %v2298_v0 }
 0x423   :  { %2049 = vmatmul.mubr.msk.bf16.vlgmr.msra.gmra.mrb[36].mxu0 %vm56_vm2, %v880_v18  ;;  %2057 = vmatmul.mubr.msk.bf16.vlgmr.msra.gmra.mrb[36].mxu1 %vm56_vm2, %v880_v18 }
 0x424   :  { %2061 = vmatpush3.bf16.msra.mxu0 %v2325_v1  ;;  %2069 = vmatpush3.bf16.msra.mxu1 %v2334_v2 }
 0x425   :  { %2062 = vmatprep.subr.bf16.mxu0 %v2298_v0  ;;  %2070 = vmatprep.subr.bf16.mxu1 %v2298_v0 }
 0x426   :  { %2064 = vmatprep.mubr.msk.bf16.mxu0 %vm2299_vm1, %v2298_v0  ;;  %2072 = vmatprep.mubr.msk.bf16.mxu1 %vm2299_vm1, %v2298_v0 }
 0x428   :  { %2063 = vmatpush3.bf16.msra.mxu0 %v2344_v3  ;;  %2071 = vmatpush3.bf16.msra.mxu1 %v2351_v4 }
 0x429   :  { %2076 = vmatprep.subr.bf16.mxu0 %v2298_v0  ;;  %2084 = vmatprep.subr.bf16.mxu1 %v2298_v0 }
 0x4ee   :  { %v922_v21 = vpop.f32.mrb[32].mxu0  ;;  %v964_v22 = vpop.f32.mrb[32].mxu1 }
 0x4ef   :  { %v923_v23 = vadd.f32 %v1756_v19, %v922_v21  ;;  %v965_v24 = vadd.f32 %v1758_v20, %v964_v22  ;;  %v2034_v25 = vpop.f32.mrb[33].mxu0  ;;  %v2042_v26 = vpop.f32.mrb[33].mxu1  ;;  %v1774_v21 = vld [vmem:[%s2759_s0 + $0x3a] sm:$0x3] }
 0x4f0   :  { %v925_v27 = vpop.f32.mrb[34].mxu0  ;;  %v967_v28 = vpop.f32.mrb[34].mxu1 }
 0x4f1   :  { %v1764_v29 = vmul.f32 -1.442695, %v923_v23  ;;  %v1765_v30 = vmul.f32 -1.442695, %v965_v24  ;;  %v2035_v31 = vpop.f32.mrb[35].mxu0  ;;  %v2043_v32 = vpop.f32.mrb[35].mxu1 }
 0x4f2   :  { %v1772_v27 = vld [vmem:[%s2759_s0 + $0x2a] sm:$0x3] }
 0x4f3   :  { %2230 = vpow2.f32 %v1764_v29 }
 0x4f4   :  { %2232 = vpow2.f32 %v1765_v30 }
 0x4f6   :  { %v1006_v34 = vpop.f32.mrb[36].mxu0  ;;  %v1048_v35 = vpop.f32.mrb[36].mxu1 }
 0x4f7   :  { %v1049_v36 = vadd.f32 %v1762_v33, %v1048_v35  ;;  %v2050_v37 = vpop.f32.mrb[37].mxu0  ;;  %v2058_v38 = vpop.f32.mrb[37].mxu1  ;;  %v1007_v45 = vadd.f32 %v1760_v39, %v1006_v34 }
 0x4f8   :  { %v1009_v40 = vpop.f32.mrb[38].mxu0  ;;  %v1051_v41 = vpop.f32.mrb[38].mxu1 }
 0x4f9   :  { %v2051_v42 = vpop.f32.mrb[39].mxu0  ;;  %v2059_v43 = vpop.f32.mrb[39].mxu1  ;;  %v1766_v44 = vmul.f32 -1.442695, %v1049_v36 }
 0x4fb   :  { %2234 = vpow2.f32 %v1766_v44 }
 0x4fc   :  { %2236 = vtanh.f32 %v1007_v45 }
 0x4fd   :  { %v2231_v46 = vpop.eup %2230 }
 0x4fe   :  { %v2233_v47 = vpop.eup %2232  ;;  %v1057_v48 = vadd.f32 1.0, %v2231_v46 }
 0x4ff   :  { %v1063_v49 = vadd.f32 1.0, %v2233_v47 }
 0x500   :  { %2238 = vrcp.f32 %v1057_v48 }
 0x501   :  { %2240 = vrcp.f32 %v1063_v49 }
 0x505   :  { %v2235_v50 = vpop.eup %2234 }
 0x506   :  { %v2237_v51 = vpop.eup %2236  ;;  %v1070_v55 = vadd.f32 1.0, %v2235_v50 }
 0x508   :  { %2242 = vrcp.f32 %v1070_v55 }
 0x50a   :  { %v2239_v52 = vpop.eup %2238 }
 0x50b   :  { %v2241_v53 = vpop.eup %2240  ;;  %v1074_v54 = vmul.f32 %v2239_v52, %v2237_v51 }
 0x50c   :  { %v1073_v56 = vmul.f32 %v2241_v53, %v2562_v14 }
 0x50e   :  { %v2610_v57 = vadd.f32 %v1074_v54, %v1073_v56  ;;  %v1786_v56 = vld [vmem:[%s2759_s0 + $0x3c] sm:$0x3] }
 0x510   :  { %2244 = vtanh.f32 %v2610_v57 }
 0x512   :  { %v2243_v58 = vpop.eup %2242 }
 0x51a   :  { %v2245_v59 = vpop.eup %2244 }
 0x51b   :  { %v1077_v60 = vmul.f32 %v2245_v59, %v2243_v58 }
 0x51d   :  { %v1078_v61 = vpack.c.bf16 %v1077_v60, %v1077_v60 }
 0x51f   :  { %1767 = vst.msk [vmem:[%s2760_s2 + $0x4] sm:$0x1] %vm287_vm3, %v1078_v61  ;;  %2065 = vmatmul.mubr.msk.bf16.vlgmr.msra.gmra.mrb[40].mxu0 %vm56_vm2, %v1078_v61  ;;  %2073 = vmatmul.mubr.msk.bf16.vlgmr.msra.gmra.mrb[40].mxu1 %vm56_vm2, %v1078_v61 }
 0x520   :  { %2077 = vmatpush3.bf16.msra.mxu0 %v2357_v5  ;;  %2085 = vmatpush3.bf16.msra.mxu1 %v2363_v6 }
 0x521   :  { %2078 = vmatprep.subr.bf16.mxu0 %v2298_v0  ;;  %2086 = vmatprep.subr.bf16.mxu1 %v2298_v0 }
 0x522   :  { %2080 = vmatprep.mubr.msk.bf16.mxu0 %vm2299_vm1, %v2298_v0  ;;  %2088 = vmatprep.mubr.msk.bf16.mxu1 %vm2299_vm1, %v2298_v0 }
 0x524   :  { %2079 = vmatpush3.bf16.msra.mxu0 %v2375_v9  ;;  %2087 = vmatpush3.bf16.msra.mxu1 %v2380_v10 }
 0x525   :  { %2092 = vmatprep.subr.bf16.mxu0 %v2298_v0  ;;  %2100 = vmatprep.subr.bf16.mxu1 %v2298_v0 }
 0x527   :  { %2081 = vmatmul.mubr.msk.bf16.vlgmr.msra.gmra.mrb[44].mxu0 %vm56_vm2, %v1078_v61  ;;  %2089 = vmatmul.mubr.msk.bf16.vlgmr.msra.gmra.mrb[44].mxu1 %vm56_vm2, %v1078_v61 }
 0x528   :  { %2093 = vmatpush3.bf16.msra.mxu0 %v2325_v1  ;;  %2101 = vmatpush3.bf16.msra.mxu1 %v2334_v2 }
 0x529   :  { %2094 = vmatprep.subr.bf16.mxu0 %v2298_v0  ;;  %2102 = vmatprep.subr.bf16.mxu1 %v2298_v0 }
 0x52a   :  { %2096 = vmatprep.mubr.msk.bf16.mxu0 %vm2299_vm1, %v2298_v0  ;;  %2104 = vmatprep.mubr.msk.bf16.mxu1 %vm2299_vm1, %v2298_v0 }
 0x52c   :  { %2095 = vmatpush3.bf16.msra.mxu0 %v2344_v3  ;;  %2103 = vmatpush3.bf16.msra.mxu1 %v2351_v4 }
 0x52d   :  { %2108 = vmatprep.subr.bf16.mxu0 %v2298_v0  ;;  %2116 = vmatprep.subr.bf16.mxu1 %v2298_v0 }
 0x5f2   :  { %v1120_v7 = vpop.f32.mrb[40].mxu0  ;;  %v1162_v8 = vpop.f32.mrb[40].mxu1 }
 0x5f3   :  { %v1121_v11 = vadd.f32 %v1768_v62, %v1120_v7  ;;  %v1163_v12 = vadd.f32 %v1770_v63, %v1162_v8  ;;  %v2066_v13 = vpop.f32.mrb[41].mxu0  ;;  %v2074_v14 = vpop.f32.mrb[41].mxu1  ;;  %v1784_v62 = vld [vmem:[%s2759_s0 + $0x2c] sm:$0x3] }
 0x5f4   :  { %v1123_v15 = vpop.f32.mrb[42].mxu0  ;;  %v1165_v16 = vpop.f32.mrb[42].mxu1 }
 0x5f5   :  { %v1776_v17 = vmul.f32 -1.442695, %v1121_v11  ;;  %v1777_v18 = vmul.f32 -1.442695, %v1163_v12  ;;  %v2067_v19 = vpop.f32.mrb[43].mxu0  ;;  %v2075_v20 = vpop.f32.mrb[43].mxu1 }
 0x5f7   :  { %2246 = vpow2.f32 %v1776_v17 }
 0x5f8   :  { %2248 = vpow2.f32 %v1777_v18 }
 0x5fa   :  { %v1204_v22 = vpop.f32.mrb[44].mxu0  ;;  %v1246_v23 = vpop.f32.mrb[44].mxu1 }
 0x5fb   :  { %v1247_v24 = vadd.f32 %v1774_v21, %v1246_v23  ;;  %v2082_v25 = vpop.f32.mrb[45].mxu0  ;;  %v2090_v26 = vpop.f32.mrb[45].mxu1  ;;  %v1205_v33 = vadd.f32 %v1772_v27, %v1204_v22 }
 0x5fc   :  { %v1207_v28 = vpop.f32.mrb[46].mxu0  ;;  %v1249_v29 = vpop.f32.mrb[46].mxu1 }
 0x5fd   :  { %v2083_v30 = vpop.f32.mrb[47].mxu0  ;;  %v2091_v31 = vpop.f32.mrb[47].mxu1  ;;  %v1778_v32 = vmul.f32 -1.442695, %v1247_v24 }
 0x5fe   :  { %v2294_v30 = vld [vmem:[%s2758_s1 + $0x20] sm:$0xff]   ;;  %v2295_v31 = vld [vmem:[%s2758_s1 + $0x30] sm:$0xff]  }
 0x5ff   :  { %2250 = vpow2.f32 %v1778_v32  ;;  %v2296_v32 = vld [vmem:[%s2758_s1 + $0x28] sm:$0xff]  }
 0x600   :  { %2252 = vtanh.f32 %v1205_v33  ;;  %v2297_v33 = vld [vmem:[%s2758_s1 + $0x38] sm:$0xff]  }
 0x601   :  { %v2247_v34 = vpop.eup %2246 }
 0x602   :  { %v2249_v35 = vpop.eup %2248  ;;  %v1255_v36 = vadd.f32 1.0, %v2247_v34  ;;  %v1792_v34 = vld [vmem:[%s2759_s0 + $0xe] sm:$0x3] }
 0x603   :  { %v1261_v37 = vadd.f32 1.0, %v2249_v35 }
 0x604   :  { %2254 = vrcp.f32 %v1255_v36 }
 0x605   :  { %2256 = vrcp.f32 %v1261_v37 }
 0x609   :  { %v2251_v38 = vpop.eup %2250 }
 0x60a   :  { %v2253_v39 = vpop.eup %2252  ;;  %v1268_v43 = vadd.f32 1.0, %v2251_v38 }
 0x60c   :  { %2258 = vrcp.f32 %v1268_v43 }
 0x60e   :  { %v2255_v40 = vpop.eup %2254 }
 0x60f   :  { %v2257_v41 = vpop.eup %2256  ;;  %v1272_v42 = vmul.f32 %v2255_v40, %v2253_v39 }
 0x610   :  { %v1271_v44 = vmul.f32 %v2257_v41, %v2610_v57 }
 0x612   :  { %v2658_v45 = vadd.f32 %v1272_v42, %v1271_v44 }
 0x614   :  { %2260 = vtanh.f32 %v2658_v45 }
 0x616   :  { %v2259_v46 = vpop.eup %2258 }
 0x61e   :  { %v2261_v47 = vpop.eup %2260 }
 0x61f   :  { %v1275_v48 = vmul.f32 %v2261_v47, %v2259_v46  ;;  %v1798_v47 = vld [vmem:[%s2759_s0 + $0x3e] sm:$0x3] }
 0x621   :  { %v1276_v49 = vpack.c.bf16 %v1275_v48, %v1275_v48 }
 0x623   :  { %1779 = vst.msk [vmem:[%s2760_s2 + $0x5] sm:$0x1] %vm287_vm3, %v1276_v49  ;;  %2097 = vmatmul.mubr.msk.bf16.vlgmr.msra.gmra.mrb[48].mxu0 %vm56_vm2, %v1276_v49  ;;  %2105 = vmatmul.mubr.msk.bf16.vlgmr.msra.gmra.mrb[48].mxu1 %vm56_vm2, %v1276_v49 }
 0x624   :  { %2109 = vmatpush3.bf16.msra.mxu0 %v2357_v5  ;;  %2117 = vmatpush3.bf16.msra.mxu1 %v2363_v6 }
 0x625   :  { %2110 = vmatprep.subr.bf16.mxu0 %v2298_v0  ;;  %2118 = vmatprep.subr.bf16.mxu1 %v2298_v0 }
 0x626   :  { %2112 = vmatprep.mubr.msk.bf16.mxu0 %vm2299_vm1, %v2298_v0  ;;  %2120 = vmatprep.mubr.msk.bf16.mxu1 %vm2299_vm1, %v2298_v0 }
 0x628   :  { %2111 = vmatpush3.bf16.msra.mxu0 %v2375_v9  ;;  %2119 = vmatpush3.bf16.msra.mxu1 %v2380_v10 }
 0x629   :  { %2124 = vmatprep.subr.bf16.mxu0 %v2298_v0  ;;  %2132 = vmatprep.subr.bf16.mxu1 %v2298_v0 }
 0x62b   :  { %2113 = vmatmul.mubr.msk.bf16.vlgmr.msra.gmra.mrb[52].mxu0 %vm56_vm2, %v1276_v49  ;;  %2121 = vmatmul.mubr.msk.bf16.vlgmr.msra.gmra.mrb[52].mxu1 %vm56_vm2, %v1276_v49 }
 0x62c   :  { %2125 = vmatpush3.bf16.msra.mxu0 %v2325_v1  ;;  %2133 = vmatpush3.bf16.msra.mxu1 %v2334_v2  ;;  %v1780_v1 = vld [vmem:[%s2759_s0 + $0xc] sm:$0x3]  ;;  %v1782_v2 = vld [vmem:[%s2759_s0 + $0x1c] sm:$0x3] }
 0x62d   :  { %2126 = vmatprep.subr.bf16.mxu0 %v2298_v0  ;;  %2134 = vmatprep.subr.bf16.mxu1 %v2298_v0 }
 0x62e   :  { %2128 = vmatprep.mubr.msk.bf16.mxu0 %vm2299_vm1, %v2298_v0  ;;  %2136 = vmatprep.mubr.msk.bf16.mxu1 %vm2299_vm1, %v2298_v0 }
 0x630   :  { %2127 = vmatpush3.bf16.msra.mxu0 %v2344_v3  ;;  %2135 = vmatpush3.bf16.msra.mxu1 %v2351_v4 }
 0x631   :  { %2140 = vmatprep.subr.bf16.mxu0 %v2298_v0  ;;  %2148 = vmatprep.subr.bf16.mxu1 %v2298_v0 }
 0x6f6   :  { %v1318_v5 = vpop.f32.mrb[48].mxu0  ;;  %v1360_v6 = vpop.f32.mrb[48].mxu1 }
 0x6f7   :  { %v1319_v9 = vadd.f32 %v1780_v1, %v1318_v5  ;;  %v1361_v10 = vadd.f32 %v1782_v2, %v1360_v6  ;;  %v2098_v50 = vpop.f32.mrb[49].mxu0  ;;  %v2106_v3 = vpop.f32.mrb[49].mxu1  ;;  %v1796_v6 = vld [vmem:[%s2759_s0 + $0x2e] sm:$0x3] }
 0x6f8   :  { %v1321_v51 = vpop.f32.mrb[50].mxu0  ;;  %v1363_v4 = vpop.f32.mrb[50].mxu1 }
 0x6f9   :  { %v1788_v52 = vmul.f32 -1.442695, %v1319_v9  ;;  %v1789_v53 = vmul.f32 -1.442695, %v1361_v10  ;;  %v2099_v54 = vpop.f32.mrb[51].mxu0  ;;  %v2107_v55 = vpop.f32.mrb[51].mxu1 }
 0x6fb   :  { %2262 = vpow2.f32 %v1788_v52 }
 0x6fc   :  { %2264 = vpow2.f32 %v1789_v53 }
 0x6fe   :  { %v1402_v57 = vpop.f32.mrb[52].mxu0  ;;  %v1444_v58 = vpop.f32.mrb[52].mxu1 }
 0x6ff   :  { %v1445_v59 = vadd.f32 %v1786_v56, %v1444_v58  ;;  %v2114_v60 = vpop.f32.mrb[53].mxu0  ;;  %v2122_v61 = vpop.f32.mrb[53].mxu1  ;;  %v1403_v13 = vadd.f32 %v1784_v62, %v1402_v57 }
 0x700   :  { %v1405_v63 = vpop.f32.mrb[54].mxu0  ;;  %v1447_v7 = vpop.f32.mrb[54].mxu1 }
 0x701   :  { %v2115_v8 = vpop.f32.mrb[55].mxu0  ;;  %v2123_v11 = vpop.f32.mrb[55].mxu1  ;;  %v1790_v12 = vmul.f32 -1.442695, %v1445_v59 }
 0x703   :  { %2266 = vpow2.f32 %v1790_v12 }
 0x704   :  { %2268 = vtanh.f32 %v1403_v13 }
 0x705   :  { %v2263_v14 = vpop.eup %2262 }
 0x706   :  { %v2265_v15 = vpop.eup %2264  ;;  %v1453_v16 = vadd.f32 1.0, %v2263_v14 }
 0x707   :  { %v1459_v17 = vadd.f32 1.0, %v2265_v15 }
 0x708   :  { %2270 = vrcp.f32 %v1453_v16 }
 0x709   :  { %2272 = vrcp.f32 %v1459_v17 }
 0x70d   :  { %v2267_v18 = vpop.eup %2266 }
 0x70e   :  { %v2269_v19 = vpop.eup %2268  ;;  %v1466_v23 = vadd.f32 1.0, %v2267_v18 }
 0x710   :  { %2274 = vrcp.f32 %v1466_v23 }
 0x712   :  { %v2271_v20 = vpop.eup %2270 }
 0x713   :  { %v2273_v21 = vpop.eup %2272  ;;  %v1470_v22 = vmul.f32 %v2271_v20, %v2269_v19 }
 0x714   :  { %v1469_v24 = vmul.f32 %v2273_v21, %v2658_v45 }
 0x716   :  { %v2706_v25 = vadd.f32 %v1470_v22, %v1469_v24 }
 0x718   :  { %2276 = vtanh.f32 %v2706_v25 }
 0x71a   :  { %v2275_v26 = vpop.eup %2274 }
 0x722   :  { %v2277_v27 = vpop.eup %2276 }
 0x723   :  { %v1473_v28 = vmul.f32 %v2277_v27, %v2275_v26 }
 0x725   :  { %v1474_v29 = vpack.c.bf16 %v1473_v28, %v1473_v28 }
 0x727   :  { %1791 = vst.msk [vmem:[%s2760_s2 + $0x6] sm:$0x1] %vm287_vm3, %v1474_v29  ;;  %2129 = vmatmul.mubr.msk.bf16.vlgmr.msra.gmra.mrb[56].mxu0 %vm56_vm2, %v1474_v29  ;;  %2137 = vmatmul.mubr.msk.bf16.vlgmr.msra.gmra.mrb[56].mxu1 %vm56_vm2, %v1474_v29 }
 0x728   :  { %2141 = vmatpush3.bf16.msra.mxu0 %v2294_v30  ;;  %2149 = vmatpush3.bf16.msra.mxu1 %v2295_v31 }
 0x729   :  { %2142 = vmatprep.subr.bf16.mxu0 %v2298_v0  ;;  %2150 = vmatprep.subr.bf16.mxu1 %v2298_v0 }
 0x72a   :  { %2144 = vmatprep.mubr.msk.bf16.mxu0 %vm2299_vm1, %v2298_v0  ;;  %2152 = vmatprep.mubr.msk.bf16.mxu1 %vm2299_vm1, %v2298_v0  ;;  %v1794_v0 = vld [vmem:[%s2759_s0 + $0x1e] sm:$0x3] }
 0x72c   :  { %2143 = vmatpush3.bf16.msra.mxu0 %v2296_v32  ;;  %2151 = vmatpush3.bf16.msra.mxu1 %v2297_v33 }
 0x72f   :  { %2145 = vmatmul.mubr.msk.bf16.vlgmr.msra.gmra.mrb[60].mxu0 %vm56_vm2, %v1474_v29  ;;  %2153 = vmatmul.mubr.msk.bf16.vlgmr.msra.gmra.mrb[60].mxu1 %vm56_vm2, %v1474_v29 }
 0x7fa   :  { %v1516_v35 = vpop.f32.mrb[56].mxu0  ;;  %v1558_v36 = vpop.f32.mrb[56].mxu1 }
 0x7fb   :  { %v1517_v37 = vadd.f32 %v1792_v34, %v1516_v35  ;;  %v1559_v38 = vadd.f32 %v1794_v0, %v1558_v36  ;;  %v2130_v39 = vpop.f32.mrb[57].mxu0  ;;  %v2138_v40 = vpop.f32.mrb[57].mxu1 }
 0x7fc   :  { %v1519_v41 = vpop.f32.mrb[58].mxu0  ;;  %v1561_v42 = vpop.f32.mrb[58].mxu1 }
 0x7fd   :  { %v1800_v43 = vmul.f32 -1.442695, %v1517_v37  ;;  %v1801_v44 = vmul.f32 -1.442695, %v1559_v38  ;;  %v2131_v45 = vpop.f32.mrb[59].mxu0  ;;  %v2139_v46 = vpop.f32.mrb[59].mxu1 }
 0x7ff   :  { %2278 = vpow2.f32 %v1800_v43 }
 0x800   :  { %2280 = vpow2.f32 %v1801_v44 }
 0x802   :  { %v1600_v48 = vpop.f32.mrb[60].mxu0  ;;  %v1642_v49 = vpop.f32.mrb[60].mxu1 }
 0x803   :  { %v1643_v1 = vadd.f32 %v1798_v47, %v1642_v49  ;;  %v2146_v2 = vpop.f32.mrb[61].mxu0  ;;  %v2154_v5 = vpop.f32.mrb[61].mxu1  ;;  %v1601_v4 = vadd.f32 %v1796_v6, %v1600_v48 }
 0x804   :  { %v1603_v9 = vpop.f32.mrb[62].mxu0  ;;  %v1645_v10 = vpop.f32.mrb[62].mxu1 }
 0x805   :  { %v2147_v50 = vpop.f32.mrb[63].mxu0  ;;  %v2155_v3 = vpop.f32.mrb[63].mxu1  ;;  %v1802_v51 = vmul.f32 -1.442695, %v1643_v1 }
 0x807   :  { %2282 = vpow2.f32 %v1802_v51 }
 0x808   :  { %2284 = vtanh.f32 %v1601_v4 }
 0x809   :  { %v2279_v52 = vpop.eup %2278 }
 0x80a   :  { %v2281_v53 = vpop.eup %2280  ;;  %v1651_v54 = vadd.f32 1.0, %v2279_v52 }
 0x80b   :  { %v1657_v55 = vadd.f32 1.0, %v2281_v53 }
 0x80c   :  { %2286 = vrcp.f32 %v1651_v54 }
 0x80d   :  { %2288 = vrcp.f32 %v1657_v55 }
 0x811   :  { %v2283_v56 = vpop.eup %2282 }
 0x812   :  { %v2285_v57 = vpop.eup %2284  ;;  %v1664_v61 = vadd.f32 1.0, %v2283_v56 }
 0x814   :  { %2290 = vrcp.f32 %v1664_v61 }
 0x816   :  { %v2287_v58 = vpop.eup %2286 }
 0x817   :  { %v2289_v59 = vpop.eup %2288  ;;  %v1668_v60 = vmul.f32 %v2287_v58, %v2285_v57 }
 0x818   :  { %v1667_v62 = vmul.f32 %v2289_v59, %v2706_v25 }
 0x81a   :  { %v1669_v63 = vadd.f32 %v1668_v60, %v1667_v62 }
 0x81c   :  { %2292 = vtanh.f32 %v1669_v63  ;;  %1677 = vst.msk [vmem:[#allocation3] sm:$0x3] %vm18_vm0, %v1669_v63  ;;  %1681 = vst.msk [vmem:[%s2761_s3] sm:$0x3] %vm18_vm0, %v1669_v63 }
 0x81e   :  { %v2291_v7 = vpop.eup %2290 }
 0x826   :  { %v2293_v8 = vpop.eup %2292 }
 0x827   :  { %v1671_v11 = vmul.f32 %v2293_v8, %v2291_v7 }
 0x829   :  { %v1672_v12 = vpack.c.bf16 %v1671_v11, %v1671_v11  ;;  %1676 = vst.msk [vmem:[#allocation2] sm:$0x3] %vm18_vm0, %v1671_v11 }
 0x82b   :  { %1803 = vst.msk [vmem:[%s2760_s2 + $0x7] sm:$0x1] %vm287_vm3, %v1672_v12 }

</bundles_post_ra>
